<compile_context>
chip_gen: v5e
topology: v5e:2x2
jax: 0.10.0
libtpu: 0.0.40
codegen_flags: <defaults>
</compile_context>

<pallas_src>
import functools
import math

import jax
import jax.numpy as jnp
from jax import lax
from jax.experimental import pallas as pl
from jax.experimental.pallas import tpu as pltpu

BN_EPS = 1e-5
D_LIST = (-2, -1, 0, 1, 2)        # conv2 tap offsets (all kernels padded to 5 taps)


# ----------------------------- in-kernel helpers -----------------------------

def _dot_bf16(a, b):              # bf16 MXU operands, f32 accumulation
    return jnp.dot(a.astype(jnp.bfloat16), b.astype(jnp.bfloat16),
                   preferred_element_type=jnp.float32)


def _bnrelu(x, sb):               # eval-mode BN (affine) + ReLU, (C, W) layout
    return jnp.maximum(x * sb[:, 0:1] + sb[:, 1:2], 0.0)


def _shift_w(x, d, w, col):
    """y[:, i] = x[:, i + d] with zero fill outside [0, w) (conv zero-pad)."""
    if d == 0:
        return x
    if w >= 128:                  # wide blocks: XLU lane roll + edge mask
        rolled = pltpu.roll(x, shift=(-d) % w, axis=1)
        mask = (col < w - d) if d > 0 else (col >= -d)
        return jnp.where(mask, rolled, 0.0)
    # narrow tail blocks: tiny slice + concat (always lowers, few bytes)
    z = jnp.zeros((x.shape[0], abs(d)), x.dtype)
    if d > 0:
        return jnp.concatenate([x[:, d:w], z], axis=1)
    return jnp.concatenate([z, x[:, :w + d]], axis=1)


# ----------------------------- fused Pallas kernel -----------------------------

def _densenet_kernel(*refs, treedef, n_params, plan):
    x_ref = refs[0]
    kp = jax.tree_util.tree_unflatten(treedef, refs[1:1 + n_params])
    out_ref = refs[1 + n_params]
    fscr = refs[-1]                                 # concatenated features (Cmax, Wp0)

    nif = plan['nif']
    growth = plan['growth']
    cmax = plan['cmax']
    wp0 = plan['wp0']

    # ---- stem: conv0 + norm0/relu0 + maxpool0, only the kept stride-2 positions ----
    xin = x_ref[0]                                  # (16, Wp0): 11 im2col taps + zero pad
    sh0 = kp['b0'][...]                             # (nif, 1) norm0 shift (scale folded in w0)
    cols = lax.broadcasted_iota(jnp.int32, (1, wp0), 1)
    branches = []
    for j in range(3):                              # pool window positions p = 2w-1, 2w, 2w+1
        y = jnp.maximum(_dot_bf16(kp['w0'][j], xin) + sh0, 0.0)
        if j == 0:
            y = jnp.where(cols >= 1, y, 0.0)        # p = -1 is maxpool padding (post-ReLU, 0 safe)
        if j == 2 and plan['pool0_right_mask']:
            y = jnp.where(cols < wp0 - 1, y, 0.0)   # p = Wc0 is maxpool padding
        branches.append(y)
    m = jnp.maximum(jnp.maximum(branches[0], branches[1]), branches[2])

    fscr[...] = jnp.zeros(fscr.shape, jnp.float32)  # defined zeros in unused channel rows
    fscr[0:nif, 0:wp0] = m

    # ---- dense blocks + transitions (features stay concatenated in fscr) ----
    li = 0
    ntrans = len(plan['trans_cout'])
    for bi, (n_layers, pad_l, wcur) in enumerate(plan['blocks']):
        nf = plan['block_nf'][bi]
        col = (lax.broadcasted_iota(jnp.int32, (1, wcur), 1) if wcur >= 128 else None)
        for j in range(n_layers):
            # norm1 + relu1 + conv1 (1x1): ONE matmul over the whole concatenation.
            h = _bnrelu(fscr[0:cmax, 0:wcur], kp['n1'][li])        # (Cmax, W)
            g = _dot_bf16(kp['w1t'][li], h)                        # (cmid, W)
            # norm2 + relu2
            h2 = _bnrelu(g, kp['n2'][li])
            # conv2 (1xK, zero pad): shifted taps, back-to-back accumulated matmuls.
            acc = None
            for didx, d in enumerate(D_LIST):
                if abs(d) > pad_l:
                    continue
                part = _shift_w(h2, d, wcur, col)
                t = _dot_bf16(kp['w2'][li * len(D_LIST) + didx], part)
                acc = t if acc is None else acc + t
            # TODO(synk): training-mode F.dropout(p=0.5) skipped (eval identity).
            c0 = nf + j * growth
            fscr[c0:c0 + growth, 0:wcur] = acc                     # aligned 8-sublane append
            li += 1

        if bi < ntrans:
            cout = plan['trans_cout'][bi]
            zin = _bnrelu(fscr[0:cmax, 0:wcur], kp['nt'][bi])
            z = _dot_bf16(kp['wt'][bi], zin)[0:cout]               # 1x1 transition conv
            zp = _dot_bf16(z, kp['avg'][bi][...])                  # AvgPool2d((1,2), s=2)
            fscr[0:cout, 0:wcur // 2] = zp

    # ---- norm5/relu5 + avg_pool2d((1,7), stride=1) + classifier ----
    cfin, wlast, wf = plan['cfin'], plan['wlast'], plan['wf']
    a = _bnrelu(fscr[0:cfin, 0:wlast], kp['n5'][...])              # (Cfin, Wlast)
    pooled = _dot_bf16(a, kp['pavg'][...])                         # (Cfin, Wf)
    if plan['fuse_head']:
        acc = kp['bhead'][...]                                     # (ncls_pad, 1)
        for w in range(wf):
            acc = acc + _dot_bf16(kp['whead'][w], pooled[:, w:w + 1])
        out_ref[0] = jnp.broadcast_to(acc, (plan['ncls_pad'], 128))  # dense store
    else:
        out_ref[0] = pooled


# ----------------------------- parameter packing -----------------------------

def _pack_norm(scale, shift, cpad):
    # (1, C) scale / shift -> (cpad, 2) [scale | shift], zero padded channels
    sb = jnp.stack([scale[0], shift[0]], axis=1)
    c = sb.shape[0]
    if cpad > c:
        sb = jnp.pad(sb, ((0, cpad - c), (0, 0)))
    return sb.astype(jnp.float32)


def _avg_matrix(w):
    wn = w // 2
    i = jnp.arange(w)[:, None]
    j = jnp.arange(wn)[None, :]
    return (((i == 2 * j) | (i == 2 * j + 1)).astype(jnp.float32) * 0.5
            ).astype(jnp.bfloat16)


def _pool7_matrix(wlast, wf):
    i = jnp.arange(wlast)[:, None]
    j = jnp.arange(wf)[None, :]
    return (((i >= j) & (i <= j + 6)).astype(jnp.float32) / 7.0).astype(jnp.bfloat16)


def _build_kernel_params(params, plan):
    nif, growth, cmid, cmax = plan['nif'], plan['growth'], plan['cmid'], plan['cmax']

    # stem: fold norm0 scale into the three shifted conv0 weight matrices
    s0, b0 = params['norm0']
    conv0 = params['conv0']                                   # (7, 1, nif)
    base = (conv0[:, 0, :] * s0).T                            # (nif, 7)
    w0 = jnp.zeros((3, nif, 16), jnp.float32)
    for j in range(3):
        w0 = w0.at[j, :, 2 * j:2 * j + 7].set(base)
    kp = {'w0': w0.astype(jnp.bfloat16),
          'b0': jnp.transpose(b0).astype(jnp.float32)}

    # dense layers, stacked per category (channels zero-padded to cmax)
    n1s, w1s, n2s, w2s = [], [], [], []
    for layers in params['blocks']:
        for lp in layers:
            s1, sh1 = lp['norm1']
            cin = s1.shape[1]
            n1s.append(_pack_norm(s1, sh1, cmax))
            w1s.append(jnp.pad(lp['conv1'][0].T, ((0, 0), (0, cmax - cin))))
            s2, sh2 = lp['norm2']
            n2s.append(_pack_norm(s2, sh2, cmid))
            ks = lp['conv2'].shape[0]
            pad_l = (ks - 1) // 2
            for d in D_LIST:
                k_o = d + pad_l
                if 0 <= k_o < ks:
                    w2s.append(lp['conv2'][k_o].T)            # (growth, cmid)
                else:
                    w2s.append(jnp.zeros((growth, cmid), jnp.float32))
    kp['n1'] = jnp.stack(n1s)
    kp['w1t'] = jnp.stack(w1s).astype(jnp.bfloat16)
    kp['n2'] = jnp.stack(n2s)
    kp['w2'] = jnp.stack(w2s).astype(jnp.bfloat16)

    # transitions
    nts, wts, avgs = [], [], []
    couts = [tp['conv'].shape[2] for tp in params['transitions']]
    coutmax = max(couts) if couts else 1
    for ti, tp in enumerate(params['transitions']):
        st, bt = tp['norm']
        cin = st.shape[1]
        nts.append(_pack_norm(st, bt, cmax))
        wtT = tp['conv'][0].T                                 # (cout, cin)
        wts.append(jnp.pad(wtT, ((0, coutmax - wtT.shape[0]), (0, cmax - cin))))
        avgs.append(_avg_matrix(plan['blocks'][ti][2]))
    kp['nt'] = (jnp.stack(nts) if nts else jnp.zeros((1, cmax, 2), jnp.float32))
    kp['wt'] = (jnp.stack(wts).astype(jnp.bfloat16) if wts
                else jnp.zeros((1, 1, cmax), jnp.bfloat16))
    kp['avg'] = avgs

    # tail + classifier head
    s5, b5 = params['norm5']
    kp['n5'] = _pack_norm(s5, b5, plan['cfin'])
    kp['pavg'] = _pool7_matrix(plan['wlast'], plan['wf'])
    if plan['fuse_head']:
        wcls, bcls = params['classifier']
        cfin, wf = plan['cfin'], plan['wf']
        ncls, ncls_pad = plan['ncls'], plan['ncls_pad']
        w3 = wcls.reshape(cfin, wf, ncls)                     # .view(N,-1) is (c, w)-major
        whead = jnp.transpose(w3, (1, 2, 0))                  # (wf, ncls, cfin)
        kp['whead'] = jnp.pad(whead, ((0, 0), (0, ncls_pad - ncls), (0, 0))
                              ).astype(jnp.bfloat16)
        kp['bhead'] = jnp.pad(jnp.transpose(bcls), ((0, ncls_pad - ncls), (0, 0))
                              ).astype(jnp.float32)
    return kp


def _const_index_map(nd):
    return lambda b, _nd=nd: (0,) * _nd


# ----------------------------- forward -----------------------------

def densenet_forward(params, x_nchw):
    N, _, H, W = x_nchw.shape
    x = x_nchw[:, 0].astype(jnp.float32)[:, ::2, :]      # conv0 stride-2 rows (kernel height 1)
    H2 = x.shape[1]
    B = N * H2
    x = x.reshape(B, W)

    Wc0 = (W - 1) // 2 + 1                               # conv0 (1,7) s=2 p=3 output width
    Wp0 = (Wc0 - 1) // 2 + 1                             # pool0 (1,3) s=2 p=1 output width

    # stem im2col at the kept pool0 positions: x11[b, t, w] = x[b, 4w - 5 + t]
    pad_r = max(0, 4 * Wp0 + 2 - W)
    xpad = jnp.pad(x, ((0, 0), (5, pad_r)))
    taps = [xpad[:, t:t + 4 * Wp0:4] for t in range(11)]
    x11 = jnp.stack(taps, axis=1)                        # (B, 11, Wp0)
    x11 = jnp.pad(x11, ((0, 0), (0, 5), (0, 0)))         # (B, 16, Wp0) sublane/lane aligned

    # static plan
    ntrans = len(params['transitions'])
    growth = params['blocks'][0][0]['conv2'].shape[2]
    cmid = params['blocks'][0][0]['conv1'].shape[2]
    nif = params['conv0'].shape[2]
    ncls = params['classifier'][0].shape[1]

    block_nf, blocks_plan, trans_cout = [], [], []
    nf, Wcur, cmax = nif, Wp0, nif
    for bi, layers in enumerate(params['blocks']):
        block_nf.append(nf)
        ksize = layers[0]['conv2'].shape[0]
        blocks_plan.append((len(layers), (ksize - 1) // 2, Wcur))
        nf += len(layers) * growth
        cmax = max(cmax, nf)
        if bi < ntrans:
            cout = params['transitions'][bi]['conv'].shape[2]
            trans_cout.append(cout)
            nf = cout
            Wcur //= 2
    cmax = ((cmax + 7) // 8) * 8
    cfin, Wlast = nf, Wcur
    Wf = Wlast - 6
    assert Wf >= 1
    fuse_head = (H2 == 1)
    ncls_pad = max(8, ((ncls + 7) // 8) * 8)

    plan = dict(nif=nif, growth=growth, cmid=cmid, cmax=cmax, wp0=Wp0,
                blocks=blocks_plan, block_nf=block_nf, trans_cout=trans_cout,
                cfin=cfin, wlast=Wlast, wf=Wf, fuse_head=fuse_head,
                ncls=ncls, ncls_pad=ncls_pad,
                pool0_right_mask=(2 * (Wp0 - 1) + 1 >= Wc0))

    kp = _build_kernel_params(params, plan)
    leaves, treedef = jax.tree_util.tree_flatten(kp)

    in_specs = [pl.BlockSpec((1, 16, Wp0), lambda b: (b, 0, 0))]
    in_specs += [pl.BlockSpec(l.shape, _const_index_map(l.ndim)) for l in leaves]

    if fuse_head:
        out_shape = jax.ShapeDtypeStruct((B, ncls_pad, 128), jnp.float32)
        out_specs = pl.BlockSpec((1, ncls_pad, 128), lambda b: (b, 0, 0))
    else:
        out_shape = jax.ShapeDtypeStruct((B, cfin, Wf), jnp.float32)
        out_specs = pl.BlockSpec((1, cfin, Wf), lambda b: (b, 0, 0))

    kernel = functools.partial(_densenet_kernel, treedef=treedef,
                               n_params=len(leaves), plan=plan)

    out = pl.pallas_call(
        kernel,
        out_shape=out_shape,
        grid=(B,),
        in_specs=in_specs,
        out_specs=out_specs,
        scratch_shapes=[pltpu.VMEM((cmax, Wp0), jnp.float32)],
        compiler_params=pltpu.CompilerParams(dimension_semantics=("parallel",)),
    )(x11, *leaves)

    if fuse_head:
        return out[:, :ncls, 0].reshape(N, ncls)

    # H > 1 fallback: pick surviving H rows, flatten channel-major, classify in XLA.
    # TODO(synk): the flatten + Linear head stays in XLA on this (non-demo) path.
    step = 2 ** (ntrans + 1)
    Hf = (H2 - 1) // step + 1
    f = out.reshape(N, H2, cfin, Wf)[:, ::step][:, :Hf]        # (N, Hf, Cfin, Wf)
    feat = jnp.transpose(f, (0, 2, 1, 3)).reshape(N, -1)       # (c, h, w)-major
    wc, bc = params['classifier']
    return feat @ wc + bc


# ----------------------------- parameters -----------------------------

def _bn_params(c):
    # eval-mode BN with gamma=1, beta=0, running_mean=0, running_var=1.
    scale = jnp.full((1, c), 1.0 / math.sqrt(1.0 + BN_EPS), jnp.float32)
    shift = jnp.zeros((1, c), jnp.float32)
    return scale, shift


def init_densenet_params(key, *, growth_rate, block_config, num_init_features,
                         bn_size, compression_rate, num_classes, linear_size):
    def conv_w(k, K, cin, cout):
        std = math.sqrt(2.0 / (cin * K))              # kaiming_normal_ (fan_in)
        return std * jax.random.normal(k, (K, cin, cout), jnp.float32)

    keys = iter(jax.random.split(key, 4 * sum(block_config) + len(block_config) + 8))
    p = {}
    p['conv0'] = conv_w(next(keys), 7, 1, num_init_features)
    p['norm0'] = _bn_params(num_init_features)

    blocks, transitions = [], []
    nf = num_init_features
    for i, nl in enumerate(block_config):
        ksize = 5 if i <= 2 else 3
        layers = []
        for j in range(nl):
            cin = nf + j * growth_rate
            layers.append({
                'norm1': _bn_params(cin),
                'conv1': conv_w(next(keys), 1, cin, bn_size * growth_rate),
                'norm2': _bn_params(bn_size * growth_rate),
                'conv2': conv_w(next(keys), ksize, bn_size * growth_rate, growth_rate),
            })
        blocks.append(layers)
        nf += nl * growth_rate
        if i != len(block_config) - 1:
            nout = int(nf * compression_rate)
            transitions.append({'norm': _bn_params(nf),
                                'conv': conv_w(next(keys), 1, nf, nout)})
            nf = nout
    p['blocks'] = blocks
    p['transitions'] = transitions
    p['norm5'] = _bn_params(nf)
    wcls = (1.0 / math.sqrt(linear_size)) * jax.random.normal(
        next(keys), (linear_size, num_classes), jnp.float32)
    p['classifier'] = (wcls, jnp.zeros((1, num_classes), jnp.float32))
    return p


def infer_linear_size(growth_rate, block_config, num_init_features,
                      compression_rate, H, W):
    half = lambda x: (x - 1) // 2 + 1
    h, w = half(H), half(W)            # conv0 stride 2
    h, w = half(h), half(w)            # pool0 (1,3) stride 2, pad (0,1)
    nf = num_init_features
    for i, nl in enumerate(block_config):
        nf += nl * growth_rate
        if i != len(block_config) - 1:
            nf = int(nf * compression_rate)
            h, w = half(h), w // 2     # AvgPool2d((1,2), stride=2)
    return nf * h * (w - 6)            # avg_pool2d (1,7) stride 1


# ----------------------------- main -----------------------------

if __name__ == "__main__":
    key = jax.random.PRNGKey(0)
    kp_, kx = jax.random.split(key)

    # Small instantiation of the DenseNet constructor (same architecture family:
    # 6 dense blocks with kernel_size 5/5/5/3/3/3 and 5 transitions).
    cfg = dict(growth_rate=8, block_config=(2, 2, 2, 2, 2, 2),
               num_init_features=16, bn_size=2, compression_rate=0.5,
               num_classes=4)
    N, H, W = 2, 1, 1024                       # PyTorch input (N, 1, H, W)
    linear_size = infer_linear_size(cfg['growth_rate'], cfg['block_config'],
                                    cfg['num_init_features'],
                                    cfg['compression_rate'], H, W)     # = 64

    params = init_densenet_params(kp_, linear_size=linear_size, **cfg)
    x = jax.random.normal(kx, (N, 1, H, W), jnp.float32)

    fwd = jax.jit(densenet_forward)
    out = jax.block_until_ready(fwd(params, x))

    assert out.shape == (N, cfg['num_classes']), out.shape
    assert bool(jnp.all(jnp.isfinite(out)))
    print("KERNEL_OK")
</pallas_src>

<mosaic_0001>
module attributes {stable_mosaic.version = 11 : i64} {
  func.func @_densenet_kernel(%arg0: i32, %arg1: memref<1x16x256xf32, #tpu.memory_space<vmem>>, %arg2: memref<256x128xbf16, #tpu.memory_space<vmem>>, %arg3: memref<128x64xbf16, #tpu.memory_space<vmem>>, %arg4: memref<64x32xbf16, #tpu.memory_space<vmem>>, %arg5: memref<32x16xbf16, #tpu.memory_space<vmem>>, %arg6: memref<16x8xbf16, #tpu.memory_space<vmem>>, %arg7: memref<16x1xf32, #tpu.memory_space<vmem>>, %arg8: memref<8x1xf32, #tpu.memory_space<vmem>>, %arg9: memref<12x32x2xf32, #tpu.memory_space<vmem>>, %arg10: memref<12x16x2xf32, #tpu.memory_space<vmem>>, %arg11: memref<32x2xf32, #tpu.memory_space<vmem>>, %arg12: memref<5x32x2xf32, #tpu.memory_space<vmem>>, %arg13: memref<8x2xbf16, #tpu.memory_space<vmem>>, %arg14: memref<3x16x16xbf16, #tpu.memory_space<vmem>>, %arg15: memref<12x16x32xbf16, #tpu.memory_space<vmem>>, %arg16: memref<60x8x16xbf16, #tpu.memory_space<vmem>>, %arg17: memref<2x8x32xbf16, #tpu.memory_space<vmem>>, %arg18: memref<5x16x32xbf16, #tpu.memory_space<vmem>>, %arg19: memref<1x8x128xf32, #tpu.memory_space<vmem>>, %arg20: memref<32x256xf32, #tpu.memory_space<vmem>>) attributes {dimension_semantics = [#tpu.dimension_semantics<parallel>], iteration_bounds = array<i64: 2>, scalar_prefetch = 0 : i64, scratch_operands = 1 : i64, tpu.core_type = #tpu.core_type<tc>, window_params = [{transform_indices = @transform_0, window_bounds = array<i64: 1, 16, 256>}, {pipeline_mode = #tpu.pipeline_mode<synchronous>, transform_indices = @transform_1, window_bounds = array<i64: 256, 128>}, {pipeline_mode = #tpu.pipeline_mode<synchronous>, transform_indices = @transform_2, window_bounds = array<i64: 128, 64>}, {pipeline_mode = #tpu.pipeline_mode<synchronous>, transform_indices = @transform_3, window_bounds = array<i64: 64, 32>}, {pipeline_mode = #tpu.pipeline_mode<synchronous>, transform_indices = @transform_4, window_bounds = array<i64: 32, 16>}, {pipeline_mode = #tpu.pipeline_mode<synchronous>, transform_indices = @transform_5, window_bounds = array<i64: 16, 8>}, {pipeline_mode = #tpu.pipeline_mode<synchronous>, transform_indices = @transform_6, window_bounds = array<i64: 16, 1>}, {pipeline_mode = #tpu.pipeline_mode<synchronous>, transform_indices = @transform_7, window_bounds = array<i64: 8, 1>}, {pipeline_mode = #tpu.pipeline_mode<synchronous>, transform_indices = @transform_8, window_bounds = array<i64: 12, 32, 2>}, {pipeline_mode = #tpu.pipeline_mode<synchronous>, transform_indices = @transform_9, window_bounds = array<i64: 12, 16, 2>}, {pipeline_mode = #tpu.pipeline_mode<synchronous>, transform_indices = @transform_10, window_bounds = array<i64: 32, 2>}, {pipeline_mode = #tpu.pipeline_mode<synchronous>, transform_indices = @transform_11, window_bounds = array<i64: 5, 32, 2>}, {pipeline_mode = #tpu.pipeline_mode<synchronous>, transform_indices = @transform_12, window_bounds = array<i64: 8, 2>}, {pipeline_mode = #tpu.pipeline_mode<synchronous>, transform_indices = @transform_13, window_bounds = array<i64: 3, 16, 16>}, {pipeline_mode = #tpu.pipeline_mode<synchronous>, transform_indices = @transform_14, window_bounds = array<i64: 12, 16, 32>}, {pipeline_mode = #tpu.pipeline_mode<synchronous>, transform_indices = @transform_15, window_bounds = array<i64: 60, 8, 16>}, {pipeline_mode = #tpu.pipeline_mode<synchronous>, transform_indices = @transform_16, window_bounds = array<i64: 2, 8, 32>}, {pipeline_mode = #tpu.pipeline_mode<synchronous>, transform_indices = @transform_17, window_bounds = array<i64: 5, 16, 32>}, {transform_indices = @transform_18, window_bounds = array<i64: 1, 8, 128>}]} {
    %c0 = arith.constant 0 : index
    %c0_0 = arith.constant 0 : index
    %c0_1 = arith.constant 0 : index
    %0 = vector.load %arg1[%c0, %c0_0, %c0_1] : memref<1x16x256xf32, #tpu.memory_space<vmem>>, vector<1x16x256xf32>
    %1 = vector.shape_cast %0 : vector<1x16x256xf32> to vector<16x256xf32>
    %c0_2 = arith.constant 0 : index
    %c0_3 = arith.constant 0 : index
    %2 = vector.load %arg7[%c0_2, %c0_3] : memref<16x1xf32, #tpu.memory_space<vmem>>, vector<16x1xf32>
    %3 = tpu.iota {dimensions = array<i32: 1>} : vector<1x256xi32>
    %c0_4 = arith.constant 0 : index
    %c0_5 = arith.constant 0 : index
    %c0_6 = arith.constant 0 : index
    %4 = vector.load %arg14[%c0_4, %c0_5, %c0_6] : memref<3x16x16xbf16, #tpu.memory_space<vmem>>, vector<1x16x16xbf16>
    %5 = vector.shape_cast %4 : vector<1x16x16xbf16> to vector<16x16xbf16>
    %6 = arith.truncf %1 : vector<16x256xf32> to vector<16x256xbf16>
    %cst = arith.constant dense<0.000000e+00> : vector<16x256xf32>
    %7 = tpu.matmul %5, %6, %cst {dimension_numbers = #tpu.dot_dimension_numbers<[1], [0], [0], [1], [0, 0, 1, 1], [], []>} : vector<16x16xbf16>, vector<16x256xbf16>, vector<16x256xf32> -> vector<16x256xf32>
    %8 = vector.broadcast %2 : vector<16x1xf32> to vector<16x256xf32>
    %9 = arith.addf %7, %8 : vector<16x256xf32>
    %cst_7 = arith.constant 0.000000e+00 : f32
    %10 = vector.broadcast %cst_7 : f32 to vector<16x256xf32>
    %11 = arith.maximumf %9, %10 : vector<16x256xf32>
    %c1_i32 = arith.constant 1 : i32
    %12 = vector.broadcast %c1_i32 : i32 to vector<1x256xi32>
    %13 = arith.cmpi sge, %3, %12 : vector<1x256xi32>
    %cst_8 = arith.constant 0.000000e+00 : f32
    %14 = vector.shape_cast %13 : vector<1x256xi1> to vector<1x256xi1>
    %15 = vector.broadcast %14 : vector<1x256xi1> to vector<16x256xi1>
    %16 = vector.broadcast %cst_8 : f32 to vector<16x256xf32>
    %17 = arith.select %15, %11, %16 : vector<16x256xi1>, vector<16x256xf32>
    %c1 = arith.constant 1 : index
    %c0_9 = arith.constant 0 : index
    %c0_10 = arith.constant 0 : index
    %18 = vector.load %arg14[%c1, %c0_9, %c0_10] : memref<3x16x16xbf16, #tpu.memory_space<vmem>>, vector<1x16x16xbf16>
    %19 = vector.shape_cast %18 : vector<1x16x16xbf16> to vector<16x16xbf16>
    %20 = arith.truncf %1 : vector<16x256xf32> to vector<16x256xbf16>
    %cst_11 = arith.constant dense<0.000000e+00> : vector<16x256xf32>
    %21 = tpu.matmul %19, %20, %cst_11 {dimension_numbers = #tpu.dot_dimension_numbers<[1], [0], [0], [1], [0, 0, 1, 1], [], []>} : vector<16x16xbf16>, vector<16x256xbf16>, vector<16x256xf32> -> vector<16x256xf32>
    %22 = vector.broadcast %2 : vector<16x1xf32> to vector<16x256xf32>
    %23 = arith.addf %21, %22 : vector<16x256xf32>
    %cst_12 = arith.constant 0.000000e+00 : f32
    %24 = vector.broadcast %cst_12 : f32 to vector<16x256xf32>
    %25 = arith.maximumf %23, %24 : vector<16x256xf32>
    %c2 = arith.constant 2 : index
    %c0_13 = arith.constant 0 : index
    %c0_14 = arith.constant 0 : index
    %26 = vector.load %arg14[%c2, %c0_13, %c0_14] : memref<3x16x16xbf16, #tpu.memory_space<vmem>>, vector<1x16x16xbf16>
    %27 = vector.shape_cast %26 : vector<1x16x16xbf16> to vector<16x16xbf16>
    %28 = arith.truncf %1 : vector<16x256xf32> to vector<16x256xbf16>
    %cst_15 = arith.constant dense<0.000000e+00> : vector<16x256xf32>
    %29 = tpu.matmul %27, %28, %cst_15 {dimension_numbers = #tpu.dot_dimension_numbers<[1], [0], [0], [1], [0, 0, 1, 1], [], []>} : vector<16x16xbf16>, vector<16x256xbf16>, vector<16x256xf32> -> vector<16x256xf32>
    %30 = vector.broadcast %2 : vector<16x1xf32> to vector<16x256xf32>
    %31 = arith.addf %29, %30 : vector<16x256xf32>
    %cst_16 = arith.constant 0.000000e+00 : f32
    %32 = vector.broadcast %cst_16 : f32 to vector<16x256xf32>
    %33 = arith.maximumf %31, %32 : vector<16x256xf32>
    %34 = arith.maximumf %17, %25 : vector<16x256xf32>
    %35 = arith.maximumf %34, %33 : vector<16x256xf32>
    %cst_17 = arith.constant 0.000000e+00 : f32
    %36 = vector.broadcast %cst_17 : f32 to vector<32x256xf32>
    %c0_18 = arith.constant 0 : index
    %c0_19 = arith.constant 0 : index
    %37 = vector.load %arg20[%c0_18, %c0_19] : memref<32x256xf32, #tpu.memory_space<vmem>>, vector<32x256xf32>
    tpu.vector_store %arg20[%c0_18, %c0_19], %36 {strides = array<i32>} : memref<32x256xf32, #tpu.memory_space<vmem>>, vector<32x256xf32>,
    %c0_20 = arith.constant 0 : index
    %c0_21 = arith.constant 0 : index
    %38 = vector.load %arg20[%c0_20, %c0_21] : memref<32x256xf32, #tpu.memory_space<vmem>>, vector<16x256xf32>
    tpu.vector_store %arg20[%c0_20, %c0_21], %35 {strides = array<i32>} : memref<32x256xf32, #tpu.memory_space<vmem>>, vector<16x256xf32>,
    %39 = tpu.iota {dimensions = array<i32: 1>} : vector<1x256xi32>
    %c0_22 = arith.constant 0 : index
    %c0_23 = arith.constant 0 : index
    %40 = vector.load %arg20[%c0_22, %c0_23] : memref<32x256xf32, #tpu.memory_space<vmem>>, vector<32x256xf32>
    %c0_24 = arith.constant 0 : index
    %c0_25 = arith.constant 0 : index
    %c0_26 = arith.constant 0 : index
    %41 = vector.load %arg9[%c0_24, %c0_25, %c0_26] : memref<12x32x2xf32, #tpu.memory_space<vmem>>, vector<1x32x2xf32>
    %42 = vector.shape_cast %41 : vector<1x32x2xf32> to vector<32x2xf32>
    %43 = vector.extract_strided_slice %42 {offsets = [0, 0], sizes = [32, 1], strides = [1, 1]} : vector<32x2xf32> to vector<32x1xf32>
    %44 = vector.broadcast %43 : vector<32x1xf32> to vector<32x256xf32>
    %45 = arith.mulf %40, %44 : vector<32x256xf32>
    %46 = vector.extract_strided_slice %42 {offsets = [0, 1], sizes = [32, 1], strides = [1, 1]} : vector<32x2xf32> to vector<32x1xf32>
    %47 = vector.broadcast %46 : vector<32x1xf32> to vector<32x256xf32>
    %48 = arith.addf %45, %47 : vector<32x256xf32>
    %cst_27 = arith.constant 0.000000e+00 : f32
    %49 = vector.broadcast %cst_27 : f32 to vector<32x256xf32>
    %50 = arith.maximumf %48, %49 : vector<32x256xf32>
    %c0_28 = arith.constant 0 : index
    %c0_29 = arith.constant 0 : index
    %c0_30 = arith.constant 0 : index
    %51 = vector.load %arg15[%c0_28, %c0_29, %c0_30] : memref<12x16x32xbf16, #tpu.memory_space<vmem>>, vector<1x16x32xbf16>
    %52 = vector.shape_cast %51 : vector<1x16x32xbf16> to vector<16x32xbf16>
    %53 = arith.truncf %50 : vector<32x256xf32> to vector<32x256xbf16>
    %cst_31 = arith.constant dense<0.000000e+00> : vector<16x256xf32>
    %54 = tpu.matmul %52, %53, %cst_31 {dimension_numbers = #tpu.dot_dimension_numbers<[1], [0], [0], [1], [0, 0, 1, 1], [], []>} : vector<16x32xbf16>, vector<32x256xbf16>, vector<16x256xf32> -> vector<16x256xf32>
    %c0_32 = arith.constant 0 : index
    %c0_33 = arith.constant 0 : index
    %c0_34 = arith.constant 0 : index
    %55 = vector.load %arg10[%c0_32, %c0_33, %c0_34] : memref<12x16x2xf32, #tpu.memory_space<vmem>>, vector<1x16x2xf32>
    %56 = vector.shape_cast %55 : vector<1x16x2xf32> to vector<16x2xf32>
    %57 = vector.extract_strided_slice %56 {offsets = [0, 0], sizes = [16, 1], strides = [1, 1]} : vector<16x2xf32> to vector<16x1xf32>
    %58 = vector.broadcast %57 : vector<16x1xf32> to vector<16x256xf32>
    %59 = arith.mulf %54, %58 : vector<16x256xf32>
    %60 = vector.extract_strided_slice %56 {offsets = [0, 1], sizes = [16, 1], strides = [1, 1]} : vector<16x2xf32> to vector<16x1xf32>
    %61 = vector.broadcast %60 : vector<16x1xf32> to vector<16x256xf32>
    %62 = arith.addf %59, %61 : vector<16x256xf32>
    %cst_35 = arith.constant 0.000000e+00 : f32
    %63 = vector.broadcast %cst_35 : f32 to vector<16x256xf32>
    %64 = arith.maximumf %62, %63 : vector<16x256xf32>
    %c2_i32 = arith.constant 2 : i32
    %65 = tpu.dynamic_rotate %64 by %c2_i32 dim 1 : vector<16x256xf32>, i32 -> vector<16x256xf32>
    %c2_i32_36 = arith.constant 2 : i32
    %66 = vector.broadcast %c2_i32_36 : i32 to vector<1x256xi32>
    %67 = arith.cmpi sge, %39, %66 : vector<1x256xi32>
    %cst_37 = arith.constant 0.000000e+00 : f32
    %68 = vector.shape_cast %67 : vector<1x256xi1> to vector<1x256xi1>
    %69 = vector.broadcast %68 : vector<1x256xi1> to vector<16x256xi1>
    %70 = vector.broadcast %cst_37 : f32 to vector<16x256xf32>
    %71 = arith.select %69, %65, %70 : vector<16x256xi1>, vector<16x256xf32>
    %c0_38 = arith.constant 0 : index
    %c0_39 = arith.constant 0 : index
    %c0_40 = arith.constant 0 : index
    %72 = vector.load %arg16[%c0_38, %c0_39, %c0_40] : memref<60x8x16xbf16, #tpu.memory_space<vmem>>, vector<1x8x16xbf16>
    %73 = vector.shape_cast %72 : vector<1x8x16xbf16> to vector<8x16xbf16>
    %74 = arith.truncf %71 : vector<16x256xf32> to vector<16x256xbf16>
    %cst_41 = arith.constant dense<0.000000e+00> : vector<8x256xf32>
    %75 = tpu.matmul %73, %74, %cst_41 {dimension_numbers = #tpu.dot_dimension_numbers<[1], [0], [0], [1], [0, 0, 1, 1], [], []>} : vector<8x16xbf16>, vector<16x256xbf16>, vector<8x256xf32> -> vector<8x256xf32>
    %c1_i32_42 = arith.constant 1 : i32
    %76 = tpu.dynamic_rotate %64 by %c1_i32_42 dim 1 : vector<16x256xf32>, i32 -> vector<16x256xf32>
    %c1_i32_43 = arith.constant 1 : i32
    %77 = vector.broadcast %c1_i32_43 : i32 to vector<1x256xi32>
    %78 = arith.cmpi sge, %39, %77 : vector<1x256xi32>
    %cst_44 = arith.constant 0.000000e+00 : f32
    %79 = vector.shape_cast %78 : vector<1x256xi1> to vector<1x256xi1>
    %80 = vector.broadcast %79 : vector<1x256xi1> to vector<16x256xi1>
    %81 = vector.broadcast %cst_44 : f32 to vector<16x256xf32>
    %82 = arith.select %80, %76, %81 : vector<16x256xi1>, vector<16x256xf32>
    %c1_45 = arith.constant 1 : index
    %c0_46 = arith.constant 0 : index
    %c0_47 = arith.constant 0 : index
    %83 = vector.load %arg16[%c1_45, %c0_46, %c0_47] : memref<60x8x16xbf16, #tpu.memory_space<vmem>>, vector<1x8x16xbf16>
    %84 = vector.shape_cast %83 : vector<1x8x16xbf16> to vector<8x16xbf16>
    %85 = arith.truncf %82 : vector<16x256xf32> to vector<16x256xbf16>
    %cst_48 = arith.constant dense<0.000000e+00> : vector<8x256xf32>
    %86 = tpu.matmul %84, %85, %cst_48 {dimension_numbers = #tpu.dot_dimension_numbers<[1], [0], [0], [1], [0, 0, 1, 1], [], []>} : vector<8x16xbf16>, vector<16x256xbf16>, vector<8x256xf32> -> vector<8x256xf32>
    %87 = arith.addf %75, %86 : vector<8x256xf32>
    %c2_49 = arith.constant 2 : index
    %c0_50 = arith.constant 0 : index
    %c0_51 = arith.constant 0 : index
    %88 = vector.load %arg16[%c2_49, %c0_50, %c0_51] : memref<60x8x16xbf16, #tpu.memory_space<vmem>>, vector<1x8x16xbf16>
    %89 = vector.shape_cast %88 : vector<1x8x16xbf16> to vector<8x16xbf16>
    %90 = arith.truncf %64 : vector<16x256xf32> to vector<16x256xbf16>
    %cst_52 = arith.constant dense<0.000000e+00> : vector<8x256xf32>
    %91 = tpu.matmul %89, %90, %cst_52 {dimension_numbers = #tpu.dot_dimension_numbers<[1], [0], [0], [1], [0, 0, 1, 1], [], []>} : vector<8x16xbf16>, vector<16x256xbf16>, vector<8x256xf32> -> vector<8x256xf32>
    %92 = arith.addf %87, %91 : vector<8x256xf32>
    %c255_i32 = arith.constant 255 : i32
    %93 = tpu.dynamic_rotate %64 by %c255_i32 dim 1 : vector<16x256xf32>, i32 -> vector<16x256xf32>
    %c255_i32_53 = arith.constant 255 : i32
    %94 = vector.broadcast %c255_i32_53 : i32 to vector<1x256xi32>
    %95 = arith.cmpi slt, %39, %94 : vector<1x256xi32>
    %cst_54 = arith.constant 0.000000e+00 : f32
    %96 = vector.shape_cast %95 : vector<1x256xi1> to vector<1x256xi1>
    %97 = vector.broadcast %96 : vector<1x256xi1> to vector<16x256xi1>
    %98 = vector.broadcast %cst_54 : f32 to vector<16x256xf32>
    %99 = arith.select %97, %93, %98 : vector<16x256xi1>, vector<16x256xf32>
    %c3 = arith.constant 3 : index
    %c0_55 = arith.constant 0 : index
    %c0_56 = arith.constant 0 : index
    %100 = vector.load %arg16[%c3, %c0_55, %c0_56] : memref<60x8x16xbf16, #tpu.memory_space<vmem>>, vector<1x8x16xbf16>
    %101 = vector.shape_cast %100 : vector<1x8x16xbf16> to vector<8x16xbf16>
    %102 = arith.truncf %99 : vector<16x256xf32> to vector<16x256xbf16>
    %cst_57 = arith.constant dense<0.000000e+00> : vector<8x256xf32>
    %103 = tpu.matmul %101, %102, %cst_57 {dimension_numbers = #tpu.dot_dimension_numbers<[1], [0], [0], [1], [0, 0, 1, 1], [], []>} : vector<8x16xbf16>, vector<16x256xbf16>, vector<8x256xf32> -> vector<8x256xf32>
    %104 = arith.addf %92, %103 : vector<8x256xf32>
    %c254_i32 = arith.constant 254 : i32
    %105 = tpu.dynamic_rotate %64 by %c254_i32 dim 1 : vector<16x256xf32>, i32 -> vector<16x256xf32>
    %c254_i32_58 = arith.constant 254 : i32
    %106 = vector.broadcast %c254_i32_58 : i32 to vector<1x256xi32>
    %107 = arith.cmpi slt, %39, %106 : vector<1x256xi32>
    %cst_59 = arith.constant 0.000000e+00 : f32
    %108 = vector.shape_cast %107 : vector<1x256xi1> to vector<1x256xi1>
    %109 = vector.broadcast %108 : vector<1x256xi1> to vector<16x256xi1>
    %110 = vector.broadcast %cst_59 : f32 to vector<16x256xf32>
    %111 = arith.select %109, %105, %110 : vector<16x256xi1>, vector<16x256xf32>
    %c4 = arith.constant 4 : index
    %c0_60 = arith.constant 0 : index
    %c0_61 = arith.constant 0 : index
    %112 = vector.load %arg16[%c4, %c0_60, %c0_61] : memref<60x8x16xbf16, #tpu.memory_space<vmem>>, vector<1x8x16xbf16>
    %113 = vector.shape_cast %112 : vector<1x8x16xbf16> to vector<8x16xbf16>
    %114 = arith.truncf %111 : vector<16x256xf32> to vector<16x256xbf16>
    %cst_62 = arith.constant dense<0.000000e+00> : vector<8x256xf32>
    %115 = tpu.matmul %113, %114, %cst_62 {dimension_numbers = #tpu.dot_dimension_numbers<[1], [0], [0], [1], [0, 0, 1, 1], [], []>} : vector<8x16xbf16>, vector<16x256xbf16>, vector<8x256xf32> -> vector<8x256xf32>
    %116 = arith.addf %104, %115 : vector<8x256xf32>
    %c16 = arith.constant 16 : index
    %c0_63 = arith.constant 0 : index
    %117 = vector.load %arg20[%c16, %c0_63] : memref<32x256xf32, #tpu.memory_space<vmem>>, vector<8x256xf32>
    tpu.vector_store %arg20[%c16, %c0_63], %116 {strides = array<i32>} : memref<32x256xf32, #tpu.memory_space<vmem>>, vector<8x256xf32>,
    %c0_64 = arith.constant 0 : index
    %c0_65 = arith.constant 0 : index
    %118 = vector.load %arg20[%c0_64, %c0_65] : memref<32x256xf32, #tpu.memory_space<vmem>>, vector<32x256xf32>
    %c1_66 = arith.constant 1 : index
    %c0_67 = arith.constant 0 : index
    %c0_68 = arith.constant 0 : index
    %119 = vector.load %arg9[%c1_66, %c0_67, %c0_68] : memref<12x32x2xf32, #tpu.memory_space<vmem>>, vector<1x32x2xf32>
    %120 = vector.shape_cast %119 : vector<1x32x2xf32> to vector<32x2xf32>
    %121 = vector.extract_strided_slice %120 {offsets = [0, 0], sizes = [32, 1], strides = [1, 1]} : vector<32x2xf32> to vector<32x1xf32>
    %122 = vector.broadcast %121 : vector<32x1xf32> to vector<32x256xf32>
    %123 = arith.mulf %118, %122 : vector<32x256xf32>
    %124 = vector.extract_strided_slice %120 {offsets = [0, 1], sizes = [32, 1], strides = [1, 1]} : vector<32x2xf32> to vector<32x1xf32>
    %125 = vector.broadcast %124 : vector<32x1xf32> to vector<32x256xf32>
    %126 = arith.addf %123, %125 : vector<32x256xf32>
    %cst_69 = arith.constant 0.000000e+00 : f32
    %127 = vector.broadcast %cst_69 : f32 to vector<32x256xf32>
    %128 = arith.maximumf %126, %127 : vector<32x256xf32>
    %c1_70 = arith.constant 1 : index
    %c0_71 = arith.constant 0 : index
    %c0_72 = arith.constant 0 : index
    %129 = vector.load %arg15[%c1_70, %c0_71, %c0_72] : memref<12x16x32xbf16, #tpu.memory_space<vmem>>, vector<1x16x32xbf16>
    %130 = vector.shape_cast %129 : vector<1x16x32xbf16> to vector<16x32xbf16>
    %131 = arith.truncf %128 : vector<32x256xf32> to vector<32x256xbf16>
    %cst_73 = arith.constant dense<0.000000e+00> : vector<16x256xf32>
    %132 = tpu.matmul %130, %131, %cst_73 {dimension_numbers = #tpu.dot_dimension_numbers<[1], [0], [0], [1], [0, 0, 1, 1], [], []>} : vector<16x32xbf16>, vector<32x256xbf16>, vector<16x256xf32> -> vector<16x256xf32>
    %c1_74 = arith.constant 1 : index
    %c0_75 = arith.constant 0 : index
    %c0_76 = arith.constant 0 : index
    %133 = vector.load %arg10[%c1_74, %c0_75, %c0_76] : memref<12x16x2xf32, #tpu.memory_space<vmem>>, vector<1x16x2xf32>
    %134 = vector.shape_cast %133 : vector<1x16x2xf32> to vector<16x2xf32>
    %135 = vector.extract_strided_slice %134 {offsets = [0, 0], sizes = [16, 1], strides = [1, 1]} : vector<16x2xf32> to vector<16x1xf32>
    %136 = vector.broadcast %135 : vector<16x1xf32> to vector<16x256xf32>
    %137 = arith.mulf %132, %136 : vector<16x256xf32>
    %138 = vector.extract_strided_slice %134 {offsets = [0, 1], sizes = [16, 1], strides = [1, 1]} : vector<16x2xf32> to vector<16x1xf32>
    %139 = vector.broadcast %138 : vector<16x1xf32> to vector<16x256xf32>
    %140 = arith.addf %137, %139 : vector<16x256xf32>
    %cst_77 = arith.constant 0.000000e+00 : f32
    %141 = vector.broadcast %cst_77 : f32 to vector<16x256xf32>
    %142 = arith.maximumf %140, %141 : vector<16x256xf32>
    %c2_i32_78 = arith.constant 2 : i32
    %143 = tpu.dynamic_rotate %142 by %c2_i32_78 dim 1 : vector<16x256xf32>, i32 -> vector<16x256xf32>
    %c2_i32_79 = arith.constant 2 : i32
    %144 = vector.broadcast %c2_i32_79 : i32 to vector<1x256xi32>
    %145 = arith.cmpi sge, %39, %144 : vector<1x256xi32>
    %cst_80 = arith.constant 0.000000e+00 : f32
    %146 = vector.shape_cast %145 : vector<1x256xi1> to vector<1x256xi1>
    %147 = vector.broadcast %146 : vector<1x256xi1> to vector<16x256xi1>
    %148 = vector.broadcast %cst_80 : f32 to vector<16x256xf32>
    %149 = arith.select %147, %143, %148 : vector<16x256xi1>, vector<16x256xf32>
    %c5 = arith.constant 5 : index
    %c0_81 = arith.constant 0 : index
    %c0_82 = arith.constant 0 : index
    %150 = vector.load %arg16[%c5, %c0_81, %c0_82] : memref<60x8x16xbf16, #tpu.memory_space<vmem>>, vector<1x8x16xbf16>
    %151 = vector.shape_cast %150 : vector<1x8x16xbf16> to vector<8x16xbf16>
    %152 = arith.truncf %149 : vector<16x256xf32> to vector<16x256xbf16>
    %cst_83 = arith.constant dense<0.000000e+00> : vector<8x256xf32>
    %153 = tpu.matmul %151, %152, %cst_83 {dimension_numbers = #tpu.dot_dimension_numbers<[1], [0], [0], [1], [0, 0, 1, 1], [], []>} : vector<8x16xbf16>, vector<16x256xbf16>, vector<8x256xf32> -> vector<8x256xf32>
    %c1_i32_84 = arith.constant 1 : i32
    %154 = tpu.dynamic_rotate %142 by %c1_i32_84 dim 1 : vector<16x256xf32>, i32 -> vector<16x256xf32>
    %c1_i32_85 = arith.constant 1 : i32
    %155 = vector.broadcast %c1_i32_85 : i32 to vector<1x256xi32>
    %156 = arith.cmpi sge, %39, %155 : vector<1x256xi32>
    %cst_86 = arith.constant 0.000000e+00 : f32
    %157 = vector.shape_cast %156 : vector<1x256xi1> to vector<1x256xi1>
    %158 = vector.broadcast %157 : vector<1x256xi1> to vector<16x256xi1>
    %159 = vector.broadcast %cst_86 : f32 to vector<16x256xf32>
    %160 = arith.select %158, %154, %159 : vector<16x256xi1>, vector<16x256xf32>
    %c6 = arith.constant 6 : index
    %c0_87 = arith.constant 0 : index
    %c0_88 = arith.constant 0 : index
    %161 = vector.load %arg16[%c6, %c0_87, %c0_88] : memref<60x8x16xbf16, #tpu.memory_space<vmem>>, vector<1x8x16xbf16>
    %162 = vector.shape_cast %161 : vector<1x8x16xbf16> to vector<8x16xbf16>
    %163 = arith.truncf %160 : vector<16x256xf32> to vector<16x256xbf16>
    %cst_89 = arith.constant dense<0.000000e+00> : vector<8x256xf32>
    %164 = tpu.matmul %162, %163, %cst_89 {dimension_numbers = #tpu.dot_dimension_numbers<[1], [0], [0], [1], [0, 0, 1, 1], [], []>} : vector<8x16xbf16>, vector<16x256xbf16>, vector<8x256xf32> -> vector<8x256xf32>
    %165 = arith.addf %153, %164 : vector<8x256xf32>
    %c7 = arith.constant 7 : index
    %c0_90 = arith.constant 0 : index
    %c0_91 = arith.constant 0 : index
    %166 = vector.load %arg16[%c7, %c0_90, %c0_91] : memref<60x8x16xbf16, #tpu.memory_space<vmem>>, vector<1x8x16xbf16>
    %167 = vector.shape_cast %166 : vector<1x8x16xbf16> to vector<8x16xbf16>
    %168 = arith.truncf %142 : vector<16x256xf32> to vector<16x256xbf16>
    %cst_92 = arith.constant dense<0.000000e+00> : vector<8x256xf32>
    %169 = tpu.matmul %167, %168, %cst_92 {dimension_numbers = #tpu.dot_dimension_numbers<[1], [0], [0], [1], [0, 0, 1, 1], [], []>} : vector<8x16xbf16>, vector<16x256xbf16>, vector<8x256xf32> -> vector<8x256xf32>
    %170 = arith.addf %165, %169 : vector<8x256xf32>
    %c255_i32_93 = arith.constant 255 : i32
    %171 = tpu.dynamic_rotate %142 by %c255_i32_93 dim 1 : vector<16x256xf32>, i32 -> vector<16x256xf32>
    %c255_i32_94 = arith.constant 255 : i32
    %172 = vector.broadcast %c255_i32_94 : i32 to vector<1x256xi32>
    %173 = arith.cmpi slt, %39, %172 : vector<1x256xi32>
    %cst_95 = arith.constant 0.000000e+00 : f32
    %174 = vector.shape_cast %173 : vector<1x256xi1> to vector<1x256xi1>
    %175 = vector.broadcast %174 : vector<1x256xi1> to vector<16x256xi1>
    %176 = vector.broadcast %cst_95 : f32 to vector<16x256xf32>
    %177 = arith.select %175, %171, %176 : vector<16x256xi1>, vector<16x256xf32>
    %c8 = arith.constant 8 : index
    %c0_96 = arith.constant 0 : index
    %c0_97 = arith.constant 0 : index
    %178 = vector.load %arg16[%c8, %c0_96, %c0_97] : memref<60x8x16xbf16, #tpu.memory_space<vmem>>, vector<1x8x16xbf16>
    %179 = vector.shape_cast %178 : vector<1x8x16xbf16> to vector<8x16xbf16>
    %180 = arith.truncf %177 : vector<16x256xf32> to vector<16x256xbf16>
    %cst_98 = arith.constant dense<0.000000e+00> : vector<8x256xf32>
    %181 = tpu.matmul %179, %180, %cst_98 {dimension_numbers = #tpu.dot_dimension_numbers<[1], [0], [0], [1], [0, 0, 1, 1], [], []>} : vector<8x16xbf16>, vector<16x256xbf16>, vector<8x256xf32> -> vector<8x256xf32>
    %182 = arith.addf %170, %181 : vector<8x256xf32>
    %c254_i32_99 = arith.constant 254 : i32
    %183 = tpu.dynamic_rotate %142 by %c254_i32_99 dim 1 : vector<16x256xf32>, i32 -> vector<16x256xf32>
    %c254_i32_100 = arith.constant 254 : i32
    %184 = vector.broadcast %c254_i32_100 : i32 to vector<1x256xi32>
    %185 = arith.cmpi slt, %39, %184 : vector<1x256xi32>
    %cst_101 = arith.constant 0.000000e+00 : f32
    %186 = vector.shape_cast %185 : vector<1x256xi1> to vector<1x256xi1>
    %187 = vector.broadcast %186 : vector<1x256xi1> to vector<16x256xi1>
    %188 = vector.broadcast %cst_101 : f32 to vector<16x256xf32>
    %189 = arith.select %187, %183, %188 : vector<16x256xi1>, vector<16x256xf32>
    %c9 = arith.constant 9 : index
    %c0_102 = arith.constant 0 : index
    %c0_103 = arith.constant 0 : index
    %190 = vector.load %arg16[%c9, %c0_102, %c0_103] : memref<60x8x16xbf16, #tpu.memory_space<vmem>>, vector<1x8x16xbf16>
    %191 = vector.shape_cast %190 : vector<1x8x16xbf16> to vector<8x16xbf16>
    %192 = arith.truncf %189 : vector<16x256xf32> to vector<16x256xbf16>
    %cst_104 = arith.constant dense<0.000000e+00> : vector<8x256xf32>
    %193 = tpu.matmul %191, %192, %cst_104 {dimension_numbers = #tpu.dot_dimension_numbers<[1], [0], [0], [1], [0, 0, 1, 1], [], []>} : vector<8x16xbf16>, vector<16x256xbf16>, vector<8x256xf32> -> vector<8x256xf32>
    %194 = arith.addf %182, %193 : vector<8x256xf32>
    %c24 = arith.constant 24 : index
    %c0_105 = arith.constant 0 : index
    %195 = vector.load %arg20[%c24, %c0_105] : memref<32x256xf32, #tpu.memory_space<vmem>>, vector<8x256xf32>
    tpu.vector_store %arg20[%c24, %c0_105], %194 {strides = array<i32>} : memref<32x256xf32, #tpu.memory_space<vmem>>, vector<8x256xf32>,
    %c0_106 = arith.constant 0 : index
    %c0_107 = arith.constant 0 : index
    %196 = vector.load %arg20[%c0_106, %c0_107] : memref<32x256xf32, #tpu.memory_space<vmem>>, vector<32x256xf32>
    %c0_108 = arith.constant 0 : index
    %c0_109 = arith.constant 0 : index
    %c0_110 = arith.constant 0 : index
    %197 = vector.load %arg12[%c0_108, %c0_109, %c0_110] : memref<5x32x2xf32, #tpu.memory_space<vmem>>, vector<1x32x2xf32>
    %198 = vector.shape_cast %197 : vector<1x32x2xf32> to vector<32x2xf32>
    %199 = vector.extract_strided_slice %198 {offsets = [0, 0], sizes = [32, 1], strides = [1, 1]} : vector<32x2xf32> to vector<32x1xf32>
    %200 = vector.broadcast %199 : vector<32x1xf32> to vector<32x256xf32>
    %201 = arith.mulf %196, %200 : vector<32x256xf32>
    %202 = vector.extract_strided_slice %198 {offsets = [0, 1], sizes = [32, 1], strides = [1, 1]} : vector<32x2xf32> to vector<32x1xf32>
    %203 = vector.broadcast %202 : vector<32x1xf32> to vector<32x256xf32>
    %204 = arith.addf %201, %203 : vector<32x256xf32>
    %cst_111 = arith.constant 0.000000e+00 : f32
    %205 = vector.broadcast %cst_111 : f32 to vector<32x256xf32>
    %206 = arith.maximumf %204, %205 : vector<32x256xf32>
    %c0_112 = arith.constant 0 : index
    %c0_113 = arith.constant 0 : index
    %c0_114 = arith.constant 0 : index
    %207 = vector.load %arg18[%c0_112, %c0_113, %c0_114] : memref<5x16x32xbf16, #tpu.memory_space<vmem>>, vector<1x16x32xbf16>
    %208 = vector.shape_cast %207 : vector<1x16x32xbf16> to vector<16x32xbf16>
    %209 = arith.truncf %206 : vector<32x256xf32> to vector<32x256xbf16>
    %cst_115 = arith.constant dense<0.000000e+00> : vector<16x256xf32>
    %210 = tpu.matmul %208, %209, %cst_115 {dimension_numbers = #tpu.dot_dimension_numbers<[1], [0], [0], [1], [0, 0, 1, 1], [], []>} : vector<16x32xbf16>, vector<32x256xbf16>, vector<16x256xf32> -> vector<16x256xf32>
    %c0_116 = arith.constant 0 : index
    %c0_117 = arith.constant 0 : index
    %211 = vector.load %arg2[%c0_116, %c0_117] : memref<256x128xbf16, #tpu.memory_space<vmem>>, vector<256x128xbf16>
    %212 = arith.truncf %210 : vector<16x256xf32> to vector<16x256xbf16>
    %cst_118 = arith.constant dense<0.000000e+00> : vector<16x128xf32>
    %213 = tpu.matmul %212, %211, %cst_118 {dimension_numbers = #tpu.dot_dimension_numbers<[1], [0], [0], [1], [0, 0, 1, 1], [], []>} : vector<16x256xbf16>, vector<256x128xbf16>, vector<16x128xf32> -> vector<16x128xf32>
    %c0_119 = arith.constant 0 : index
    %c0_120 = arith.constant 0 : index
    %214 = vector.load %arg20[%c0_119, %c0_120] : memref<32x256xf32, #tpu.memory_space<vmem>>, vector<16x128xf32>
    tpu.vector_store %arg20[%c0_119, %c0_120], %213 {strides = array<i32>} : memref<32x256xf32, #tpu.memory_space<vmem>>, vector<16x128xf32>,
    %215 = tpu.iota {dimensions = array<i32: 1>} : vector<1x128xi32>
    %c0_121 = arith.constant 0 : index
    %c0_122 = arith.constant 0 : index
    %216 = vector.load %arg20[%c0_121, %c0_122] : memref<32x256xf32, #tpu.memory_space<vmem>>, vector<32x128xf32>
    %c2_123 = arith.constant 2 : index
    %c0_124 = arith.constant 0 : index
    %c0_125 = arith.constant 0 : index
    %217 = vector.load %arg9[%c2_123, %c0_124, %c0_125] : memref<12x32x2xf32, #tpu.memory_space<vmem>>, vector<1x32x2xf32>
    %218 = vector.shape_cast %217 : vector<1x32x2xf32> to vector<32x2xf32>
    %219 = vector.extract_strided_slice %218 {offsets = [0, 0], sizes = [32, 1], strides = [1, 1]} : vector<32x2xf32> to vector<32x1xf32>
    %220 = vector.broadcast %219 : vector<32x1xf32> to vector<32x128xf32>
    %221 = arith.mulf %216, %220 : vector<32x128xf32>
    %222 = vector.extract_strided_slice %218 {offsets = [0, 1], sizes = [32, 1], strides = [1, 1]} : vector<32x2xf32> to vector<32x1xf32>
    %223 = vector.broadcast %222 : vector<32x1xf32> to vector<32x128xf32>
    %224 = arith.addf %221, %223 : vector<32x128xf32>
    %cst_126 = arith.constant 0.000000e+00 : f32
    %225 = vector.broadcast %cst_126 : f32 to vector<32x128xf32>
    %226 = arith.maximumf %224, %225 : vector<32x128xf32>
    %c2_127 = arith.constant 2 : index
    %c0_128 = arith.constant 0 : index
    %c0_129 = arith.constant 0 : index
    %227 = vector.load %arg15[%c2_127, %c0_128, %c0_129] : memref<12x16x32xbf16, #tpu.memory_space<vmem>>, vector<1x16x32xbf16>
    %228 = vector.shape_cast %227 : vector<1x16x32xbf16> to vector<16x32xbf16>
    %229 = arith.truncf %226 : vector<32x128xf32> to vector<32x128xbf16>
    %cst_130 = arith.constant dense<0.000000e+00> : vector<16x128xf32>
    %230 = tpu.matmul %228, %229, %cst_130 {dimension_numbers = #tpu.dot_dimension_numbers<[1], [0], [0], [1], [0, 0, 1, 1], [], []>} : vector<16x32xbf16>, vector<32x128xbf16>, vector<16x128xf32> -> vector<16x128xf32>
    %c2_131 = arith.constant 2 : index
    %c0_132 = arith.constant 0 : index
    %c0_133 = arith.constant 0 : index
    %231 = vector.load %arg10[%c2_131, %c0_132, %c0_133] : memref<12x16x2xf32, #tpu.memory_space<vmem>>, vector<1x16x2xf32>
    %232 = vector.shape_cast %231 : vector<1x16x2xf32> to vector<16x2xf32>
    %233 = vector.extract_strided_slice %232 {offsets = [0, 0], sizes = [16, 1], strides = [1, 1]} : vector<16x2xf32> to vector<16x1xf32>
    %234 = vector.broadcast %233 : vector<16x1xf32> to vector<16x128xf32>
    %235 = arith.mulf %230, %234 : vector<16x128xf32>
    %236 = vector.extract_strided_slice %232 {offsets = [0, 1], sizes = [16, 1], strides = [1, 1]} : vector<16x2xf32> to vector<16x1xf32>
    %237 = vector.broadcast %236 : vector<16x1xf32> to vector<16x128xf32>
    %238 = arith.addf %235, %237 : vector<16x128xf32>
    %cst_134 = arith.constant 0.000000e+00 : f32
    %239 = vector.broadcast %cst_134 : f32 to vector<16x128xf32>
    %240 = arith.maximumf %238, %239 : vector<16x128xf32>
    %c2_i32_135 = arith.constant 2 : i32
    %241 = tpu.dynamic_rotate %240 by %c2_i32_135 dim 1 : vector<16x128xf32>, i32 -> vector<16x128xf32>
    %c2_i32_136 = arith.constant 2 : i32
    %242 = vector.broadcast %c2_i32_136 : i32 to vector<1x128xi32>
    %243 = arith.cmpi sge, %215, %242 : vector<1x128xi32>
    %cst_137 = arith.constant 0.000000e+00 : f32
    %244 = vector.shape_cast %243 : vector<1x128xi1> to vector<1x128xi1>
    %245 = vector.broadcast %244 : vector<1x128xi1> to vector<16x128xi1>
    %246 = vector.broadcast %cst_137 : f32 to vector<16x128xf32>
    %247 = arith.select %245, %241, %246 : vector<16x128xi1>, vector<16x128xf32>
    %c10 = arith.constant 10 : index
    %c0_138 = arith.constant 0 : index
    %c0_139 = arith.constant 0 : index
    %248 = vector.load %arg16[%c10, %c0_138, %c0_139] : memref<60x8x16xbf16, #tpu.memory_space<vmem>>, vector<1x8x16xbf16>
    %249 = vector.shape_cast %248 : vector<1x8x16xbf16> to vector<8x16xbf16>
    %250 = arith.truncf %247 : vector<16x128xf32> to vector<16x128xbf16>
    %cst_140 = arith.constant dense<0.000000e+00> : vector<8x128xf32>
    %251 = tpu.matmul %249, %250, %cst_140 {dimension_numbers = #tpu.dot_dimension_numbers<[1], [0], [0], [1], [0, 0, 1, 1], [], []>} : vector<8x16xbf16>, vector<16x128xbf16>, vector<8x128xf32> -> vector<8x128xf32>
    %c1_i32_141 = arith.constant 1 : i32
    %252 = tpu.dynamic_rotate %240 by %c1_i32_141 dim 1 : vector<16x128xf32>, i32 -> vector<16x128xf32>
    %c1_i32_142 = arith.constant 1 : i32
    %253 = vector.broadcast %c1_i32_142 : i32 to vector<1x128xi32>
    %254 = arith.cmpi sge, %215, %253 : vector<1x128xi32>
    %cst_143 = arith.constant 0.000000e+00 : f32
    %255 = vector.shape_cast %254 : vector<1x128xi1> to vector<1x128xi1>
    %256 = vector.broadcast %255 : vector<1x128xi1> to vector<16x128xi1>
    %257 = vector.broadcast %cst_143 : f32 to vector<16x128xf32>
    %258 = arith.select %256, %252, %257 : vector<16x128xi1>, vector<16x128xf32>
    %c11 = arith.constant 11 : index
    %c0_144 = arith.constant 0 : index
    %c0_145 = arith.constant 0 : index
    %259 = vector.load %arg16[%c11, %c0_144, %c0_145] : memref<60x8x16xbf16, #tpu.memory_space<vmem>>, vector<1x8x16xbf16>
    %260 = vector.shape_cast %259 : vector<1x8x16xbf16> to vector<8x16xbf16>
    %261 = arith.truncf %258 : vector<16x128xf32> to vector<16x128xbf16>
    %cst_146 = arith.constant dense<0.000000e+00> : vector<8x128xf32>
    %262 = tpu.matmul %260, %261, %cst_146 {dimension_numbers = #tpu.dot_dimension_numbers<[1], [0], [0], [1], [0, 0, 1, 1], [], []>} : vector<8x16xbf16>, vector<16x128xbf16>, vector<8x128xf32> -> vector<8x128xf32>
    %263 = arith.addf %251, %262 : vector<8x128xf32>
    %c12 = arith.constant 12 : index
    %c0_147 = arith.constant 0 : index
    %c0_148 = arith.constant 0 : index
    %264 = vector.load %arg16[%c12, %c0_147, %c0_148] : memref<60x8x16xbf16, #tpu.memory_space<vmem>>, vector<1x8x16xbf16>
    %265 = vector.shape_cast %264 : vector<1x8x16xbf16> to vector<8x16xbf16>
    %266 = arith.truncf %240 : vector<16x128xf32> to vector<16x128xbf16>
    %cst_149 = arith.constant dense<0.000000e+00> : vector<8x128xf32>
    %267 = tpu.matmul %265, %266, %cst_149 {dimension_numbers = #tpu.dot_dimension_numbers<[1], [0], [0], [1], [0, 0, 1, 1], [], []>} : vector<8x16xbf16>, vector<16x128xbf16>, vector<8x128xf32> -> vector<8x128xf32>
    %268 = arith.addf %263, %267 : vector<8x128xf32>
    %c127_i32 = arith.constant 127 : i32
    %269 = tpu.dynamic_rotate %240 by %c127_i32 dim 1 : vector<16x128xf32>, i32 -> vector<16x128xf32>
    %c127_i32_150 = arith.constant 127 : i32
    %270 = vector.broadcast %c127_i32_150 : i32 to vector<1x128xi32>
    %271 = arith.cmpi slt, %215, %270 : vector<1x128xi32>
    %cst_151 = arith.constant 0.000000e+00 : f32
    %272 = vector.shape_cast %271 : vector<1x128xi1> to vector<1x128xi1>
    %273 = vector.broadcast %272 : vector<1x128xi1> to vector<16x128xi1>
    %274 = vector.broadcast %cst_151 : f32 to vector<16x128xf32>
    %275 = arith.select %273, %269, %274 : vector<16x128xi1>, vector<16x128xf32>
    %c13 = arith.constant 13 : index
    %c0_152 = arith.constant 0 : index
    %c0_153 = arith.constant 0 : index
    %276 = vector.load %arg16[%c13, %c0_152, %c0_153] : memref<60x8x16xbf16, #tpu.memory_space<vmem>>, vector<1x8x16xbf16>
    %277 = vector.shape_cast %276 : vector<1x8x16xbf16> to vector<8x16xbf16>
    %278 = arith.truncf %275 : vector<16x128xf32> to vector<16x128xbf16>
    %cst_154 = arith.constant dense<0.000000e+00> : vector<8x128xf32>
    %279 = tpu.matmul %277, %278, %cst_154 {dimension_numbers = #tpu.dot_dimension_numbers<[1], [0], [0], [1], [0, 0, 1, 1], [], []>} : vector<8x16xbf16>, vector<16x128xbf16>, vector<8x128xf32> -> vector<8x128xf32>
    %280 = arith.addf %268, %279 : vector<8x128xf32>
    %c126_i32 = arith.constant 126 : i32
    %281 = tpu.dynamic_rotate %240 by %c126_i32 dim 1 : vector<16x128xf32>, i32 -> vector<16x128xf32>
    %c126_i32_155 = arith.constant 126 : i32
    %282 = vector.broadcast %c126_i32_155 : i32 to vector<1x128xi32>
    %283 = arith.cmpi slt, %215, %282 : vector<1x128xi32>
    %cst_156 = arith.constant 0.000000e+00 : f32
    %284 = vector.shape_cast %283 : vector<1x128xi1> to vector<1x128xi1>
    %285 = vector.broadcast %284 : vector<1x128xi1> to vector<16x128xi1>
    %286 = vector.broadcast %cst_156 : f32 to vector<16x128xf32>
    %287 = arith.select %285, %281, %286 : vector<16x128xi1>, vector<16x128xf32>
    %c14 = arith.constant 14 : index
    %c0_157 = arith.constant 0 : index
    %c0_158 = arith.constant 0 : index
    %288 = vector.load %arg16[%c14, %c0_157, %c0_158] : memref<60x8x16xbf16, #tpu.memory_space<vmem>>, vector<1x8x16xbf16>
    %289 = vector.shape_cast %288 : vector<1x8x16xbf16> to vector<8x16xbf16>
    %290 = arith.truncf %287 : vector<16x128xf32> to vector<16x128xbf16>
    %cst_159 = arith.constant dense<0.000000e+00> : vector<8x128xf32>
    %291 = tpu.matmul %289, %290, %cst_159 {dimension_numbers = #tpu.dot_dimension_numbers<[1], [0], [0], [1], [0, 0, 1, 1], [], []>} : vector<8x16xbf16>, vector<16x128xbf16>, vector<8x128xf32> -> vector<8x128xf32>
    %292 = arith.addf %280, %291 : vector<8x128xf32>
    %c16_160 = arith.constant 16 : index
    %c0_161 = arith.constant 0 : index
    %293 = vector.load %arg20[%c16_160, %c0_161] : memref<32x256xf32, #tpu.memory_space<vmem>>, vector<8x128xf32>
    tpu.vector_store %arg20[%c16_160, %c0_161], %292 {strides = array<i32>} : memref<32x256xf32, #tpu.memory_space<vmem>>, vector<8x128xf32>,
    %c0_162 = arith.constant 0 : index
    %c0_163 = arith.constant 0 : index
    %294 = vector.load %arg20[%c0_162, %c0_163] : memref<32x256xf32, #tpu.memory_space<vmem>>, vector<32x128xf32>
    %c3_164 = arith.constant 3 : index
    %c0_165 = arith.constant 0 : index
    %c0_166 = arith.constant 0 : index
    %295 = vector.load %arg9[%c3_164, %c0_165, %c0_166] : memref<12x32x2xf32, #tpu.memory_space<vmem>>, vector<1x32x2xf32>
    %296 = vector.shape_cast %295 : vector<1x32x2xf32> to vector<32x2xf32>
    %297 = vector.extract_strided_slice %296 {offsets = [0, 0], sizes = [32, 1], strides = [1, 1]} : vector<32x2xf32> to vector<32x1xf32>
    %298 = vector.broadcast %297 : vector<32x1xf32> to vector<32x128xf32>
    %299 = arith.mulf %294, %298 : vector<32x128xf32>
    %300 = vector.extract_strided_slice %296 {offsets = [0, 1], sizes = [32, 1], strides = [1, 1]} : vector<32x2xf32> to vector<32x1xf32>
    %301 = vector.broadcast %300 : vector<32x1xf32> to vector<32x128xf32>
    %302 = arith.addf %299, %301 : vector<32x128xf32>
    %cst_167 = arith.constant 0.000000e+00 : f32
    %303 = vector.broadcast %cst_167 : f32 to vector<32x128xf32>
    %304 = arith.maximumf %302, %303 : vector<32x128xf32>
    %c3_168 = arith.constant 3 : index
    %c0_169 = arith.constant 0 : index
    %c0_170 = arith.constant 0 : index
    %305 = vector.load %arg15[%c3_168, %c0_169, %c0_170] : memref<12x16x32xbf16, #tpu.memory_space<vmem>>, vector<1x16x32xbf16>
    %306 = vector.shape_cast %305 : vector<1x16x32xbf16> to vector<16x32xbf16>
    %307 = arith.truncf %304 : vector<32x128xf32> to vector<32x128xbf16>
    %cst_171 = arith.constant dense<0.000000e+00> : vector<16x128xf32>
    %308 = tpu.matmul %306, %307, %cst_171 {dimension_numbers = #tpu.dot_dimension_numbers<[1], [0], [0], [1], [0, 0, 1, 1], [], []>} : vector<16x32xbf16>, vector<32x128xbf16>, vector<16x128xf32> -> vector<16x128xf32>
    %c3_172 = arith.constant 3 : index
    %c0_173 = arith.constant 0 : index
    %c0_174 = arith.constant 0 : index
    %309 = vector.load %arg10[%c3_172, %c0_173, %c0_174] : memref<12x16x2xf32, #tpu.memory_space<vmem>>, vector<1x16x2xf32>
    %310 = vector.shape_cast %309 : vector<1x16x2xf32> to vector<16x2xf32>
    %311 = vector.extract_strided_slice %310 {offsets = [0, 0], sizes = [16, 1], strides = [1, 1]} : vector<16x2xf32> to vector<16x1xf32>
    %312 = vector.broadcast %311 : vector<16x1xf32> to vector<16x128xf32>
    %313 = arith.mulf %308, %312 : vector<16x128xf32>
    %314 = vector.extract_strided_slice %310 {offsets = [0, 1], sizes = [16, 1], strides = [1, 1]} : vector<16x2xf32> to vector<16x1xf32>
    %315 = vector.broadcast %314 : vector<16x1xf32> to vector<16x128xf32>
    %316 = arith.addf %313, %315 : vector<16x128xf32>
    %cst_175 = arith.constant 0.000000e+00 : f32
    %317 = vector.broadcast %cst_175 : f32 to vector<16x128xf32>
    %318 = arith.maximumf %316, %317 : vector<16x128xf32>
    %c2_i32_176 = arith.constant 2 : i32
    %319 = tpu.dynamic_rotate %318 by %c2_i32_176 dim 1 : vector<16x128xf32>, i32 -> vector<16x128xf32>
    %c2_i32_177 = arith.constant 2 : i32
    %320 = vector.broadcast %c2_i32_177 : i32 to vector<1x128xi32>
    %321 = arith.cmpi sge, %215, %320 : vector<1x128xi32>
    %cst_178 = arith.constant 0.000000e+00 : f32
    %322 = vector.shape_cast %321 : vector<1x128xi1> to vector<1x128xi1>
    %323 = vector.broadcast %322 : vector<1x128xi1> to vector<16x128xi1>
    %324 = vector.broadcast %cst_178 : f32 to vector<16x128xf32>
    %325 = arith.select %323, %319, %324 : vector<16x128xi1>, vector<16x128xf32>
    %c15 = arith.constant 15 : index
    %c0_179 = arith.constant 0 : index
    %c0_180 = arith.constant 0 : index
    %326 = vector.load %arg16[%c15, %c0_179, %c0_180] : memref<60x8x16xbf16, #tpu.memory_space<vmem>>, vector<1x8x16xbf16>
    %327 = vector.shape_cast %326 : vector<1x8x16xbf16> to vector<8x16xbf16>
    %328 = arith.truncf %325 : vector<16x128xf32> to vector<16x128xbf16>
    %cst_181 = arith.constant dense<0.000000e+00> : vector<8x128xf32>
    %329 = tpu.matmul %327, %328, %cst_181 {dimension_numbers = #tpu.dot_dimension_numbers<[1], [0], [0], [1], [0, 0, 1, 1], [], []>} : vector<8x16xbf16>, vector<16x128xbf16>, vector<8x128xf32> -> vector<8x128xf32>
    %c1_i32_182 = arith.constant 1 : i32
    %330 = tpu.dynamic_rotate %318 by %c1_i32_182 dim 1 : vector<16x128xf32>, i32 -> vector<16x128xf32>
    %c1_i32_183 = arith.constant 1 : i32
    %331 = vector.broadcast %c1_i32_183 : i32 to vector<1x128xi32>
    %332 = arith.cmpi sge, %215, %331 : vector<1x128xi32>
    %cst_184 = arith.constant 0.000000e+00 : f32
    %333 = vector.shape_cast %332 : vector<1x128xi1> to vector<1x128xi1>
    %334 = vector.broadcast %333 : vector<1x128xi1> to vector<16x128xi1>
    %335 = vector.broadcast %cst_184 : f32 to vector<16x128xf32>
    %336 = arith.select %334, %330, %335 : vector<16x128xi1>, vector<16x128xf32>
    %c16_185 = arith.constant 16 : index
    %c0_186 = arith.constant 0 : index
    %c0_187 = arith.constant 0 : index
    %337 = vector.load %arg16[%c16_185, %c0_186, %c0_187] : memref<60x8x16xbf16, #tpu.memory_space<vmem>>, vector<1x8x16xbf16>
    %338 = vector.shape_cast %337 : vector<1x8x16xbf16> to vector<8x16xbf16>
    %339 = arith.truncf %336 : vector<16x128xf32> to vector<16x128xbf16>
    %cst_188 = arith.constant dense<0.000000e+00> : vector<8x128xf32>
    %340 = tpu.matmul %338, %339, %cst_188 {dimension_numbers = #tpu.dot_dimension_numbers<[1], [0], [0], [1], [0, 0, 1, 1], [], []>} : vector<8x16xbf16>, vector<16x128xbf16>, vector<8x128xf32> -> vector<8x128xf32>
    %341 = arith.addf %329, %340 : vector<8x128xf32>
    %c17 = arith.constant 17 : index
    %c0_189 = arith.constant 0 : index
    %c0_190 = arith.constant 0 : index
    %342 = vector.load %arg16[%c17, %c0_189, %c0_190] : memref<60x8x16xbf16, #tpu.memory_space<vmem>>, vector<1x8x16xbf16>
    %343 = vector.shape_cast %342 : vector<1x8x16xbf16> to vector<8x16xbf16>
    %344 = arith.truncf %318 : vector<16x128xf32> to vector<16x128xbf16>
    %cst_191 = arith.constant dense<0.000000e+00> : vector<8x128xf32>
    %345 = tpu.matmul %343, %344, %cst_191 {dimension_numbers = #tpu.dot_dimension_numbers<[1], [0], [0], [1], [0, 0, 1, 1], [], []>} : vector<8x16xbf16>, vector<16x128xbf16>, vector<8x128xf32> -> vector<8x128xf32>
    %346 = arith.addf %341, %345 : vector<8x128xf32>
    %c127_i32_192 = arith.constant 127 : i32
    %347 = tpu.dynamic_rotate %318 by %c127_i32_192 dim 1 : vector<16x128xf32>, i32 -> vector<16x128xf32>
    %c127_i32_193 = arith.constant 127 : i32
    %348 = vector.broadcast %c127_i32_193 : i32 to vector<1x128xi32>
    %349 = arith.cmpi slt, %215, %348 : vector<1x128xi32>
    %cst_194 = arith.constant 0.000000e+00 : f32
    %350 = vector.shape_cast %349 : vector<1x128xi1> to vector<1x128xi1>
    %351 = vector.broadcast %350 : vector<1x128xi1> to vector<16x128xi1>
    %352 = vector.broadcast %cst_194 : f32 to vector<16x128xf32>
    %353 = arith.select %351, %347, %352 : vector<16x128xi1>, vector<16x128xf32>
    %c18 = arith.constant 18 : index
    %c0_195 = arith.constant 0 : index
    %c0_196 = arith.constant 0 : index
    %354 = vector.load %arg16[%c18, %c0_195, %c0_196] : memref<60x8x16xbf16, #tpu.memory_space<vmem>>, vector<1x8x16xbf16>
    %355 = vector.shape_cast %354 : vector<1x8x16xbf16> to vector<8x16xbf16>
    %356 = arith.truncf %353 : vector<16x128xf32> to vector<16x128xbf16>
    %cst_197 = arith.constant dense<0.000000e+00> : vector<8x128xf32>
    %357 = tpu.matmul %355, %356, %cst_197 {dimension_numbers = #tpu.dot_dimension_numbers<[1], [0], [0], [1], [0, 0, 1, 1], [], []>} : vector<8x16xbf16>, vector<16x128xbf16>, vector<8x128xf32> -> vector<8x128xf32>
    %358 = arith.addf %346, %357 : vector<8x128xf32>
    %c126_i32_198 = arith.constant 126 : i32
    %359 = tpu.dynamic_rotate %318 by %c126_i32_198 dim 1 : vector<16x128xf32>, i32 -> vector<16x128xf32>
    %c126_i32_199 = arith.constant 126 : i32
    %360 = vector.broadcast %c126_i32_199 : i32 to vector<1x128xi32>
    %361 = arith.cmpi slt, %215, %360 : vector<1x128xi32>
    %cst_200 = arith.constant 0.000000e+00 : f32
    %362 = vector.shape_cast %361 : vector<1x128xi1> to vector<1x128xi1>
    %363 = vector.broadcast %362 : vector<1x128xi1> to vector<16x128xi1>
    %364 = vector.broadcast %cst_200 : f32 to vector<16x128xf32>
    %365 = arith.select %363, %359, %364 : vector<16x128xi1>, vector<16x128xf32>
    %c19 = arith.constant 19 : index
    %c0_201 = arith.constant 0 : index
    %c0_202 = arith.constant 0 : index
    %366 = vector.load %arg16[%c19, %c0_201, %c0_202] : memref<60x8x16xbf16, #tpu.memory_space<vmem>>, vector<1x8x16xbf16>
    %367 = vector.shape_cast %366 : vector<1x8x16xbf16> to vector<8x16xbf16>
    %368 = arith.truncf %365 : vector<16x128xf32> to vector<16x128xbf16>
    %cst_203 = arith.constant dense<0.000000e+00> : vector<8x128xf32>
    %369 = tpu.matmul %367, %368, %cst_203 {dimension_numbers = #tpu.dot_dimension_numbers<[1], [0], [0], [1], [0, 0, 1, 1], [], []>} : vector<8x16xbf16>, vector<16x128xbf16>, vector<8x128xf32> -> vector<8x128xf32>
    %370 = arith.addf %358, %369 : vector<8x128xf32>
    %c24_204 = arith.constant 24 : index
    %c0_205 = arith.constant 0 : index
    %371 = vector.load %arg20[%c24_204, %c0_205] : memref<32x256xf32, #tpu.memory_space<vmem>>, vector<8x128xf32>
    tpu.vector_store %arg20[%c24_204, %c0_205], %370 {strides = array<i32>} : memref<32x256xf32, #tpu.memory_space<vmem>>, vector<8x128xf32>,
    %c0_206 = arith.constant 0 : index
    %c0_207 = arith.constant 0 : index
    %372 = vector.load %arg20[%c0_206, %c0_207] : memref<32x256xf32, #tpu.memory_space<vmem>>, vector<32x128xf32>
    %c1_208 = arith.constant 1 : index
    %c0_209 = arith.constant 0 : index
    %c0_210 = arith.constant 0 : index
    %373 = vector.load %arg12[%c1_208, %c0_209, %c0_210] : memref<5x32x2xf32, #tpu.memory_space<vmem>>, vector<1x32x2xf32>
    %374 = vector.shape_cast %373 : vector<1x32x2xf32> to vector<32x2xf32>
    %375 = vector.extract_strided_slice %374 {offsets = [0, 0], sizes = [32, 1], strides = [1, 1]} : vector<32x2xf32> to vector<32x1xf32>
    %376 = vector.broadcast %375 : vector<32x1xf32> to vector<32x128xf32>
    %377 = arith.mulf %372, %376 : vector<32x128xf32>
    %378 = vector.extract_strided_slice %374 {offsets = [0, 1], sizes = [32, 1], strides = [1, 1]} : vector<32x2xf32> to vector<32x1xf32>
    %379 = vector.broadcast %378 : vector<32x1xf32> to vector<32x128xf32>
    %380 = arith.addf %377, %379 : vector<32x128xf32>
    %cst_211 = arith.constant 0.000000e+00 : f32
    %381 = vector.broadcast %cst_211 : f32 to vector<32x128xf32>
    %382 = arith.maximumf %380, %381 : vector<32x128xf32>
    %c1_212 = arith.constant 1 : index
    %c0_213 = arith.constant 0 : index
    %c0_214 = arith.constant 0 : index
    %383 = vector.load %arg18[%c1_212, %c0_213, %c0_214] : memref<5x16x32xbf16, #tpu.memory_space<vmem>>, vector<1x16x32xbf16>
    %384 = vector.shape_cast %383 : vector<1x16x32xbf16> to vector<16x32xbf16>
    %385 = arith.truncf %382 : vector<32x128xf32> to vector<32x128xbf16>
    %cst_215 = arith.constant dense<0.000000e+00> : vector<16x128xf32>
    %386 = tpu.matmul %384, %385, %cst_215 {dimension_numbers = #tpu.dot_dimension_numbers<[1], [0], [0], [1], [0, 0, 1, 1], [], []>} : vector<16x32xbf16>, vector<32x128xbf16>, vector<16x128xf32> -> vector<16x128xf32>
    %c0_216 = arith.constant 0 : index
    %c0_217 = arith.constant 0 : index
    %387 = vector.load %arg3[%c0_216, %c0_217] : memref<128x64xbf16, #tpu.memory_space<vmem>>, vector<128x64xbf16>
    %388 = arith.truncf %386 : vector<16x128xf32> to vector<16x128xbf16>
    %cst_218 = arith.constant dense<0.000000e+00> : vector<16x64xf32>
    %389 = tpu.matmul %388, %387, %cst_218 {dimension_numbers = #tpu.dot_dimension_numbers<[1], [0], [0], [1], [0, 0, 1, 1], [], []>} : vector<16x128xbf16>, vector<128x64xbf16>, vector<16x64xf32> -> vector<16x64xf32>
    %c0_219 = arith.constant 0 : index
    %c0_220 = arith.constant 0 : index
    %390 = vector.load %arg20[%c0_219, %c0_220] : memref<32x256xf32, #tpu.memory_space<vmem>>, vector<16x64xf32>
    tpu.vector_store %arg20[%c0_219, %c0_220], %389 {strides = array<i32>} : memref<32x256xf32, #tpu.memory_space<vmem>>, vector<16x64xf32>,
    %c0_221 = arith.constant 0 : index
    %c0_222 = arith.constant 0 : index
    %391 = vector.load %arg20[%c0_221, %c0_222] : memref<32x256xf32, #tpu.memory_space<vmem>>, vector<32x64xf32>
    %c4_223 = arith.constant 4 : index
    %c0_224 = arith.constant 0 : index
    %c0_225 = arith.constant 0 : index
    %392 = vector.load %arg9[%c4_223, %c0_224, %c0_225] : memref<12x32x2xf32, #tpu.memory_space<vmem>>, vector<1x32x2xf32>
    %393 = vector.shape_cast %392 : vector<1x32x2xf32> to vector<32x2xf32>
    %394 = vector.extract_strided_slice %393 {offsets = [0, 0], sizes = [32, 1], strides = [1, 1]} : vector<32x2xf32> to vector<32x1xf32>
    %395 = vector.broadcast %394 : vector<32x1xf32> to vector<32x64xf32>
    %396 = arith.mulf %391, %395 : vector<32x64xf32>
    %397 = vector.extract_strided_slice %393 {offsets = [0, 1], sizes = [32, 1], strides = [1, 1]} : vector<32x2xf32> to vector<32x1xf32>
    %398 = vector.broadcast %397 : vector<32x1xf32> to vector<32x64xf32>
    %399 = arith.addf %396, %398 : vector<32x64xf32>
    %cst_226 = arith.constant 0.000000e+00 : f32
    %400 = vector.broadcast %cst_226 : f32 to vector<32x64xf32>
    %401 = arith.maximumf %399, %400 : vector<32x64xf32>
    %c4_227 = arith.constant 4 : index
    %c0_228 = arith.constant 0 : index
    %c0_229 = arith.constant 0 : index
    %402 = vector.load %arg15[%c4_227, %c0_228, %c0_229] : memref<12x16x32xbf16, #tpu.memory_space<vmem>>, vector<1x16x32xbf16>
    %403 = vector.shape_cast %402 : vector<1x16x32xbf16> to vector<16x32xbf16>
    %404 = arith.truncf %401 : vector<32x64xf32> to vector<32x64xbf16>
    %cst_230 = arith.constant dense<0.000000e+00> : vector<16x64xf32>
    %405 = tpu.matmul %403, %404, %cst_230 {dimension_numbers = #tpu.dot_dimension_numbers<[1], [0], [0], [1], [0, 0, 1, 1], [], []>} : vector<16x32xbf16>, vector<32x64xbf16>, vector<16x64xf32> -> vector<16x64xf32>
    %c4_231 = arith.constant 4 : index
    %c0_232 = arith.constant 0 : index
    %c0_233 = arith.constant 0 : index
    %406 = vector.load %arg10[%c4_231, %c0_232, %c0_233] : memref<12x16x2xf32, #tpu.memory_space<vmem>>, vector<1x16x2xf32>
    %407 = vector.shape_cast %406 : vector<1x16x2xf32> to vector<16x2xf32>
    %408 = vector.extract_strided_slice %407 {offsets = [0, 0], sizes = [16, 1], strides = [1, 1]} : vector<16x2xf32> to vector<16x1xf32>
    %409 = vector.broadcast %408 : vector<16x1xf32> to vector<16x64xf32>
    %410 = arith.mulf %405, %409 : vector<16x64xf32>
    %411 = vector.extract_strided_slice %407 {offsets = [0, 1], sizes = [16, 1], strides = [1, 1]} : vector<16x2xf32> to vector<16x1xf32>
    %412 = vector.broadcast %411 : vector<16x1xf32> to vector<16x64xf32>
    %413 = arith.addf %410, %412 : vector<16x64xf32>
    %cst_234 = arith.constant 0.000000e+00 : f32
    %414 = vector.broadcast %cst_234 : f32 to vector<16x64xf32>
    %415 = arith.maximumf %413, %414 : vector<16x64xf32>
    %cst_235 = arith.constant 0.000000e+00 : f32
    %416 = vector.broadcast %cst_235 : f32 to vector<16x2xf32>
    %417 = vector.extract_strided_slice %415 {offsets = [0, 0], sizes = [16, 62], strides = [1, 1]} : vector<16x64xf32> to vector<16x62xf32>
    %418 = tpu.concatenate %416, %417 in 1 : vector<16x2xf32>, vector<16x62xf32> -> vector<16x64xf32>
    %c20 = arith.constant 20 : index
    %c0_236 = arith.constant 0 : index
    %c0_237 = arith.constant 0 : index
    %419 = vector.load %arg16[%c20, %c0_236, %c0_237] : memref<60x8x16xbf16, #tpu.memory_space<vmem>>, vector<1x8x16xbf16>
    %420 = vector.shape_cast %419 : vector<1x8x16xbf16> to vector<8x16xbf16>
    %421 = arith.truncf %418 : vector<16x64xf32> to vector<16x64xbf16>
    %cst_238 = arith.constant dense<0.000000e+00> : vector<8x64xf32>
    %422 = tpu.matmul %420, %421, %cst_238 {dimension_numbers = #tpu.dot_dimension_numbers<[1], [0], [0], [1], [0, 0, 1, 1], [], []>} : vector<8x16xbf16>, vector<16x64xbf16>, vector<8x64xf32> -> vector<8x64xf32>
    %cst_239 = arith.constant 0.000000e+00 : f32
    %423 = vector.broadcast %cst_239 : f32 to vector<16x1xf32>
    %424 = vector.extract_strided_slice %415 {offsets = [0, 0], sizes = [16, 63], strides = [1, 1]} : vector<16x64xf32> to vector<16x63xf32>
    %425 = tpu.concatenate %423, %424 in 1 : vector<16x1xf32>, vector<16x63xf32> -> vector<16x64xf32>
    %c21 = arith.constant 21 : index
    %c0_240 = arith.constant 0 : index
    %c0_241 = arith.constant 0 : index
    %426 = vector.load %arg16[%c21, %c0_240, %c0_241] : memref<60x8x16xbf16, #tpu.memory_space<vmem>>, vector<1x8x16xbf16>
    %427 = vector.shape_cast %426 : vector<1x8x16xbf16> to vector<8x16xbf16>
    %428 = arith.truncf %425 : vector<16x64xf32> to vector<16x64xbf16>
    %cst_242 = arith.constant dense<0.000000e+00> : vector<8x64xf32>
    %429 = tpu.matmul %427, %428, %cst_242 {dimension_numbers = #tpu.dot_dimension_numbers<[1], [0], [0], [1], [0, 0, 1, 1], [], []>} : vector<8x16xbf16>, vector<16x64xbf16>, vector<8x64xf32> -> vector<8x64xf32>
    %430 = arith.addf %422, %429 : vector<8x64xf32>
    %c22 = arith.constant 22 : index
    %c0_243 = arith.constant 0 : index
    %c0_244 = arith.constant 0 : index
    %431 = vector.load %arg16[%c22, %c0_243, %c0_244] : memref<60x8x16xbf16, #tpu.memory_space<vmem>>, vector<1x8x16xbf16>
    %432 = vector.shape_cast %431 : vector<1x8x16xbf16> to vector<8x16xbf16>
    %433 = arith.truncf %415 : vector<16x64xf32> to vector<16x64xbf16>
    %cst_245 = arith.constant dense<0.000000e+00> : vector<8x64xf32>
    %434 = tpu.matmul %432, %433, %cst_245 {dimension_numbers = #tpu.dot_dimension_numbers<[1], [0], [0], [1], [0, 0, 1, 1], [], []>} : vector<8x16xbf16>, vector<16x64xbf16>, vector<8x64xf32> -> vector<8x64xf32>
    %435 = arith.addf %430, %434 : vector<8x64xf32>
    %cst_246 = arith.constant 0.000000e+00 : f32
    %436 = vector.broadcast %cst_246 : f32 to vector<16x1xf32>
    %437 = vector.extract_strided_slice %415 {offsets = [0, 1], sizes = [16, 63], strides = [1, 1]} : vector<16x64xf32> to vector<16x63xf32>
    %438 = tpu.concatenate %437, %436 in 1 : vector<16x63xf32>, vector<16x1xf32> -> vector<16x64xf32>
    %c23 = arith.constant 23 : index
    %c0_247 = arith.constant 0 : index
    %c0_248 = arith.constant 0 : index
    %439 = vector.load %arg16[%c23, %c0_247, %c0_248] : memref<60x8x16xbf16, #tpu.memory_space<vmem>>, vector<1x8x16xbf16>
    %440 = vector.shape_cast %439 : vector<1x8x16xbf16> to vector<8x16xbf16>
    %441 = arith.truncf %438 : vector<16x64xf32> to vector<16x64xbf16>
    %cst_249 = arith.constant dense<0.000000e+00> : vector<8x64xf32>
    %442 = tpu.matmul %440, %441, %cst_249 {dimension_numbers = #tpu.dot_dimension_numbers<[1], [0], [0], [1], [0, 0, 1, 1], [], []>} : vector<8x16xbf16>, vector<16x64xbf16>, vector<8x64xf32> -> vector<8x64xf32>
    %443 = arith.addf %435, %442 : vector<8x64xf32>
    %cst_250 = arith.constant 0.000000e+00 : f32
    %444 = vector.broadcast %cst_250 : f32 to vector<16x2xf32>
    %445 = vector.extract_strided_slice %415 {offsets = [0, 2], sizes = [16, 62], strides = [1, 1]} : vector<16x64xf32> to vector<16x62xf32>
    %446 = tpu.concatenate %445, %444 in 1 : vector<16x62xf32>, vector<16x2xf32> -> vector<16x64xf32>
    %c24_251 = arith.constant 24 : index
    %c0_252 = arith.constant 0 : index
    %c0_253 = arith.constant 0 : index
    %447 = vector.load %arg16[%c24_251, %c0_252, %c0_253] : memref<60x8x16xbf16, #tpu.memory_space<vmem>>, vector<1x8x16xbf16>
    %448 = vector.shape_cast %447 : vector<1x8x16xbf16> to vector<8x16xbf16>
    %449 = arith.truncf %446 : vector<16x64xf32> to vector<16x64xbf16>
    %cst_254 = arith.constant dense<0.000000e+00> : vector<8x64xf32>
    %450 = tpu.matmul %448, %449, %cst_254 {dimension_numbers = #tpu.dot_dimension_numbers<[1], [0], [0], [1], [0, 0, 1, 1], [], []>} : vector<8x16xbf16>, vector<16x64xbf16>, vector<8x64xf32> -> vector<8x64xf32>
    %451 = arith.addf %443, %450 : vector<8x64xf32>
    %c16_255 = arith.constant 16 : index
    %c0_256 = arith.constant 0 : index
    %452 = vector.load %arg20[%c16_255, %c0_256] : memref<32x256xf32, #tpu.memory_space<vmem>>, vector<8x64xf32>
    tpu.vector_store %arg20[%c16_255, %c0_256], %451 {strides = array<i32>} : memref<32x256xf32, #tpu.memory_space<vmem>>, vector<8x64xf32>,
    %c0_257 = arith.constant 0 : index
    %c0_258 = arith.constant 0 : index
    %453 = vector.load %arg20[%c0_257, %c0_258] : memref<32x256xf32, #tpu.memory_space<vmem>>, vector<32x64xf32>
    %c5_259 = arith.constant 5 : index
    %c0_260 = arith.constant 0 : index
    %c0_261 = arith.constant 0 : index
    %454 = vector.load %arg9[%c5_259, %c0_260, %c0_261] : memref<12x32x2xf32, #tpu.memory_space<vmem>>, vector<1x32x2xf32>
    %455 = vector.shape_cast %454 : vector<1x32x2xf32> to vector<32x2xf32>
    %456 = vector.extract_strided_slice %455 {offsets = [0, 0], sizes = [32, 1], strides = [1, 1]} : vector<32x2xf32> to vector<32x1xf32>
    %457 = vector.broadcast %456 : vector<32x1xf32> to vector<32x64xf32>
    %458 = arith.mulf %453, %457 : vector<32x64xf32>
    %459 = vector.extract_strided_slice %455 {offsets = [0, 1], sizes = [32, 1], strides = [1, 1]} : vector<32x2xf32> to vector<32x1xf32>
    %460 = vector.broadcast %459 : vector<32x1xf32> to vector<32x64xf32>
    %461 = arith.addf %458, %460 : vector<32x64xf32>
    %cst_262 = arith.constant 0.000000e+00 : f32
    %462 = vector.broadcast %cst_262 : f32 to vector<32x64xf32>
    %463 = arith.maximumf %461, %462 : vector<32x64xf32>
    %c5_263 = arith.constant 5 : index
    %c0_264 = arith.constant 0 : index
    %c0_265 = arith.constant 0 : index
    %464 = vector.load %arg15[%c5_263, %c0_264, %c0_265] : memref<12x16x32xbf16, #tpu.memory_space<vmem>>, vector<1x16x32xbf16>
    %465 = vector.shape_cast %464 : vector<1x16x32xbf16> to vector<16x32xbf16>
    %466 = arith.truncf %463 : vector<32x64xf32> to vector<32x64xbf16>
    %cst_266 = arith.constant dense<0.000000e+00> : vector<16x64xf32>
    %467 = tpu.matmul %465, %466, %cst_266 {dimension_numbers = #tpu.dot_dimension_numbers<[1], [0], [0], [1], [0, 0, 1, 1], [], []>} : vector<16x32xbf16>, vector<32x64xbf16>, vector<16x64xf32> -> vector<16x64xf32>
    %c5_267 = arith.constant 5 : index
    %c0_268 = arith.constant 0 : index
    %c0_269 = arith.constant 0 : index
    %468 = vector.load %arg10[%c5_267, %c0_268, %c0_269] : memref<12x16x2xf32, #tpu.memory_space<vmem>>, vector<1x16x2xf32>
    %469 = vector.shape_cast %468 : vector<1x16x2xf32> to vector<16x2xf32>
    %470 = vector.extract_strided_slice %469 {offsets = [0, 0], sizes = [16, 1], strides = [1, 1]} : vector<16x2xf32> to vector<16x1xf32>
    %471 = vector.broadcast %470 : vector<16x1xf32> to vector<16x64xf32>
    %472 = arith.mulf %467, %471 : vector<16x64xf32>
    %473 = vector.extract_strided_slice %469 {offsets = [0, 1], sizes = [16, 1], strides = [1, 1]} : vector<16x2xf32> to vector<16x1xf32>
    %474 = vector.broadcast %473 : vector<16x1xf32> to vector<16x64xf32>
    %475 = arith.addf %472, %474 : vector<16x64xf32>
    %cst_270 = arith.constant 0.000000e+00 : f32
    %476 = vector.broadcast %cst_270 : f32 to vector<16x64xf32>
    %477 = arith.maximumf %475, %476 : vector<16x64xf32>
    %cst_271 = arith.constant 0.000000e+00 : f32
    %478 = vector.broadcast %cst_271 : f32 to vector<16x2xf32>
    %479 = vector.extract_strided_slice %477 {offsets = [0, 0], sizes = [16, 62], strides = [1, 1]} : vector<16x64xf32> to vector<16x62xf32>
    %480 = tpu.concatenate %478, %479 in 1 : vector<16x2xf32>, vector<16x62xf32> -> vector<16x64xf32>
    %c25 = arith.constant 25 : index
    %c0_272 = arith.constant 0 : index
    %c0_273 = arith.constant 0 : index
    %481 = vector.load %arg16[%c25, %c0_272, %c0_273] : memref<60x8x16xbf16, #tpu.memory_space<vmem>>, vector<1x8x16xbf16>
    %482 = vector.shape_cast %481 : vector<1x8x16xbf16> to vector<8x16xbf16>
    %483 = arith.truncf %480 : vector<16x64xf32> to vector<16x64xbf16>
    %cst_274 = arith.constant dense<0.000000e+00> : vector<8x64xf32>
    %484 = tpu.matmul %482, %483, %cst_274 {dimension_numbers = #tpu.dot_dimension_numbers<[1], [0], [0], [1], [0, 0, 1, 1], [], []>} : vector<8x16xbf16>, vector<16x64xbf16>, vector<8x64xf32> -> vector<8x64xf32>
    %cst_275 = arith.constant 0.000000e+00 : f32
    %485 = vector.broadcast %cst_275 : f32 to vector<16x1xf32>
    %486 = vector.extract_strided_slice %477 {offsets = [0, 0], sizes = [16, 63], strides = [1, 1]} : vector<16x64xf32> to vector<16x63xf32>
    %487 = tpu.concatenate %485, %486 in 1 : vector<16x1xf32>, vector<16x63xf32> -> vector<16x64xf32>
    %c26 = arith.constant 26 : index
    %c0_276 = arith.constant 0 : index
    %c0_277 = arith.constant 0 : index
    %488 = vector.load %arg16[%c26, %c0_276, %c0_277] : memref<60x8x16xbf16, #tpu.memory_space<vmem>>, vector<1x8x16xbf16>
    %489 = vector.shape_cast %488 : vector<1x8x16xbf16> to vector<8x16xbf16>
    %490 = arith.truncf %487 : vector<16x64xf32> to vector<16x64xbf16>
    %cst_278 = arith.constant dense<0.000000e+00> : vector<8x64xf32>
    %491 = tpu.matmul %489, %490, %cst_278 {dimension_numbers = #tpu.dot_dimension_numbers<[1], [0], [0], [1], [0, 0, 1, 1], [], []>} : vector<8x16xbf16>, vector<16x64xbf16>, vector<8x64xf32> -> vector<8x64xf32>
    %492 = arith.addf %484, %491 : vector<8x64xf32>
    %c27 = arith.constant 27 : index
    %c0_279 = arith.constant 0 : index
    %c0_280 = arith.constant 0 : index
    %493 = vector.load %arg16[%c27, %c0_279, %c0_280] : memref<60x8x16xbf16, #tpu.memory_space<vmem>>, vector<1x8x16xbf16>
    %494 = vector.shape_cast %493 : vector<1x8x16xbf16> to vector<8x16xbf16>
    %495 = arith.truncf %477 : vector<16x64xf32> to vector<16x64xbf16>
    %cst_281 = arith.constant dense<0.000000e+00> : vector<8x64xf32>
    %496 = tpu.matmul %494, %495, %cst_281 {dimension_numbers = #tpu.dot_dimension_numbers<[1], [0], [0], [1], [0, 0, 1, 1], [], []>} : vector<8x16xbf16>, vector<16x64xbf16>, vector<8x64xf32> -> vector<8x64xf32>
    %497 = arith.addf %492, %496 : vector<8x64xf32>
    %cst_282 = arith.constant 0.000000e+00 : f32
    %498 = vector.broadcast %cst_282 : f32 to vector<16x1xf32>
    %499 = vector.extract_strided_slice %477 {offsets = [0, 1], sizes = [16, 63], strides = [1, 1]} : vector<16x64xf32> to vector<16x63xf32>
    %500 = tpu.concatenate %499, %498 in 1 : vector<16x63xf32>, vector<16x1xf32> -> vector<16x64xf32>
    %c28 = arith.constant 28 : index
    %c0_283 = arith.constant 0 : index
    %c0_284 = arith.constant 0 : index
    %501 = vector.load %arg16[%c28, %c0_283, %c0_284] : memref<60x8x16xbf16, #tpu.memory_space<vmem>>, vector<1x8x16xbf16>
    %502 = vector.shape_cast %501 : vector<1x8x16xbf16> to vector<8x16xbf16>
    %503 = arith.truncf %500 : vector<16x64xf32> to vector<16x64xbf16>
    %cst_285 = arith.constant dense<0.000000e+00> : vector<8x64xf32>
    %504 = tpu.matmul %502, %503, %cst_285 {dimension_numbers = #tpu.dot_dimension_numbers<[1], [0], [0], [1], [0, 0, 1, 1], [], []>} : vector<8x16xbf16>, vector<16x64xbf16>, vector<8x64xf32> -> vector<8x64xf32>
    %505 = arith.addf %497, %504 : vector<8x64xf32>
    %cst_286 = arith.constant 0.000000e+00 : f32
    %506 = vector.broadcast %cst_286 : f32 to vector<16x2xf32>
    %507 = vector.extract_strided_slice %477 {offsets = [0, 2], sizes = [16, 62], strides = [1, 1]} : vector<16x64xf32> to vector<16x62xf32>
    %508 = tpu.concatenate %507, %506 in 1 : vector<16x62xf32>, vector<16x2xf32> -> vector<16x64xf32>
    %c29 = arith.constant 29 : index
    %c0_287 = arith.constant 0 : index
    %c0_288 = arith.constant 0 : index
    %509 = vector.load %arg16[%c29, %c0_287, %c0_288] : memref<60x8x16xbf16, #tpu.memory_space<vmem>>, vector<1x8x16xbf16>
    %510 = vector.shape_cast %509 : vector<1x8x16xbf16> to vector<8x16xbf16>
    %511 = arith.truncf %508 : vector<16x64xf32> to vector<16x64xbf16>
    %cst_289 = arith.constant dense<0.000000e+00> : vector<8x64xf32>
    %512 = tpu.matmul %510, %511, %cst_289 {dimension_numbers = #tpu.dot_dimension_numbers<[1], [0], [0], [1], [0, 0, 1, 1], [], []>} : vector<8x16xbf16>, vector<16x64xbf16>, vector<8x64xf32> -> vector<8x64xf32>
    %513 = arith.addf %505, %512 : vector<8x64xf32>
    %c24_290 = arith.constant 24 : index
    %c0_291 = arith.constant 0 : index
    %514 = vector.load %arg20[%c24_290, %c0_291] : memref<32x256xf32, #tpu.memory_space<vmem>>, vector<8x64xf32>
    tpu.vector_store %arg20[%c24_290, %c0_291], %513 {strides = array<i32>} : memref<32x256xf32, #tpu.memory_space<vmem>>, vector<8x64xf32>,
    %c0_292 = arith.constant 0 : index
    %c0_293 = arith.constant 0 : index
    %515 = vector.load %arg20[%c0_292, %c0_293] : memref<32x256xf32, #tpu.memory_space<vmem>>, vector<32x64xf32>
    %c2_294 = arith.constant 2 : index
    %c0_295 = arith.constant 0 : index
    %c0_296 = arith.constant 0 : index
    %516 = vector.load %arg12[%c2_294, %c0_295, %c0_296] : memref<5x32x2xf32, #tpu.memory_space<vmem>>, vector<1x32x2xf32>
    %517 = vector.shape_cast %516 : vector<1x32x2xf32> to vector<32x2xf32>
    %518 = vector.extract_strided_slice %517 {offsets = [0, 0], sizes = [32, 1], strides = [1, 1]} : vector<32x2xf32> to vector<32x1xf32>
    %519 = vector.broadcast %518 : vector<32x1xf32> to vector<32x64xf32>
    %520 = arith.mulf %515, %519 : vector<32x64xf32>
    %521 = vector.extract_strided_slice %517 {offsets = [0, 1], sizes = [32, 1], strides = [1, 1]} : vector<32x2xf32> to vector<32x1xf32>
    %522 = vector.broadcast %521 : vector<32x1xf32> to vector<32x64xf32>
    %523 = arith.addf %520, %522 : vector<32x64xf32>
    %cst_297 = arith.constant 0.000000e+00 : f32
    %524 = vector.broadcast %cst_297 : f32 to vector<32x64xf32>
    %525 = arith.maximumf %523, %524 : vector<32x64xf32>
    %c2_298 = arith.constant 2 : index
    %c0_299 = arith.constant 0 : index
    %c0_300 = arith.constant 0 : index
    %526 = vector.load %arg18[%c2_298, %c0_299, %c0_300] : memref<5x16x32xbf16, #tpu.memory_space<vmem>>, vector<1x16x32xbf16>
    %527 = vector.shape_cast %526 : vector<1x16x32xbf16> to vector<16x32xbf16>
    %528 = arith.truncf %525 : vector<32x64xf32> to vector<32x64xbf16>
    %cst_301 = arith.constant dense<0.000000e+00> : vector<16x64xf32>
    %529 = tpu.matmul %527, %528, %cst_301 {dimension_numbers = #tpu.dot_dimension_numbers<[1], [0], [0], [1], [0, 0, 1, 1], [], []>} : vector<16x32xbf16>, vector<32x64xbf16>, vector<16x64xf32> -> vector<16x64xf32>
    %c0_302 = arith.constant 0 : index
    %c0_303 = arith.constant 0 : index
    %530 = vector.load %arg4[%c0_302, %c0_303] : memref<64x32xbf16, #tpu.memory_space<vmem>>, vector<64x32xbf16>
    %531 = arith.truncf %529 : vector<16x64xf32> to vector<16x64xbf16>
    %cst_304 = arith.constant dense<0.000000e+00> : vector<16x32xf32>
    %532 = tpu.matmul %531, %530, %cst_304 {dimension_numbers = #tpu.dot_dimension_numbers<[1], [0], [0], [1], [0, 0, 1, 1], [], []>} : vector<16x64xbf16>, vector<64x32xbf16>, vector<16x32xf32> -> vector<16x32xf32>
    %c0_305 = arith.constant 0 : index
    %c0_306 = arith.constant 0 : index
    %533 = vector.load %arg20[%c0_305, %c0_306] : memref<32x256xf32, #tpu.memory_space<vmem>>, vector<16x32xf32>
    tpu.vector_store %arg20[%c0_305, %c0_306], %532 {strides = array<i32>} : memref<32x256xf32, #tpu.memory_space<vmem>>, vector<16x32xf32>,
    %c0_307 = arith.constant 0 : index
    %c0_308 = arith.constant 0 : index
    %534 = vector.load %arg20[%c0_307, %c0_308] : memref<32x256xf32, #tpu.memory_space<vmem>>, vector<32x32xf32>
    %c6_309 = arith.constant 6 : index
    %c0_310 = arith.constant 0 : index
    %c0_311 = arith.constant 0 : index
    %535 = vector.load %arg9[%c6_309, %c0_310, %c0_311] : memref<12x32x2xf32, #tpu.memory_space<vmem>>, vector<1x32x2xf32>
    %536 = vector.shape_cast %535 : vector<1x32x2xf32> to vector<32x2xf32>
    %537 = vector.extract_strided_slice %536 {offsets = [0, 0], sizes = [32, 1], strides = [1, 1]} : vector<32x2xf32> to vector<32x1xf32>
    %538 = vector.broadcast %537 : vector<32x1xf32> to vector<32x32xf32>
    %539 = arith.mulf %534, %538 : vector<32x32xf32>
    %540 = vector.extract_strided_slice %536 {offsets = [0, 1], sizes = [32, 1], strides = [1, 1]} : vector<32x2xf32> to vector<32x1xf32>
    %541 = vector.broadcast %540 : vector<32x1xf32> to vector<32x32xf32>
    %542 = arith.addf %539, %541 : vector<32x32xf32>
    %cst_312 = arith.constant 0.000000e+00 : f32
    %543 = vector.broadcast %cst_312 : f32 to vector<32x32xf32>
    %544 = arith.maximumf %542, %543 : vector<32x32xf32>
    %c6_313 = arith.constant 6 : index
    %c0_314 = arith.constant 0 : index
    %c0_315 = arith.constant 0 : index
    %545 = vector.load %arg15[%c6_313, %c0_314, %c0_315] : memref<12x16x32xbf16, #tpu.memory_space<vmem>>, vector<1x16x32xbf16>
    %546 = vector.shape_cast %545 : vector<1x16x32xbf16> to vector<16x32xbf16>
    %547 = arith.truncf %544 : vector<32x32xf32> to vector<32x32xbf16>
    %cst_316 = arith.constant dense<0.000000e+00> : vector<16x32xf32>
    %548 = tpu.matmul %546, %547, %cst_316 {dimension_numbers = #tpu.dot_dimension_numbers<[1], [0], [0], [1], [0, 0, 1, 1], [], []>} : vector<16x32xbf16>, vector<32x32xbf16>, vector<16x32xf32> -> vector<16x32xf32>
    %c6_317 = arith.constant 6 : index
    %c0_318 = arith.constant 0 : index
    %c0_319 = arith.constant 0 : index
    %549 = vector.load %arg10[%c6_317, %c0_318, %c0_319] : memref<12x16x2xf32, #tpu.memory_space<vmem>>, vector<1x16x2xf32>
    %550 = vector.shape_cast %549 : vector<1x16x2xf32> to vector<16x2xf32>
    %551 = vector.extract_strided_slice %550 {offsets = [0, 0], sizes = [16, 1], strides = [1, 1]} : vector<16x2xf32> to vector<16x1xf32>
    %552 = vector.broadcast %551 : vector<16x1xf32> to vector<16x32xf32>
    %553 = arith.mulf %548, %552 : vector<16x32xf32>
    %554 = vector.extract_strided_slice %550 {offsets = [0, 1], sizes = [16, 1], strides = [1, 1]} : vector<16x2xf32> to vector<16x1xf32>
    %555 = vector.broadcast %554 : vector<16x1xf32> to vector<16x32xf32>
    %556 = arith.addf %553, %555 : vector<16x32xf32>
    %cst_320 = arith.constant 0.000000e+00 : f32
    %557 = vector.broadcast %cst_320 : f32 to vector<16x32xf32>
    %558 = arith.maximumf %556, %557 : vector<16x32xf32>
    %cst_321 = arith.constant 0.000000e+00 : f32
    %559 = vector.broadcast %cst_321 : f32 to vector<16x1xf32>
    %560 = vector.extract_strided_slice %558 {offsets = [0, 0], sizes = [16, 31], strides = [1, 1]} : vector<16x32xf32> to vector<16x31xf32>
    %561 = tpu.concatenate %559, %560 in 1 : vector<16x1xf32>, vector<16x31xf32> -> vector<16x32xf32>
    %c31 = arith.constant 31 : index
    %c0_322 = arith.constant 0 : index
    %c0_323 = arith.constant 0 : index
    %562 = vector.load %arg16[%c31, %c0_322, %c0_323] : memref<60x8x16xbf16, #tpu.memory_space<vmem>>, vector<1x8x16xbf16>
    %563 = vector.shape_cast %562 : vector<1x8x16xbf16> to vector<8x16xbf16>
    %564 = arith.truncf %561 : vector<16x32xf32> to vector<16x32xbf16>
    %cst_324 = arith.constant dense<0.000000e+00> : vector<8x32xf32>
    %565 = tpu.matmul %563, %564, %cst_324 {dimension_numbers = #tpu.dot_dimension_numbers<[1], [0], [0], [1], [0, 0, 1, 1], [], []>} : vector<8x16xbf16>, vector<16x32xbf16>, vector<8x32xf32> -> vector<8x32xf32>
    %c32 = arith.constant 32 : index
    %c0_325 = arith.constant 0 : index
    %c0_326 = arith.constant 0 : index
    %566 = vector.load %arg16[%c32, %c0_325, %c0_326] : memref<60x8x16xbf16, #tpu.memory_space<vmem>>, vector<1x8x16xbf16>
    %567 = vector.shape_cast %566 : vector<1x8x16xbf16> to vector<8x16xbf16>
    %568 = arith.truncf %558 : vector<16x32xf32> to vector<16x32xbf16>
    %cst_327 = arith.constant dense<0.000000e+00> : vector<8x32xf32>
    %569 = tpu.matmul %567, %568, %cst_327 {dimension_numbers = #tpu.dot_dimension_numbers<[1], [0], [0], [1], [0, 0, 1, 1], [], []>} : vector<8x16xbf16>, vector<16x32xbf16>, vector<8x32xf32> -> vector<8x32xf32>
    %570 = arith.addf %565, %569 : vector<8x32xf32>
    %cst_328 = arith.constant 0.000000e+00 : f32
    %571 = vector.broadcast %cst_328 : f32 to vector<16x1xf32>
    %572 = vector.extract_strided_slice %558 {offsets = [0, 1], sizes = [16, 31], strides = [1, 1]} : vector<16x32xf32> to vector<16x31xf32>
    %573 = tpu.concatenate %572, %571 in 1 : vector<16x31xf32>, vector<16x1xf32> -> vector<16x32xf32>
    %c33 = arith.constant 33 : index
    %c0_329 = arith.constant 0 : index
    %c0_330 = arith.constant 0 : index
    %574 = vector.load %arg16[%c33, %c0_329, %c0_330] : memref<60x8x16xbf16, #tpu.memory_space<vmem>>, vector<1x8x16xbf16>
    %575 = vector.shape_cast %574 : vector<1x8x16xbf16> to vector<8x16xbf16>
    %576 = arith.truncf %573 : vector<16x32xf32> to vector<16x32xbf16>
    %cst_331 = arith.constant dense<0.000000e+00> : vector<8x32xf32>
    %577 = tpu.matmul %575, %576, %cst_331 {dimension_numbers = #tpu.dot_dimension_numbers<[1], [0], [0], [1], [0, 0, 1, 1], [], []>} : vector<8x16xbf16>, vector<16x32xbf16>, vector<8x32xf32> -> vector<8x32xf32>
    %578 = arith.addf %570, %577 : vector<8x32xf32>
    %c16_332 = arith.constant 16 : index
    %c0_333 = arith.constant 0 : index
    %579 = vector.load %arg20[%c16_332, %c0_333] : memref<32x256xf32, #tpu.memory_space<vmem>>, vector<8x32xf32>
    tpu.vector_store %arg20[%c16_332, %c0_333], %578 {strides = array<i32>} : memref<32x256xf32, #tpu.memory_space<vmem>>, vector<8x32xf32>,
    %c0_334 = arith.constant 0 : index
    %c0_335 = arith.constant 0 : index
    %580 = vector.load %arg20[%c0_334, %c0_335] : memref<32x256xf32, #tpu.memory_space<vmem>>, vector<32x32xf32>
    %c7_336 = arith.constant 7 : index
    %c0_337 = arith.constant 0 : index
    %c0_338 = arith.constant 0 : index
    %581 = vector.load %arg9[%c7_336, %c0_337, %c0_338] : memref<12x32x2xf32, #tpu.memory_space<vmem>>, vector<1x32x2xf32>
    %582 = vector.shape_cast %581 : vector<1x32x2xf32> to vector<32x2xf32>
    %583 = vector.extract_strided_slice %582 {offsets = [0, 0], sizes = [32, 1], strides = [1, 1]} : vector<32x2xf32> to vector<32x1xf32>
    %584 = vector.broadcast %583 : vector<32x1xf32> to vector<32x32xf32>
    %585 = arith.mulf %580, %584 : vector<32x32xf32>
    %586 = vector.extract_strided_slice %582 {offsets = [0, 1], sizes = [32, 1], strides = [1, 1]} : vector<32x2xf32> to vector<32x1xf32>
    %587 = vector.broadcast %586 : vector<32x1xf32> to vector<32x32xf32>
    %588 = arith.addf %585, %587 : vector<32x32xf32>
    %cst_339 = arith.constant 0.000000e+00 : f32
    %589 = vector.broadcast %cst_339 : f32 to vector<32x32xf32>
    %590 = arith.maximumf %588, %589 : vector<32x32xf32>
    %c7_340 = arith.constant 7 : index
    %c0_341 = arith.constant 0 : index
    %c0_342 = arith.constant 0 : index
    %591 = vector.load %arg15[%c7_340, %c0_341, %c0_342] : memref<12x16x32xbf16, #tpu.memory_space<vmem>>, vector<1x16x32xbf16>
    %592 = vector.shape_cast %591 : vector<1x16x32xbf16> to vector<16x32xbf16>
    %593 = arith.truncf %590 : vector<32x32xf32> to vector<32x32xbf16>
    %cst_343 = arith.constant dense<0.000000e+00> : vector<16x32xf32>
    %594 = tpu.matmul %592, %593, %cst_343 {dimension_numbers = #tpu.dot_dimension_numbers<[1], [0], [0], [1], [0, 0, 1, 1], [], []>} : vector<16x32xbf16>, vector<32x32xbf16>, vector<16x32xf32> -> vector<16x32xf32>
    %c7_344 = arith.constant 7 : index
    %c0_345 = arith.constant 0 : index
    %c0_346 = arith.constant 0 : index
    %595 = vector.load %arg10[%c7_344, %c0_345, %c0_346] : memref<12x16x2xf32, #tpu.memory_space<vmem>>, vector<1x16x2xf32>
    %596 = vector.shape_cast %595 : vector<1x16x2xf32> to vector<16x2xf32>
    %597 = vector.extract_strided_slice %596 {offsets = [0, 0], sizes = [16, 1], strides = [1, 1]} : vector<16x2xf32> to vector<16x1xf32>
    %598 = vector.broadcast %597 : vector<16x1xf32> to vector<16x32xf32>
    %599 = arith.mulf %594, %598 : vector<16x32xf32>
    %600 = vector.extract_strided_slice %596 {offsets = [0, 1], sizes = [16, 1], strides = [1, 1]} : vector<16x2xf32> to vector<16x1xf32>
    %601 = vector.broadcast %600 : vector<16x1xf32> to vector<16x32xf32>
    %602 = arith.addf %599, %601 : vector<16x32xf32>
    %cst_347 = arith.constant 0.000000e+00 : f32
    %603 = vector.broadcast %cst_347 : f32 to vector<16x32xf32>
    %604 = arith.maximumf %602, %603 : vector<16x32xf32>
    %cst_348 = arith.constant 0.000000e+00 : f32
    %605 = vector.broadcast %cst_348 : f32 to vector<16x1xf32>
    %606 = vector.extract_strided_slice %604 {offsets = [0, 0], sizes = [16, 31], strides = [1, 1]} : vector<16x32xf32> to vector<16x31xf32>
    %607 = tpu.concatenate %605, %606 in 1 : vector<16x1xf32>, vector<16x31xf32> -> vector<16x32xf32>
    %c36 = arith.constant 36 : index
    %c0_349 = arith.constant 0 : index
    %c0_350 = arith.constant 0 : index
    %608 = vector.load %arg16[%c36, %c0_349, %c0_350] : memref<60x8x16xbf16, #tpu.memory_space<vmem>>, vector<1x8x16xbf16>
    %609 = vector.shape_cast %608 : vector<1x8x16xbf16> to vector<8x16xbf16>
    %610 = arith.truncf %607 : vector<16x32xf32> to vector<16x32xbf16>
    %cst_351 = arith.constant dense<0.000000e+00> : vector<8x32xf32>
    %611 = tpu.matmul %609, %610, %cst_351 {dimension_numbers = #tpu.dot_dimension_numbers<[1], [0], [0], [1], [0, 0, 1, 1], [], []>} : vector<8x16xbf16>, vector<16x32xbf16>, vector<8x32xf32> -> vector<8x32xf32>
    %c37 = arith.constant 37 : index
    %c0_352 = arith.constant 0 : index
    %c0_353 = arith.constant 0 : index
    %612 = vector.load %arg16[%c37, %c0_352, %c0_353] : memref<60x8x16xbf16, #tpu.memory_space<vmem>>, vector<1x8x16xbf16>
    %613 = vector.shape_cast %612 : vector<1x8x16xbf16> to vector<8x16xbf16>
    %614 = arith.truncf %604 : vector<16x32xf32> to vector<16x32xbf16>
    %cst_354 = arith.constant dense<0.000000e+00> : vector<8x32xf32>
    %615 = tpu.matmul %613, %614, %cst_354 {dimension_numbers = #tpu.dot_dimension_numbers<[1], [0], [0], [1], [0, 0, 1, 1], [], []>} : vector<8x16xbf16>, vector<16x32xbf16>, vector<8x32xf32> -> vector<8x32xf32>
    %616 = arith.addf %611, %615 : vector<8x32xf32>
    %cst_355 = arith.constant 0.000000e+00 : f32
    %617 = vector.broadcast %cst_355 : f32 to vector<16x1xf32>
    %618 = vector.extract_strided_slice %604 {offsets = [0, 1], sizes = [16, 31], strides = [1, 1]} : vector<16x32xf32> to vector<16x31xf32>
    %619 = tpu.concatenate %618, %617 in 1 : vector<16x31xf32>, vector<16x1xf32> -> vector<16x32xf32>
    %c38 = arith.constant 38 : index
    %c0_356 = arith.constant 0 : index
    %c0_357 = arith.constant 0 : index
    %620 = vector.load %arg16[%c38, %c0_356, %c0_357] : memref<60x8x16xbf16, #tpu.memory_space<vmem>>, vector<1x8x16xbf16>
    %621 = vector.shape_cast %620 : vector<1x8x16xbf16> to vector<8x16xbf16>
    %622 = arith.truncf %619 : vector<16x32xf32> to vector<16x32xbf16>
    %cst_358 = arith.constant dense<0.000000e+00> : vector<8x32xf32>
    %623 = tpu.matmul %621, %622, %cst_358 {dimension_numbers = #tpu.dot_dimension_numbers<[1], [0], [0], [1], [0, 0, 1, 1], [], []>} : vector<8x16xbf16>, vector<16x32xbf16>, vector<8x32xf32> -> vector<8x32xf32>
    %624 = arith.addf %616, %623 : vector<8x32xf32>
    %c24_359 = arith.constant 24 : index
    %c0_360 = arith.constant 0 : index
    %625 = vector.load %arg20[%c24_359, %c0_360] : memref<32x256xf32, #tpu.memory_space<vmem>>, vector<8x32xf32>
    tpu.vector_store %arg20[%c24_359, %c0_360], %624 {strides = array<i32>} : memref<32x256xf32, #tpu.memory_space<vmem>>, vector<8x32xf32>,
    %c0_361 = arith.constant 0 : index
    %c0_362 = arith.constant 0 : index
    %626 = vector.load %arg20[%c0_361, %c0_362] : memref<32x256xf32, #tpu.memory_space<vmem>>, vector<32x32xf32>
    %c3_363 = arith.constant 3 : index
    %c0_364 = arith.constant 0 : index
    %c0_365 = arith.constant 0 : index
    %627 = vector.load %arg12[%c3_363, %c0_364, %c0_365] : memref<5x32x2xf32, #tpu.memory_space<vmem>>, vector<1x32x2xf32>
    %628 = vector.shape_cast %627 : vector<1x32x2xf32> to vector<32x2xf32>
    %629 = vector.extract_strided_slice %628 {offsets = [0, 0], sizes = [32, 1], strides = [1, 1]} : vector<32x2xf32> to vector<32x1xf32>
    %630 = vector.broadcast %629 : vector<32x1xf32> to vector<32x32xf32>
    %631 = arith.mulf %626, %630 : vector<32x32xf32>
    %632 = vector.extract_strided_slice %628 {offsets = [0, 1], sizes = [32, 1], strides = [1, 1]} : vector<32x2xf32> to vector<32x1xf32>
    %633 = vector.broadcast %632 : vector<32x1xf32> to vector<32x32xf32>
    %634 = arith.addf %631, %633 : vector<32x32xf32>
    %cst_366 = arith.constant 0.000000e+00 : f32
    %635 = vector.broadcast %cst_366 : f32 to vector<32x32xf32>
    %636 = arith.maximumf %634, %635 : vector<32x32xf32>
    %c3_367 = arith.constant 3 : index
    %c0_368 = arith.constant 0 : index
    %c0_369 = arith.constant 0 : index
    %637 = vector.load %arg18[%c3_367, %c0_368, %c0_369] : memref<5x16x32xbf16, #tpu.memory_space<vmem>>, vector<1x16x32xbf16>
    %638 = vector.shape_cast %637 : vector<1x16x32xbf16> to vector<16x32xbf16>
    %639 = arith.truncf %636 : vector<32x32xf32> to vector<32x32xbf16>
    %cst_370 = arith.constant dense<0.000000e+00> : vector<16x32xf32>
    %640 = tpu.matmul %638, %639, %cst_370 {dimension_numbers = #tpu.dot_dimension_numbers<[1], [0], [0], [1], [0, 0, 1, 1], [], []>} : vector<16x32xbf16>, vector<32x32xbf16>, vector<16x32xf32> -> vector<16x32xf32>
    %c0_371 = arith.constant 0 : index
    %c0_372 = arith.constant 0 : index
    %641 = vector.load %arg5[%c0_371, %c0_372] : memref<32x16xbf16, #tpu.memory_space<vmem>>, vector<32x16xbf16>
    %642 = arith.truncf %640 : vector<16x32xf32> to vector<16x32xbf16>
    %cst_373 = arith.constant dense<0.000000e+00> : vector<16x16xf32>
    %643 = tpu.matmul %642, %641, %cst_373 {dimension_numbers = #tpu.dot_dimension_numbers<[1], [0], [0], [1], [0, 0, 1, 1], [], []>} : vector<16x32xbf16>, vector<32x16xbf16>, vector<16x16xf32> -> vector<16x16xf32>
    %c0_374 = arith.constant 0 : index
    %c0_375 = arith.constant 0 : index
    %644 = vector.load %arg20[%c0_374, %c0_375] : memref<32x256xf32, #tpu.memory_space<vmem>>, vector<16x16xf32>
    tpu.vector_store %arg20[%c0_374, %c0_375], %643 {strides = array<i32>} : memref<32x256xf32, #tpu.memory_space<vmem>>, vector<16x16xf32>,
    %c0_376 = arith.constant 0 : index
    %c0_377 = arith.constant 0 : index
    %645 = vector.load %arg20[%c0_376, %c0_377] : memref<32x256xf32, #tpu.memory_space<vmem>>, vector<32x16xf32>
    %c8_378 = arith.constant 8 : index
    %c0_379 = arith.constant 0 : index
    %c0_380 = arith.constant 0 : index
    %646 = vector.load %arg9[%c8_378, %c0_379, %c0_380] : memref<12x32x2xf32, #tpu.memory_space<vmem>>, vector<1x32x2xf32>
    %647 = vector.shape_cast %646 : vector<1x32x2xf32> to vector<32x2xf32>
    %648 = vector.extract_strided_slice %647 {offsets = [0, 0], sizes = [32, 1], strides = [1, 1]} : vector<32x2xf32> to vector<32x1xf32>
    %649 = vector.broadcast %648 : vector<32x1xf32> to vector<32x16xf32>
    %650 = arith.mulf %645, %649 : vector<32x16xf32>
    %651 = vector.extract_strided_slice %647 {offsets = [0, 1], sizes = [32, 1], strides = [1, 1]} : vector<32x2xf32> to vector<32x1xf32>
    %652 = vector.broadcast %651 : vector<32x1xf32> to vector<32x16xf32>
    %653 = arith.addf %650, %652 : vector<32x16xf32>
    %cst_381 = arith.constant 0.000000e+00 : f32
    %654 = vector.broadcast %cst_381 : f32 to vector<32x16xf32>
    %655 = arith.maximumf %653, %654 : vector<32x16xf32>
    %c8_382 = arith.constant 8 : index
    %c0_383 = arith.constant 0 : index
    %c0_384 = arith.constant 0 : index
    %656 = vector.load %arg15[%c8_382, %c0_383, %c0_384] : memref<12x16x32xbf16, #tpu.memory_space<vmem>>, vector<1x16x32xbf16>
    %657 = vector.shape_cast %656 : vector<1x16x32xbf16> to vector<16x32xbf16>
    %658 = arith.truncf %655 : vector<32x16xf32> to vector<32x16xbf16>
    %cst_385 = arith.constant dense<0.000000e+00> : vector<16x16xf32>
    %659 = tpu.matmul %657, %658, %cst_385 {dimension_numbers = #tpu.dot_dimension_numbers<[1], [0], [0], [1], [0, 0, 1, 1], [], []>} : vector<16x32xbf16>, vector<32x16xbf16>, vector<16x16xf32> -> vector<16x16xf32>
    %c8_386 = arith.constant 8 : index
    %c0_387 = arith.constant 0 : index
    %c0_388 = arith.constant 0 : index
    %660 = vector.load %arg10[%c8_386, %c0_387, %c0_388] : memref<12x16x2xf32, #tpu.memory_space<vmem>>, vector<1x16x2xf32>
    %661 = vector.shape_cast %660 : vector<1x16x2xf32> to vector<16x2xf32>
    %662 = vector.extract_strided_slice %661 {offsets = [0, 0], sizes = [16, 1], strides = [1, 1]} : vector<16x2xf32> to vector<16x1xf32>
    %663 = vector.broadcast %662 : vector<16x1xf32> to vector<16x16xf32>
    %664 = arith.mulf %659, %663 : vector<16x16xf32>
    %665 = vector.extract_strided_slice %661 {offsets = [0, 1], sizes = [16, 1], strides = [1, 1]} : vector<16x2xf32> to vector<16x1xf32>
    %666 = vector.broadcast %665 : vector<16x1xf32> to vector<16x16xf32>
    %667 = arith.addf %664, %666 : vector<16x16xf32>
    %cst_389 = arith.constant 0.000000e+00 : f32
    %668 = vector.broadcast %cst_389 : f32 to vector<16x16xf32>
    %669 = arith.maximumf %667, %668 : vector<16x16xf32>
    %cst_390 = arith.constant 0.000000e+00 : f32
    %670 = vector.broadcast %cst_390 : f32 to vector<16x1xf32>
    %671 = vector.extract_strided_slice %669 {offsets = [0, 0], sizes = [16, 15], strides = [1, 1]} : vector<16x16xf32> to vector<16x15xf32>
    %672 = tpu.concatenate %670, %671 in 1 : vector<16x1xf32>, vector<16x15xf32> -> vector<16x16xf32>
    %c41 = arith.constant 41 : index
    %c0_391 = arith.constant 0 : index
    %c0_392 = arith.constant 0 : index
    %673 = vector.load %arg16[%c41, %c0_391, %c0_392] : memref<60x8x16xbf16, #tpu.memory_space<vmem>>, vector<1x8x16xbf16>
    %674 = vector.shape_cast %673 : vector<1x8x16xbf16> to vector<8x16xbf16>
    %675 = arith.truncf %672 : vector<16x16xf32> to vector<16x16xbf16>
    %cst_393 = arith.constant dense<0.000000e+00> : vector<8x16xf32>
    %676 = tpu.matmul %674, %675, %cst_393 {dimension_numbers = #tpu.dot_dimension_numbers<[1], [0], [0], [1], [0, 0, 1, 1], [], []>} : vector<8x16xbf16>, vector<16x16xbf16>, vector<8x16xf32> -> vector<8x16xf32>
    %c42 = arith.constant 42 : index
    %c0_394 = arith.constant 0 : index
    %c0_395 = arith.constant 0 : index
    %677 = vector.load %arg16[%c42, %c0_394, %c0_395] : memref<60x8x16xbf16, #tpu.memory_space<vmem>>, vector<1x8x16xbf16>
    %678 = vector.shape_cast %677 : vector<1x8x16xbf16> to vector<8x16xbf16>
    %679 = arith.truncf %669 : vector<16x16xf32> to vector<16x16xbf16>
    %cst_396 = arith.constant dense<0.000000e+00> : vector<8x16xf32>
    %680 = tpu.matmul %678, %679, %cst_396 {dimension_numbers = #tpu.dot_dimension_numbers<[1], [0], [0], [1], [0, 0, 1, 1], [], []>} : vector<8x16xbf16>, vector<16x16xbf16>, vector<8x16xf32> -> vector<8x16xf32>
    %681 = arith.addf %676, %680 : vector<8x16xf32>
    %cst_397 = arith.constant 0.000000e+00 : f32
    %682 = vector.broadcast %cst_397 : f32 to vector<16x1xf32>
    %683 = vector.extract_strided_slice %669 {offsets = [0, 1], sizes = [16, 15], strides = [1, 1]} : vector<16x16xf32> to vector<16x15xf32>
    %684 = tpu.concatenate %683, %682 in 1 : vector<16x15xf32>, vector<16x1xf32> -> vector<16x16xf32>
    %c43 = arith.constant 43 : index
    %c0_398 = arith.constant 0 : index
    %c0_399 = arith.constant 0 : index
    %685 = vector.load %arg16[%c43, %c0_398, %c0_399] : memref<60x8x16xbf16, #tpu.memory_space<vmem>>, vector<1x8x16xbf16>
    %686 = vector.shape_cast %685 : vector<1x8x16xbf16> to vector<8x16xbf16>
    %687 = arith.truncf %684 : vector<16x16xf32> to vector<16x16xbf16>
    %cst_400 = arith.constant dense<0.000000e+00> : vector<8x16xf32>
    %688 = tpu.matmul %686, %687, %cst_400 {dimension_numbers = #tpu.dot_dimension_numbers<[1], [0], [0], [1], [0, 0, 1, 1], [], []>} : vector<8x16xbf16>, vector<16x16xbf16>, vector<8x16xf32> -> vector<8x16xf32>
    %689 = arith.addf %681, %688 : vector<8x16xf32>
    %c16_401 = arith.constant 16 : index
    %c0_402 = arith.constant 0 : index
    %690 = vector.load %arg20[%c16_401, %c0_402] : memref<32x256xf32, #tpu.memory_space<vmem>>, vector<8x16xf32>
    tpu.vector_store %arg20[%c16_401, %c0_402], %689 {strides = array<i32>} : memref<32x256xf32, #tpu.memory_space<vmem>>, vector<8x16xf32>,
    %c0_403 = arith.constant 0 : index
    %c0_404 = arith.constant 0 : index
    %691 = vector.load %arg20[%c0_403, %c0_404] : memref<32x256xf32, #tpu.memory_space<vmem>>, vector<32x16xf32>
    %c9_405 = arith.constant 9 : index
    %c0_406 = arith.constant 0 : index
    %c0_407 = arith.constant 0 : index
    %692 = vector.load %arg9[%c9_405, %c0_406, %c0_407] : memref<12x32x2xf32, #tpu.memory_space<vmem>>, vector<1x32x2xf32>
    %693 = vector.shape_cast %692 : vector<1x32x2xf32> to vector<32x2xf32>
    %694 = vector.extract_strided_slice %693 {offsets = [0, 0], sizes = [32, 1], strides = [1, 1]} : vector<32x2xf32> to vector<32x1xf32>
    %695 = vector.broadcast %694 : vector<32x1xf32> to vector<32x16xf32>
    %696 = arith.mulf %691, %695 : vector<32x16xf32>
    %697 = vector.extract_strided_slice %693 {offsets = [0, 1], sizes = [32, 1], strides = [1, 1]} : vector<32x2xf32> to vector<32x1xf32>
    %698 = vector.broadcast %697 : vector<32x1xf32> to vector<32x16xf32>
    %699 = arith.addf %696, %698 : vector<32x16xf32>
    %cst_408 = arith.constant 0.000000e+00 : f32
    %700 = vector.broadcast %cst_408 : f32 to vector<32x16xf32>
    %701 = arith.maximumf %699, %700 : vector<32x16xf32>
    %c9_409 = arith.constant 9 : index
    %c0_410 = arith.constant 0 : index
    %c0_411 = arith.constant 0 : index
    %702 = vector.load %arg15[%c9_409, %c0_410, %c0_411] : memref<12x16x32xbf16, #tpu.memory_space<vmem>>, vector<1x16x32xbf16>
    %703 = vector.shape_cast %702 : vector<1x16x32xbf16> to vector<16x32xbf16>
    %704 = arith.truncf %701 : vector<32x16xf32> to vector<32x16xbf16>
    %cst_412 = arith.constant dense<0.000000e+00> : vector<16x16xf32>
    %705 = tpu.matmul %703, %704, %cst_412 {dimension_numbers = #tpu.dot_dimension_numbers<[1], [0], [0], [1], [0, 0, 1, 1], [], []>} : vector<16x32xbf16>, vector<32x16xbf16>, vector<16x16xf32> -> vector<16x16xf32>
    %c9_413 = arith.constant 9 : index
    %c0_414 = arith.constant 0 : index
    %c0_415 = arith.constant 0 : index
    %706 = vector.load %arg10[%c9_413, %c0_414, %c0_415] : memref<12x16x2xf32, #tpu.memory_space<vmem>>, vector<1x16x2xf32>
    %707 = vector.shape_cast %706 : vector<1x16x2xf32> to vector<16x2xf32>
    %708 = vector.extract_strided_slice %707 {offsets = [0, 0], sizes = [16, 1], strides = [1, 1]} : vector<16x2xf32> to vector<16x1xf32>
    %709 = vector.broadcast %708 : vector<16x1xf32> to vector<16x16xf32>
    %710 = arith.mulf %705, %709 : vector<16x16xf32>
    %711 = vector.extract_strided_slice %707 {offsets = [0, 1], sizes = [16, 1], strides = [1, 1]} : vector<16x2xf32> to vector<16x1xf32>
    %712 = vector.broadcast %711 : vector<16x1xf32> to vector<16x16xf32>
    %713 = arith.addf %710, %712 : vector<16x16xf32>
    %cst_416 = arith.constant 0.000000e+00 : f32
    %714 = vector.broadcast %cst_416 : f32 to vector<16x16xf32>
    %715 = arith.maximumf %713, %714 : vector<16x16xf32>
    %cst_417 = arith.constant 0.000000e+00 : f32
    %716 = vector.broadcast %cst_417 : f32 to vector<16x1xf32>
    %717 = vector.extract_strided_slice %715 {offsets = [0, 0], sizes = [16, 15], strides = [1, 1]} : vector<16x16xf32> to vector<16x15xf32>
    %718 = tpu.concatenate %716, %717 in 1 : vector<16x1xf32>, vector<16x15xf32> -> vector<16x16xf32>
    %c46 = arith.constant 46 : index
    %c0_418 = arith.constant 0 : index
    %c0_419 = arith.constant 0 : index
    %719 = vector.load %arg16[%c46, %c0_418, %c0_419] : memref<60x8x16xbf16, #tpu.memory_space<vmem>>, vector<1x8x16xbf16>
    %720 = vector.shape_cast %719 : vector<1x8x16xbf16> to vector<8x16xbf16>
    %721 = arith.truncf %718 : vector<16x16xf32> to vector<16x16xbf16>
    %cst_420 = arith.constant dense<0.000000e+00> : vector<8x16xf32>
    %722 = tpu.matmul %720, %721, %cst_420 {dimension_numbers = #tpu.dot_dimension_numbers<[1], [0], [0], [1], [0, 0, 1, 1], [], []>} : vector<8x16xbf16>, vector<16x16xbf16>, vector<8x16xf32> -> vector<8x16xf32>
    %c47 = arith.constant 47 : index
    %c0_421 = arith.constant 0 : index
    %c0_422 = arith.constant 0 : index
    %723 = vector.load %arg16[%c47, %c0_421, %c0_422] : memref<60x8x16xbf16, #tpu.memory_space<vmem>>, vector<1x8x16xbf16>
    %724 = vector.shape_cast %723 : vector<1x8x16xbf16> to vector<8x16xbf16>
    %725 = arith.truncf %715 : vector<16x16xf32> to vector<16x16xbf16>
    %cst_423 = arith.constant dense<0.000000e+00> : vector<8x16xf32>
    %726 = tpu.matmul %724, %725, %cst_423 {dimension_numbers = #tpu.dot_dimension_numbers<[1], [0], [0], [1], [0, 0, 1, 1], [], []>} : vector<8x16xbf16>, vector<16x16xbf16>, vector<8x16xf32> -> vector<8x16xf32>
    %727 = arith.addf %722, %726 : vector<8x16xf32>
    %cst_424 = arith.constant 0.000000e+00 : f32
    %728 = vector.broadcast %cst_424 : f32 to vector<16x1xf32>
    %729 = vector.extract_strided_slice %715 {offsets = [0, 1], sizes = [16, 15], strides = [1, 1]} : vector<16x16xf32> to vector<16x15xf32>
    %730 = tpu.concatenate %729, %728 in 1 : vector<16x15xf32>, vector<16x1xf32> -> vector<16x16xf32>
    %c48 = arith.constant 48 : index
    %c0_425 = arith.constant 0 : index
    %c0_426 = arith.constant 0 : index
    %731 = vector.load %arg16[%c48, %c0_425, %c0_426] : memref<60x8x16xbf16, #tpu.memory_space<vmem>>, vector<1x8x16xbf16>
    %732 = vector.shape_cast %731 : vector<1x8x16xbf16> to vector<8x16xbf16>
    %733 = arith.truncf %730 : vector<16x16xf32> to vector<16x16xbf16>
    %cst_427 = arith.constant dense<0.000000e+00> : vector<8x16xf32>
    %734 = tpu.matmul %732, %733, %cst_427 {dimension_numbers = #tpu.dot_dimension_numbers<[1], [0], [0], [1], [0, 0, 1, 1], [], []>} : vector<8x16xbf16>, vector<16x16xbf16>, vector<8x16xf32> -> vector<8x16xf32>
    %735 = arith.addf %727, %734 : vector<8x16xf32>
    %c24_428 = arith.constant 24 : index
    %c0_429 = arith.constant 0 : index
    %736 = vector.load %arg20[%c24_428, %c0_429] : memref<32x256xf32, #tpu.memory_space<vmem>>, vector<8x16xf32>
    tpu.vector_store %arg20[%c24_428, %c0_429], %735 {strides = array<i32>} : memref<32x256xf32, #tpu.memory_space<vmem>>, vector<8x16xf32>,
    %c0_430 = arith.constant 0 : index
    %c0_431 = arith.constant 0 : index
    %737 = vector.load %arg20[%c0_430, %c0_431] : memref<32x256xf32, #tpu.memory_space<vmem>>, vector<32x16xf32>
    %c4_432 = arith.constant 4 : index
    %c0_433 = arith.constant 0 : index
    %c0_434 = arith.constant 0 : index
    %738 = vector.load %arg12[%c4_432, %c0_433, %c0_434] : memref<5x32x2xf32, #tpu.memory_space<vmem>>, vector<1x32x2xf32>
    %739 = vector.shape_cast %738 : vector<1x32x2xf32> to vector<32x2xf32>
    %740 = vector.extract_strided_slice %739 {offsets = [0, 0], sizes = [32, 1], strides = [1, 1]} : vector<32x2xf32> to vector<32x1xf32>
    %741 = vector.broadcast %740 : vector<32x1xf32> to vector<32x16xf32>
    %742 = arith.mulf %737, %741 : vector<32x16xf32>
    %743 = vector.extract_strided_slice %739 {offsets = [0, 1], sizes = [32, 1], strides = [1, 1]} : vector<32x2xf32> to vector<32x1xf32>
    %744 = vector.broadcast %743 : vector<32x1xf32> to vector<32x16xf32>
    %745 = arith.addf %742, %744 : vector<32x16xf32>
    %cst_435 = arith.constant 0.000000e+00 : f32
    %746 = vector.broadcast %cst_435 : f32 to vector<32x16xf32>
    %747 = arith.maximumf %745, %746 : vector<32x16xf32>
    %c4_436 = arith.constant 4 : index
    %c0_437 = arith.constant 0 : index
    %c0_438 = arith.constant 0 : index
    %748 = vector.load %arg18[%c4_436, %c0_437, %c0_438] : memref<5x16x32xbf16, #tpu.memory_space<vmem>>, vector<1x16x32xbf16>
    %749 = vector.shape_cast %748 : vector<1x16x32xbf16> to vector<16x32xbf16>
    %750 = arith.truncf %747 : vector<32x16xf32> to vector<32x16xbf16>
    %cst_439 = arith.constant dense<0.000000e+00> : vector<16x16xf32>
    %751 = tpu.matmul %749, %750, %cst_439 {dimension_numbers = #tpu.dot_dimension_numbers<[1], [0], [0], [1], [0, 0, 1, 1], [], []>} : vector<16x32xbf16>, vector<32x16xbf16>, vector<16x16xf32> -> vector<16x16xf32>
    %c0_440 = arith.constant 0 : index
    %c0_441 = arith.constant 0 : index
    %752 = vector.load %arg6[%c0_440, %c0_441] : memref<16x8xbf16, #tpu.memory_space<vmem>>, vector<16x8xbf16>
    %753 = arith.truncf %751 : vector<16x16xf32> to vector<16x16xbf16>
    %cst_442 = arith.constant dense<0.000000e+00> : vector<16x8xf32>
    %754 = tpu.matmul %753, %752, %cst_442 {dimension_numbers = #tpu.dot_dimension_numbers<[1], [0], [0], [1], [0, 0, 1, 1], [], []>} : vector<16x16xbf16>, vector<16x8xbf16>, vector<16x8xf32> -> vector<16x8xf32>
    %c0_443 = arith.constant 0 : index
    %c0_444 = arith.constant 0 : index
    %755 = vector.load %arg20[%c0_443, %c0_444] : memref<32x256xf32, #tpu.memory_space<vmem>>, vector<16x8xf32>
    tpu.vector_store %arg20[%c0_443, %c0_444], %754 {strides = array<i32>} : memref<32x256xf32, #tpu.memory_space<vmem>>, vector<16x8xf32>,
    %c0_445 = arith.constant 0 : index
    %c0_446 = arith.constant 0 : index
    %756 = vector.load %arg20[%c0_445, %c0_446] : memref<32x256xf32, #tpu.memory_space<vmem>>, vector<32x8xf32>
    %c10_447 = arith.constant 10 : index
    %c0_448 = arith.constant 0 : index
    %c0_449 = arith.constant 0 : index
    %757 = vector.load %arg9[%c10_447, %c0_448, %c0_449] : memref<12x32x2xf32, #tpu.memory_space<vmem>>, vector<1x32x2xf32>
    %758 = vector.shape_cast %757 : vector<1x32x2xf32> to vector<32x2xf32>
    %759 = vector.extract_strided_slice %758 {offsets = [0, 0], sizes = [32, 1], strides = [1, 1]} : vector<32x2xf32> to vector<32x1xf32>
    %760 = vector.broadcast %759 : vector<32x1xf32> to vector<32x8xf32>
    %761 = arith.mulf %756, %760 : vector<32x8xf32>
    %762 = vector.extract_strided_slice %758 {offsets = [0, 1], sizes = [32, 1], strides = [1, 1]} : vector<32x2xf32> to vector<32x1xf32>
    %763 = vector.broadcast %762 : vector<32x1xf32> to vector<32x8xf32>
    %764 = arith.addf %761, %763 : vector<32x8xf32>
    %cst_450 = arith.constant 0.000000e+00 : f32
    %765 = vector.broadcast %cst_450 : f32 to vector<32x8xf32>
    %766 = arith.maximumf %764, %765 : vector<32x8xf32>
    %c10_451 = arith.constant 10 : index
    %c0_452 = arith.constant 0 : index
    %c0_453 = arith.constant 0 : index
    %767 = vector.load %arg15[%c10_451, %c0_452, %c0_453] : memref<12x16x32xbf16, #tpu.memory_space<vmem>>, vector<1x16x32xbf16>
    %768 = vector.shape_cast %767 : vector<1x16x32xbf16> to vector<16x32xbf16>
    %769 = arith.truncf %766 : vector<32x8xf32> to vector<32x8xbf16>
    %cst_454 = arith.constant dense<0.000000e+00> : vector<16x8xf32>
    %770 = tpu.matmul %768, %769, %cst_454 {dimension_numbers = #tpu.dot_dimension_numbers<[1], [0], [0], [1], [0, 0, 1, 1], [], []>} : vector<16x32xbf16>, vector<32x8xbf16>, vector<16x8xf32> -> vector<16x8xf32>
    %c10_455 = arith.constant 10 : index
    %c0_456 = arith.constant 0 : index
    %c0_457 = arith.constant 0 : index
    %771 = vector.load %arg10[%c10_455, %c0_456, %c0_457] : memref<12x16x2xf32, #tpu.memory_space<vmem>>, vector<1x16x2xf32>
    %772 = vector.shape_cast %771 : vector<1x16x2xf32> to vector<16x2xf32>
    %773 = vector.extract_strided_slice %772 {offsets = [0, 0], sizes = [16, 1], strides = [1, 1]} : vector<16x2xf32> to vector<16x1xf32>
    %774 = vector.broadcast %773 : vector<16x1xf32> to vector<16x8xf32>
    %775 = arith.mulf %770, %774 : vector<16x8xf32>
    %776 = vector.extract_strided_slice %772 {offsets = [0, 1], sizes = [16, 1], strides = [1, 1]} : vector<16x2xf32> to vector<16x1xf32>
    %777 = vector.broadcast %776 : vector<16x1xf32> to vector<16x8xf32>
    %778 = arith.addf %775, %777 : vector<16x8xf32>
    %cst_458 = arith.constant 0.000000e+00 : f32
    %779 = vector.broadcast %cst_458 : f32 to vector<16x8xf32>
    %780 = arith.maximumf %778, %779 : vector<16x8xf32>
    %cst_459 = arith.constant 0.000000e+00 : f32
    %781 = vector.broadcast %cst_459 : f32 to vector<16x1xf32>
    %782 = vector.extract_strided_slice %780 {offsets = [0, 0], sizes = [16, 7], strides = [1, 1]} : vector<16x8xf32> to vector<16x7xf32>
    %783 = tpu.concatenate %781, %782 in 1 : vector<16x1xf32>, vector<16x7xf32> -> vector<16x8xf32>
    %c51 = arith.constant 51 : index
    %c0_460 = arith.constant 0 : index
    %c0_461 = arith.constant 0 : index
    %784 = vector.load %arg16[%c51, %c0_460, %c0_461] : memref<60x8x16xbf16, #tpu.memory_space<vmem>>, vector<1x8x16xbf16>
    %785 = vector.shape_cast %784 : vector<1x8x16xbf16> to vector<8x16xbf16>
    %786 = arith.truncf %783 : vector<16x8xf32> to vector<16x8xbf16>
    %cst_462 = arith.constant dense<0.000000e+00> : vector<8x8xf32>
    %787 = tpu.matmul %785, %786, %cst_462 {dimension_numbers = #tpu.dot_dimension_numbers<[1], [0], [0], [1], [0, 0, 1, 1], [], []>} : vector<8x16xbf16>, vector<16x8xbf16>, vector<8x8xf32> -> vector<8x8xf32>
    %c52 = arith.constant 52 : index
    %c0_463 = arith.constant 0 : index
    %c0_464 = arith.constant 0 : index
    %788 = vector.load %arg16[%c52, %c0_463, %c0_464] : memref<60x8x16xbf16, #tpu.memory_space<vmem>>, vector<1x8x16xbf16>
    %789 = vector.shape_cast %788 : vector<1x8x16xbf16> to vector<8x16xbf16>
    %790 = arith.truncf %780 : vector<16x8xf32> to vector<16x8xbf16>
    %cst_465 = arith.constant dense<0.000000e+00> : vector<8x8xf32>
    %791 = tpu.matmul %789, %790, %cst_465 {dimension_numbers = #tpu.dot_dimension_numbers<[1], [0], [0], [1], [0, 0, 1, 1], [], []>} : vector<8x16xbf16>, vector<16x8xbf16>, vector<8x8xf32> -> vector<8x8xf32>
    %792 = arith.addf %787, %791 : vector<8x8xf32>
    %cst_466 = arith.constant 0.000000e+00 : f32
    %793 = vector.broadcast %cst_466 : f32 to vector<16x1xf32>
    %794 = vector.extract_strided_slice %780 {offsets = [0, 1], sizes = [16, 7], strides = [1, 1]} : vector<16x8xf32> to vector<16x7xf32>
    %795 = tpu.concatenate %794, %793 in 1 : vector<16x7xf32>, vector<16x1xf32> -> vector<16x8xf32>
    %c53 = arith.constant 53 : index
    %c0_467 = arith.constant 0 : index
    %c0_468 = arith.constant 0 : index
    %796 = vector.load %arg16[%c53, %c0_467, %c0_468] : memref<60x8x16xbf16, #tpu.memory_space<vmem>>, vector<1x8x16xbf16>
    %797 = vector.shape_cast %796 : vector<1x8x16xbf16> to vector<8x16xbf16>
    %798 = arith.truncf %795 : vector<16x8xf32> to vector<16x8xbf16>
    %cst_469 = arith.constant dense<0.000000e+00> : vector<8x8xf32>
    %799 = tpu.matmul %797, %798, %cst_469 {dimension_numbers = #tpu.dot_dimension_numbers<[1], [0], [0], [1], [0, 0, 1, 1], [], []>} : vector<8x16xbf16>, vector<16x8xbf16>, vector<8x8xf32> -> vector<8x8xf32>
    %800 = arith.addf %792, %799 : vector<8x8xf32>
    %c16_470 = arith.constant 16 : index
    %c0_471 = arith.constant 0 : index
    %801 = vector.load %arg20[%c16_470, %c0_471] : memref<32x256xf32, #tpu.memory_space<vmem>>, vector<8x8xf32>
    tpu.vector_store %arg20[%c16_470, %c0_471], %800 {strides = array<i32>} : memref<32x256xf32, #tpu.memory_space<vmem>>, vector<8x8xf32>,
    %c0_472 = arith.constant 0 : index
    %c0_473 = arith.constant 0 : index
    %802 = vector.load %arg20[%c0_472, %c0_473] : memref<32x256xf32, #tpu.memory_space<vmem>>, vector<32x8xf32>
    %c11_474 = arith.constant 11 : index
    %c0_475 = arith.constant 0 : index
    %c0_476 = arith.constant 0 : index
    %803 = vector.load %arg9[%c11_474, %c0_475, %c0_476] : memref<12x32x2xf32, #tpu.memory_space<vmem>>, vector<1x32x2xf32>
    %804 = vector.shape_cast %803 : vector<1x32x2xf32> to vector<32x2xf32>
    %805 = vector.extract_strided_slice %804 {offsets = [0, 0], sizes = [32, 1], strides = [1, 1]} : vector<32x2xf32> to vector<32x1xf32>
    %806 = vector.broadcast %805 : vector<32x1xf32> to vector<32x8xf32>
    %807 = arith.mulf %802, %806 : vector<32x8xf32>
    %808 = vector.extract_strided_slice %804 {offsets = [0, 1], sizes = [32, 1], strides = [1, 1]} : vector<32x2xf32> to vector<32x1xf32>
    %809 = vector.broadcast %808 : vector<32x1xf32> to vector<32x8xf32>
    %810 = arith.addf %807, %809 : vector<32x8xf32>
    %cst_477 = arith.constant 0.000000e+00 : f32
    %811 = vector.broadcast %cst_477 : f32 to vector<32x8xf32>
    %812 = arith.maximumf %810, %811 : vector<32x8xf32>
    %c11_478 = arith.constant 11 : index
    %c0_479 = arith.constant 0 : index
    %c0_480 = arith.constant 0 : index
    %813 = vector.load %arg15[%c11_478, %c0_479, %c0_480] : memref<12x16x32xbf16, #tpu.memory_space<vmem>>, vector<1x16x32xbf16>
    %814 = vector.shape_cast %813 : vector<1x16x32xbf16> to vector<16x32xbf16>
    %815 = arith.truncf %812 : vector<32x8xf32> to vector<32x8xbf16>
    %cst_481 = arith.constant dense<0.000000e+00> : vector<16x8xf32>
    %816 = tpu.matmul %814, %815, %cst_481 {dimension_numbers = #tpu.dot_dimension_numbers<[1], [0], [0], [1], [0, 0, 1, 1], [], []>} : vector<16x32xbf16>, vector<32x8xbf16>, vector<16x8xf32> -> vector<16x8xf32>
    %c11_482 = arith.constant 11 : index
    %c0_483 = arith.constant 0 : index
    %c0_484 = arith.constant 0 : index
    %817 = vector.load %arg10[%c11_482, %c0_483, %c0_484] : memref<12x16x2xf32, #tpu.memory_space<vmem>>, vector<1x16x2xf32>
    %818 = vector.shape_cast %817 : vector<1x16x2xf32> to vector<16x2xf32>
    %819 = vector.extract_strided_slice %818 {offsets = [0, 0], sizes = [16, 1], strides = [1, 1]} : vector<16x2xf32> to vector<16x1xf32>
    %820 = vector.broadcast %819 : vector<16x1xf32> to vector<16x8xf32>
    %821 = arith.mulf %816, %820 : vector<16x8xf32>
    %822 = vector.extract_strided_slice %818 {offsets = [0, 1], sizes = [16, 1], strides = [1, 1]} : vector<16x2xf32> to vector<16x1xf32>
    %823 = vector.broadcast %822 : vector<16x1xf32> to vector<16x8xf32>
    %824 = arith.addf %821, %823 : vector<16x8xf32>
    %cst_485 = arith.constant 0.000000e+00 : f32
    %825 = vector.broadcast %cst_485 : f32 to vector<16x8xf32>
    %826 = arith.maximumf %824, %825 : vector<16x8xf32>
    %cst_486 = arith.constant 0.000000e+00 : f32
    %827 = vector.broadcast %cst_486 : f32 to vector<16x1xf32>
    %828 = vector.extract_strided_slice %826 {offsets = [0, 0], sizes = [16, 7], strides = [1, 1]} : vector<16x8xf32> to vector<16x7xf32>
    %829 = tpu.concatenate %827, %828 in 1 : vector<16x1xf32>, vector<16x7xf32> -> vector<16x8xf32>
    %c56 = arith.constant 56 : index
    %c0_487 = arith.constant 0 : index
    %c0_488 = arith.constant 0 : index
    %830 = vector.load %arg16[%c56, %c0_487, %c0_488] : memref<60x8x16xbf16, #tpu.memory_space<vmem>>, vector<1x8x16xbf16>
    %831 = vector.shape_cast %830 : vector<1x8x16xbf16> to vector<8x16xbf16>
    %832 = arith.truncf %829 : vector<16x8xf32> to vector<16x8xbf16>
    %cst_489 = arith.constant dense<0.000000e+00> : vector<8x8xf32>
    %833 = tpu.matmul %831, %832, %cst_489 {dimension_numbers = #tpu.dot_dimension_numbers<[1], [0], [0], [1], [0, 0, 1, 1], [], []>} : vector<8x16xbf16>, vector<16x8xbf16>, vector<8x8xf32> -> vector<8x8xf32>
    %c57 = arith.constant 57 : index
    %c0_490 = arith.constant 0 : index
    %c0_491 = arith.constant 0 : index
    %834 = vector.load %arg16[%c57, %c0_490, %c0_491] : memref<60x8x16xbf16, #tpu.memory_space<vmem>>, vector<1x8x16xbf16>
    %835 = vector.shape_cast %834 : vector<1x8x16xbf16> to vector<8x16xbf16>
    %836 = arith.truncf %826 : vector<16x8xf32> to vector<16x8xbf16>
    %cst_492 = arith.constant dense<0.000000e+00> : vector<8x8xf32>
    %837 = tpu.matmul %835, %836, %cst_492 {dimension_numbers = #tpu.dot_dimension_numbers<[1], [0], [0], [1], [0, 0, 1, 1], [], []>} : vector<8x16xbf16>, vector<16x8xbf16>, vector<8x8xf32> -> vector<8x8xf32>
    %838 = arith.addf %833, %837 : vector<8x8xf32>
    %cst_493 = arith.constant 0.000000e+00 : f32
    %839 = vector.broadcast %cst_493 : f32 to vector<16x1xf32>
    %840 = vector.extract_strided_slice %826 {offsets = [0, 1], sizes = [16, 7], strides = [1, 1]} : vector<16x8xf32> to vector<16x7xf32>
    %841 = tpu.concatenate %840, %839 in 1 : vector<16x7xf32>, vector<16x1xf32> -> vector<16x8xf32>
    %c58 = arith.constant 58 : index
    %c0_494 = arith.constant 0 : index
    %c0_495 = arith.constant 0 : index
    %842 = vector.load %arg16[%c58, %c0_494, %c0_495] : memref<60x8x16xbf16, #tpu.memory_space<vmem>>, vector<1x8x16xbf16>
    %843 = vector.shape_cast %842 : vector<1x8x16xbf16> to vector<8x16xbf16>
    %844 = arith.truncf %841 : vector<16x8xf32> to vector<16x8xbf16>
    %cst_496 = arith.constant dense<0.000000e+00> : vector<8x8xf32>
    %845 = tpu.matmul %843, %844, %cst_496 {dimension_numbers = #tpu.dot_dimension_numbers<[1], [0], [0], [1], [0, 0, 1, 1], [], []>} : vector<8x16xbf16>, vector<16x8xbf16>, vector<8x8xf32> -> vector<8x8xf32>
    %846 = arith.addf %838, %845 : vector<8x8xf32>
    %c24_497 = arith.constant 24 : index
    %c0_498 = arith.constant 0 : index
    %847 = vector.load %arg20[%c24_497, %c0_498] : memref<32x256xf32, #tpu.memory_space<vmem>>, vector<8x8xf32>
    tpu.vector_store %arg20[%c24_497, %c0_498], %846 {strides = array<i32>} : memref<32x256xf32, #tpu.memory_space<vmem>>, vector<8x8xf32>,
    %c0_499 = arith.constant 0 : index
    %c0_500 = arith.constant 0 : index
    %848 = vector.load %arg20[%c0_499, %c0_500] : memref<32x256xf32, #tpu.memory_space<vmem>>, vector<32x8xf32>
    %c0_501 = arith.constant 0 : index
    %c0_502 = arith.constant 0 : index
    %849 = vector.load %arg11[%c0_501, %c0_502] : memref<32x2xf32, #tpu.memory_space<vmem>>, vector<32x2xf32>
    %850 = vector.extract_strided_slice %849 {offsets = [0, 0], sizes = [32, 1], strides = [1, 1]} : vector<32x2xf32> to vector<32x1xf32>
    %851 = vector.broadcast %850 : vector<32x1xf32> to vector<32x8xf32>
    %852 = arith.mulf %848, %851 : vector<32x8xf32>
    %853 = vector.extract_strided_slice %849 {offsets = [0, 1], sizes = [32, 1], strides = [1, 1]} : vector<32x2xf32> to vector<32x1xf32>
    %854 = vector.broadcast %853 : vector<32x1xf32> to vector<32x8xf32>
    %855 = arith.addf %852, %854 : vector<32x8xf32>
    %cst_503 = arith.constant 0.000000e+00 : f32
    %856 = vector.broadcast %cst_503 : f32 to vector<32x8xf32>
    %857 = arith.maximumf %855, %856 : vector<32x8xf32>
    %c0_504 = arith.constant 0 : index
    %c0_505 = arith.constant 0 : index
    %858 = vector.load %arg13[%c0_504, %c0_505] : memref<8x2xbf16, #tpu.memory_space<vmem>>, vector<8x2xbf16>
    %859 = arith.truncf %857 : vector<32x8xf32> to vector<32x8xbf16>
    %cst_506 = arith.constant dense<0.000000e+00> : vector<32x2xf32>
    %860 = tpu.matmul %859, %858, %cst_506 {dimension_numbers = #tpu.dot_dimension_numbers<[1], [0], [0], [1], [0, 0, 1, 1], [], []>} : vector<32x8xbf16>, vector<8x2xbf16>, vector<32x2xf32> -> vector<32x2xf32>
    %c0_507 = arith.constant 0 : index
    %c0_508 = arith.constant 0 : index
    %861 = vector.load %arg8[%c0_507, %c0_508] : memref<8x1xf32, #tpu.memory_space<vmem>>, vector<8x1xf32>
    %c0_509 = arith.constant 0 : index
    %c0_510 = arith.constant 0 : index
    %c0_511 = arith.constant 0 : index
    %862 = vector.load %arg17[%c0_509, %c0_510, %c0_511] : memref<2x8x32xbf16, #tpu.memory_space<vmem>>, vector<1x8x32xbf16>
    %863 = vector.shape_cast %862 : vector<1x8x32xbf16> to vector<8x32xbf16>
    %864 = vector.extract_strided_slice %860 {offsets = [0, 0], sizes = [32, 1], strides = [1, 1]} : vector<32x2xf32> to vector<32x1xf32>
    %865 = arith.truncf %864 : vector<32x1xf32> to vector<32x1xbf16>
    %cst_512 = arith.constant dense<0.000000e+00> : vector<8x1xf32>
    %866 = tpu.matmul %863, %865, %cst_512 {dimension_numbers = #tpu.dot_dimension_numbers<[1], [0], [0], [1], [0, 0, 1, 1], [], []>} : vector<8x32xbf16>, vector<32x1xbf16>, vector<8x1xf32> -> vector<8x1xf32>
    %867 = arith.addf %861, %866 : vector<8x1xf32>
    %c1_513 = arith.constant 1 : index
    %c0_514 = arith.constant 0 : index
    %c0_515 = arith.constant 0 : index
    %868 = vector.load %arg17[%c1_513, %c0_514, %c0_515] : memref<2x8x32xbf16, #tpu.memory_space<vmem>>, vector<1x8x32xbf16>
    %869 = vector.shape_cast %868 : vector<1x8x32xbf16> to vector<8x32xbf16>
    %870 = vector.extract_strided_slice %860 {offsets = [0, 1], sizes = [32, 1], strides = [1, 1]} : vector<32x2xf32> to vector<32x1xf32>
    %871 = arith.truncf %870 : vector<32x1xf32> to vector<32x1xbf16>
    %cst_516 = arith.constant dense<0.000000e+00> : vector<8x1xf32>
    %872 = tpu.matmul %869, %871, %cst_516 {dimension_numbers = #tpu.dot_dimension_numbers<[1], [0], [0], [1], [0, 0, 1, 1], [], []>} : vector<8x32xbf16>, vector<32x1xbf16>, vector<8x1xf32> -> vector<8x1xf32>
    %873 = arith.addf %867, %872 : vector<8x1xf32>
    %874 = vector.shape_cast %873 : vector<8x1xf32> to vector<8x1xf32>
    %875 = vector.broadcast %874 : vector<8x1xf32> to vector<8x128xf32>
    %c0_517 = arith.constant 0 : index
    %c0_518 = arith.constant 0 : index
    %c0_519 = arith.constant 0 : index
    %876 = vector.load %arg19[%c0_517, %c0_518, %c0_519] : memref<1x8x128xf32, #tpu.memory_space<vmem>>, vector<1x8x128xf32>
    %877 = vector.shape_cast %876 : vector<1x8x128xf32> to vector<8x128xf32>
    %878 = vector.shape_cast %875 : vector<8x128xf32> to vector<1x8x128xf32>
    tpu.vector_store %arg19[%c0_517, %c0_518, %c0_519], %878 {strides = array<i32>} : memref<1x8x128xf32, #tpu.memory_space<vmem>>, vector<1x8x128xf32>,
    return
  }
  func.func @transform_0(%arg0: i32) -> (i32, i32, i32) {
    %c0_i32 = arith.constant 0 : i32
    %c0_i32_0 = arith.constant 0 : i32
    %c0_i32_1 = arith.constant 0 : i32
    return %arg0, %c0_i32, %c0_i32_0 : i32, i32, i32
  }
  func.func @transform_1(%arg0: i32) -> (i32, i32) {
    %c0_i32 = arith.constant 0 : i32
    %c0_i32_0 = arith.constant 0 : i32
    %c0_i32_1 = arith.constant 0 : i32
    return %c0_i32, %c0_i32_0 : i32, i32
  }
  func.func @transform_2(%arg0: i32) -> (i32, i32) {
    %c0_i32 = arith.constant 0 : i32
    %c0_i32_0 = arith.constant 0 : i32
    %c0_i32_1 = arith.constant 0 : i32
    return %c0_i32, %c0_i32_0 : i32, i32
  }
  func.func @transform_3(%arg0: i32) -> (i32, i32) {
    %c0_i32 = arith.constant 0 : i32
    %c0_i32_0 = arith.constant 0 : i32
    %c0_i32_1 = arith.constant 0 : i32
    return %c0_i32, %c0_i32_0 : i32, i32
  }
  func.func @transform_4(%arg0: i32) -> (i32, i32) {
    %c0_i32 = arith.constant 0 : i32
    %c0_i32_0 = arith.constant 0 : i32
    %c0_i32_1 = arith.constant 0 : i32
    return %c0_i32, %c0_i32_0 : i32, i32
  }
  func.func @transform_5(%arg0: i32) -> (i32, i32) {
    %c0_i32 = arith.constant 0 : i32
    %c0_i32_0 = arith.constant 0 : i32
    %c0_i32_1 = arith.constant 0 : i32
    return %c0_i32, %c0_i32_0 : i32, i32
  }
  func.func @transform_6(%arg0: i32) -> (i32, i32) {
    %c0_i32 = arith.constant 0 : i32
    %c0_i32_0 = arith.constant 0 : i32
    %c0_i32_1 = arith.constant 0 : i32
    return %c0_i32, %c0_i32_0 : i32, i32
  }
  func.func @transform_7(%arg0: i32) -> (i32, i32) {
    %c0_i32 = arith.constant 0 : i32
    %c0_i32_0 = arith.constant 0 : i32
    %c0_i32_1 = arith.constant 0 : i32
    return %c0_i32, %c0_i32_0 : i32, i32
  }
  func.func @transform_8(%arg0: i32) -> (i32, i32, i32) {
    %c0_i32 = arith.constant 0 : i32
    %c0_i32_0 = arith.constant 0 : i32
    %c0_i32_1 = arith.constant 0 : i32
    %c0_i32_2 = arith.constant 0 : i32
    return %c0_i32, %c0_i32_0, %c0_i32_1 : i32, i32, i32
  }
  func.func @transform_9(%arg0: i32) -> (i32, i32, i32) {
    %c0_i32 = arith.constant 0 : i32
    %c0_i32_0 = arith.constant 0 : i32
    %c0_i32_1 = arith.constant 0 : i32
    %c0_i32_2 = arith.constant 0 : i32
    return %c0_i32, %c0_i32_0, %c0_i32_1 : i32, i32, i32
  }
  func.func @transform_10(%arg0: i32) -> (i32, i32) {
    %c0_i32 = arith.constant 0 : i32
    %c0_i32_0 = arith.constant 0 : i32
    %c0_i32_1 = arith.constant 0 : i32
    return %c0_i32, %c0_i32_0 : i32, i32
  }
  func.func @transform_11(%arg0: i32) -> (i32, i32, i32) {
    %c0_i32 = arith.constant 0 : i32
    %c0_i32_0 = arith.constant 0 : i32
    %c0_i32_1 = arith.constant 0 : i32
    %c0_i32_2 = arith.constant 0 : i32
    return %c0_i32, %c0_i32_0, %c0_i32_1 : i32, i32, i32
  }
  func.func @transform_12(%arg0: i32) -> (i32, i32) {
    %c0_i32 = arith.constant 0 : i32
    %c0_i32_0 = arith.constant 0 : i32
    %c0_i32_1 = arith.constant 0 : i32
    return %c0_i32, %c0_i32_0 : i32, i32
  }
  func.func @transform_13(%arg0: i32) -> (i32, i32, i32) {
    %c0_i32 = arith.constant 0 : i32
    %c0_i32_0 = arith.constant 0 : i32
    %c0_i32_1 = arith.constant 0 : i32
    %c0_i32_2 = arith.constant 0 : i32
    return %c0_i32, %c0_i32_0, %c0_i32_1 : i32, i32, i32
  }
  func.func @transform_14(%arg0: i32) -> (i32, i32, i32) {
    %c0_i32 = arith.constant 0 : i32
    %c0_i32_0 = arith.constant 0 : i32
    %c0_i32_1 = arith.constant 0 : i32
    %c0_i32_2 = arith.constant 0 : i32
    return %c0_i32, %c0_i32_0, %c0_i32_1 : i32, i32, i32
  }
  func.func @transform_15(%arg0: i32) -> (i32, i32, i32) {
    %c0_i32 = arith.constant 0 : i32
    %c0_i32_0 = arith.constant 0 : i32
    %c0_i32_1 = arith.constant 0 : i32
    %c0_i32_2 = arith.constant 0 : i32
    return %c0_i32, %c0_i32_0, %c0_i32_1 : i32, i32, i32
  }
  func.func @transform_16(%arg0: i32) -> (i32, i32, i32) {
    %c0_i32 = arith.constant 0 : i32
    %c0_i32_0 = arith.constant 0 : i32
    %c0_i32_1 = arith.constant 0 : i32
    %c0_i32_2 = arith.constant 0 : i32
    return %c0_i32, %c0_i32_0, %c0_i32_1 : i32, i32, i32
  }
  func.func @transform_17(%arg0: i32) -> (i32, i32, i32) {
    %c0_i32 = arith.constant 0 : i32
    %c0_i32_0 = arith.constant 0 : i32
    %c0_i32_1 = arith.constant 0 : i32
    %c0_i32_2 = arith.constant 0 : i32
    return %c0_i32, %c0_i32_0, %c0_i32_1 : i32, i32, i32
  }
  func.func @transform_18(%arg0: i32) -> (i32, i32, i32) {
    %c0_i32 = arith.constant 0 : i32
    %c0_i32_0 = arith.constant 0 : i32
    %c0_i32_1 = arith.constant 0 : i32
    return %arg0, %c0_i32, %c0_i32_0 : i32, i32, i32
  }
}

</mosaic_0001>

<bundles_post_ra>
// kernel: densenet_forward.1
= control target key start
LH: loop header
LB: loop body
LE: loop exit
PB: predicated region body
PF: predicated region fallthrough
CT: control target
= control target key end

     0   :  { %s5759_s27 = smov 0   ;;  %s7073_s0 = inlined_call_operand.vmem [shape: f32[2,16,256], index: 0, kind: input, shape index: {}]   ;;  %s7074_s1 = inlined_call_operand.vmem [shape: bf16[256,128], index: 1, kind: input, shape index: {}]   ;;  %s7075_s2 = inlined_call_operand.vmem [shape: bf16[128,64], index: 2, kind: input, shape index: {}]   ;;  %s7076_s3 = inlined_call_operand.vmem [shape: bf16[64,32], index: 3, kind: input, shape index: {}]   ;;  %s7077_s4 = inlined_call_operand.vmem [shape: bf16[32,16], index: 4, kind: input, shape index: {}]   ;;  %s7078_s5 = inlined_call_operand.vmem [shape: bf16[16,8], index: 5, kind: input, shape index: {}]   ;;  %s7079_s6 = inlined_call_operand.vmem [shape: f32[16,1], index: 6, kind: input, shape index: {}]   ;;  %s7080_s7 = inlined_call_operand.vmem [shape: f32[8,1], index: 7, kind: input, shape index: {}]   ;;  %s7081_s8 = inlined_call_operand.vmem [shape: f32[12,32,2], index: 8, kind: input, shape index: {}]   ;;  %s7082_s9 = inlined_call_operand.vmem [shape: f32[12,16,2], index: 9, kind: input, shape index: {}]   ;;  %s7083_s10 = inlined_call_operand.vmem [shape: f32[32,2], index: 10, kind: input, shape index: {}]   ;;  %s7084_s11 = inlined_call_operand.vmem [shape: f32[5,32,2], index: 11, kind: input, shape index: {}]   ;;  %s7085_s12 = inlined_call_operand.vmem [shape: bf16[8,2], index: 12, kind: input, shape index: {}]   ;;  %s7086_s13 = inlined_call_operand.vmem [shape: bf16[3,16,16], index: 13, kind: input, shape index: {}]   ;;  %s7087_s14 = inlined_call_operand.vmem [shape: bf16[12,16,32], index: 14, kind: input, shape index: {}]   ;;  %s7088_s15 = inlined_call_operand.vmem [shape: bf16[60,8,16], index: 15, kind: input, shape index: {}]   ;;  %s7089_s16 = inlined_call_operand.vmem [shape: bf16[2,8,32], index: 16, kind: input, shape index: {}]   ;;  %s7090_s17 = inlined_call_operand.vmem [shape: bf16[5,16,32], index: 17, kind: input, shape index: {}]   ;;  %s7091_s18 = inlined_call_operand.vmem [shape: f32[2,8,128], index: 18, kind: output, shape index: {}]  }
   0x1   :  { %7100 = sst [smem:[#allocation3_spill]] %s7073_s0 }
   0x2   :  { %7101 = sst [smem:[#allocation4_spill]] %s7074_s1 }
   0x3   :  { %7102 = sst [smem:[#allocation5_spill]] %s7075_s2 }
   0x4 LB: > { %s4645_s28 = sadd.s32 4294967295, %s5656_s27   ;;  %p4649_p0 = scmp.ge.s32.totalorder %s5656_s27, 1  ;;  %s5656_s27 = sphi %s5759_s27, %s28_s27  }
   0x5   : > { %p512_p1 = scmp.lt.s32.totalorder %s5656_s27, 3 }
   0x7   : > { %p513_p2 = pnand %p4649_p0, %p512_p1 }
   0x8   : > { %p565_p3 = scmp.lt.s32.totalorder (!%p513_p2), %s4645_s28, 1  ;;  %s7103_s22 = sld [smem:[#allocation3_spill]] (!%p513_p2) }
   0x9   : > { %516 = sbr.rel (%p513_p2) target bundleno = 7291 (0x1c7b), region = 92  ;;  %s5660_s19 = smov (!%p513_p2), 2  }
   0xa   : > { %s7098_s20 = smov (!%p513_p2), 127   ;;  %s7112_s24 = sld [smem:[#allocation4_spill]] (!%p513_p2) }
   0xb   : > { %s7114_s30 = smov (!%p513_p2), 126   ;;  %s7119_s26 = sld [smem:[#allocation5_spill]] (!%p513_p2) }
   0xc   : > { %s7120_s0 = smov (!%p513_p2), 127  }
   0xe   : > { %v579_v0 = vld [vmem:[%s7079_s6] sm:$0xff]  ;;  %v5658_v1 = vmov 0   ;;  %v765_v2 = vld [vmem:[%s7081_s8 + $0x10] sm:$0xff]  ;;  %s7136_s28 = smov (!%p565_p3, %s4645_s28), 1  ;;  %v5659_v3 = vmov 1   ;;  %v5244_v11 = vld [vmem:[%s7086_s13 + $0x8] sm:$0xff]  ;;  %v581_v35 = vlaneseq }
   0xf   : > { %5309 = vset.pattern.permute.xlu0 %v5658_v1  ;;  %5310 = vset.pattern.permute.xlu1 %v5658_v1  ;;  %s5242_s1 = sshll.u32 %s7136_s28, 5  ;;  %v5243_v10 = vld [vmem:[%s7086_s13] sm:$0xff]  ;;  %vm603_vm0 = vcmask 130048   ;;  %v580_v12 = vld [vmem:[%s7079_s6 + $0x8] sm:$0xff]  ;;  %v766_v13 = vld [vmem:[%s7081_s8 + $0x18] sm:$0xff]  ;;  %vm838_vm2 = vcmask 261120  }
  0x10   : > { %590 = vperm.xlu0 %5309, %v579_v0   ;;  %779 = vperm.xlu1 %5310, %v765_v2   ;;  %s569_s2 = scalar_lea.vmem %s7103_s22, %s5242_s1  ;;  %v763_v14 = vld [vmem:[%s7081_s8] sm:$0xff]  ;;  %v764_v15 = vld [vmem:[%s7081_s8 + $0x8] sm:$0xff]  ;;  %v5245_v16 = vld [vmem:[%s7086_s13 + $0x10] sm:$0xff]  ;;  %v5819_v41 = vand.u32 127, %v581_v35  ;;  %s7096_s1 = smov 1  }
  0x11   : > { %5311 = vset.pattern.permute.xlu2 %v5659_v3  ;;  %v575_v4 = vld [vmem:[%s569_s2] sm:$0xff]  ;;  %v577_v5 = vld [vmem:[%s569_s2 + $0x10] sm:$0xff]  ;;  %v576_v6 = vld [vmem:[%s569_s2 + $0x8] sm:$0xff]  ;;  %s7113_s22 = smov 1  }
  0x12   : > { %804 = vperm.xlu2 %5311, %v765_v2   ;;  %v586_v7 = vpack.c.bf16 %v577_v5, %v575_v4  ;;  %v578_v8 = vld [vmem:[%s569_s2 + $0x18] sm:$0xff]  ;;  %v870_v17 = vld [vmem:[%s7082_s9] sm:$0xff]  ;;  %v871_v37 = vld [vmem:[%s7082_s9 + $0x8] sm:$0xff]  ;;  %vm639_vm1 = vcmp.ge.s32.totalorder %v5819_v41, 1  ;;  %s7094_s2 = smov 126   ;;  %vm936_vm3 = vcmp.lt.s32.totalorder %v5819_v41, 1 }
  0x13   : > { %v587_v9 = vpack.c.bf16 %v578_v8, %v576_v6  ;;  %vm5883_vm4 = vmpackc.low %vm639_vm1, %vm639_vm1  ;;  %vm1050_vm5 = vcmp.lt.s32.totalorder %v5819_v41, 127  ;;  %vm910_vm6 = vcmp.lt.s32.totalorder %v5819_v41, 2  ;;  %vm915_vm7 = vcmp.ge.s32.totalorder %v5819_v41, 2 }
  0x14   : > { %614 = vmatpush.bf16.msra.mxu0 %v586_v7  ;;  %667 = vmatpush.bf16.msra.mxu2 %v586_v7  ;;  %vm5917_vm9 = vmpackc.low %vm915_vm7, %vm915_vm7  ;;  %vm1108_vm11 = vcmp.lt.s32.totalorder %v5819_v41, 126 }
  0x15   : > { %628 = vmatpush.bf16.msra.mxu1 %v587_v9  ;;  %681 = vmatpush.bf16.msra.mxu3 %v587_v9  ;;  %vm6215_vm14 = vmpackc.low %vm1108_vm11, %vm1108_vm11 }
  0x16   : > { %vm6235_vm15 = vmpackc.low %vm1050_vm5, %vm1050_vm5 }
  0x17   : > { %4657 = vmatmul.msk.bf16.vlgmr.msra.gmra.mxu0 %vm603_vm0, %v5243_v10  ;;  %4665 = vmatmul.msk.bf16.vlgmr.msra.gmra.mxu2 %vm603_vm0, %v5244_v11 }
  0x18   : > { %710 = vmatpush.bf16.msrb.mxu0 %v586_v7  ;;  %4658 = vmatmul.msk.bf16.vlgmr.msra.gmra.mxu1 %vm603_vm0, %v5243_v10 }
  0x19   : > { %724 = vmatpush.bf16.msrb.mxu1 %v587_v9  ;;  %4666 = vmatmul.msk.bf16.vlgmr.msra.gmra.mxu3 %vm603_vm0, %v5244_v11 }
  0x1a   : > { %595 = vperm.xlu0 %5309, %v580_v12   ;;  %784 = vperm.xlu1 %5310, %v766_v13  }
  0x1b   : > { %808 = vperm.xlu2 %5311, %v766_v13  }
  0x22   : > { %769 = vperm.xlu0 %5309, %v763_v14   ;;  %774 = vperm.xlu1 %5310, %v764_v15  }
  0x23   : > { %796 = vperm.xlu2 %5311, %v763_v14  }
  0x27   : > { %4673 = vmatmul.msk.bf16.vlgmr.msrb.gmra.mxu0 %vm603_vm0, %v5245_v16 }
  0x28   : > { %4674 = vmatmul.msk.bf16.vlgmr.msrb.gmra.mxu1 %vm603_vm0, %v5245_v16 }
  0x2a   : > { %874 = vperm.xlu1 %5310, %v870_v17   ;;  %5312 = vset.pattern.permute.xlu0 %v5659_v3 }
  0x2b   : > { %800 = vperm.xlu0 %5312, %v764_v15   ;;  %5313 = vset.pattern.permute.xlu2 %v5658_v1 }
  0x2c   : > { %879 = vperm.xlu2 %5313, %v871_v37  }
  0x32   : > { %5314 = vset.pattern.permute.xlu1 %v5659_v3 }
  0x33   : > { %887 = vperm.xlu1 %5314, %v870_v17   ;;  %5357 = vset.pattern.permute.xlu0 %v5658_v1 }
  0x34   : > { %5315 = vset.pattern.permute.xlu2 %v5659_v3 }
  0x35   : > { %891 = vperm.xlu2 %5315, %v871_v37  }
  0x3d   : > { %5356 = vset.pattern.permute.xlu2 %v5658_v1 }
  0x6c   : > { %v805_v19 = vpop.permute.xlu2 %804 }
  0x75   : > { %v809_v24 = vpop.permute.xlu2 %808 }
  0x82   : > { %v780_v18 = vpop.permute.xlu1 %779  ;;  %v591_v31 = vpop.permute.xlu0 %590 }
  0x83   : > { %v791_v20 = vmul.f32 0.0, %v780_v18 }
  0x85   : > { %v815_v21 = vadd.f32 %v805_v19, %v791_v20  ;;  %v797_v19 = vpop.permute.xlu2 %796 }
  0x87   : > { %v823_v26 = vmax.f32 %v815_v21, 0.0 }
  0x8c   : > { %v785_v22 = vpop.permute.xlu1 %784  ;;  %v596_v39 = vpop.permute.xlu0 %595 }
  0x8d   : > { %v793_v23 = vmul.f32 0.0, %v785_v22 }
  0x8f   : > { %v817_v25 = vadd.f32 %v809_v24, %v793_v23 }
  0x91   : > { %v825_v27 = vmax.f32 %v817_v25, 0.0 }
  0x93   : > { %v831_v28 = vpack.c.bf16 %v825_v27, %v823_v26 }
  0x94   : > { %v616_v29 = vpop.f32.mrf.mxu0  ;;  %v770_v0 = vpop.permute.xlu0 %769 }
  0x95   : > { %848 = vmatpush.bf16.msrb.mxu2 %v831_v28  ;;  %862 = vmatpush.bf16.msrb.mxu3 %v831_v28  ;;  %v630_v30 = vpop.f32.mrf.mxu1  ;;  %v617_v38 = vadd.f32 %v616_v29, %v591_v31  ;;  %v775_v21 = vpop.permute.xlu1 %774 }
  0x96   : > { %v631_v43 = vadd.f32 %v630_v30, %v591_v31 }
  0x97   : > { %v635_v44 = vmax.f32 %v617_v38, 0.0  ;;  %v880_v38 = vpop.permute.xlu2 %879 }
  0x98   : > { %v636_v52 = vmax.f32 %v631_v43, 0.0 }
  0x99   : > { %v645_v57 = vsel %vm639_vm1, %v635_v44, 0.0 }
  0x9a   : > { %v669_v32 = vpop.f32.mrf.mxu2 }
  0x9b   : > { %v670_v42 = vadd.f32 %v669_v32, %v591_v31 }
  0x9c   : > { %v683_v33 = vpop.f32.mrf.mxu3  ;;  %v618_v34 = vpop.f32.mrf.mxu0 }
  0x9d   : > { %v632_v36 = vpop.f32.mrf.mxu1  ;;  %v684_v40 = vadd.f32 %v683_v33, %v591_v31  ;;  %v688_v48 = vmax.f32 %v670_v42, 0.0  ;;  %v619_v53 = vadd.f32 %v618_v34, %v596_v39  ;;  %v801_v23 = vpop.permute.xlu0 %800 }
  0x9e   : > { %v633_v63 = vadd.f32 %v632_v36, %v596_v39  ;;  %v5246_v36 = vld [vmem:[%s7087_s14] sm:$0xff]  ;;  %v875_v37 = vpop.permute.xlu1 %874 }
  0x9f   : > { %v689_v45 = vmax.f32 %v684_v40, 0.0  ;;  %v735_v61 = vmax.f32 %v645_v57, %v688_v48  ;;  %v637_v62 = vmax.f32 %v619_v53, 0.0 }
  0xa0   : > { %v638_v11 = vmax.f32 %v633_v63, 0.0  ;;  %v4710_v63 = vld [vmem:[%s7081_s8 + $0x38] sm:$0xff] }
  0xa1   : > { %v736_v58 = vmax.f32 %v636_v52, %v689_v45  ;;  %v647_v10 = vsel %vm639_vm1, %v637_v62, 0.0  ;;  %v4709_v62 = vld [vmem:[%s7081_s8 + $0x30] sm:$0xff]  ;;  %vm2455_vm1 = vcmask 523264  }
  0xa2   : > { %v671_v46 = vpop.f32.mrf.mxu2 }
  0xa3   : > { %v672_v55 = vadd.f32 %v671_v46, %v596_v39  ;;  %v892_v46 = vpop.permute.xlu2 %891 }
  0xa4   : > { %v712_v47 = vpop.f32.mrf.mxu0  ;;  %v685_v49 = vpop.f32.mrf.mxu3 }
  0xa5   : > { %v713_v50 = vadd.f32 %v712_v47, %v591_v31  ;;  %v726_v51 = vpop.f32.mrf.mxu1  ;;  %v686_v59 = vadd.f32 %v685_v49, %v596_v39  ;;  %v690_v4 = vmax.f32 %v672_v55, 0.0 }
  0xa6   : > { %v727_v54 = vadd.f32 %v726_v51, %v591_v31  ;;  %v888_v44 = vpop.permute.xlu1 %887 }
  0xa7   : > { %v731_v56 = vmax.f32 %v713_v50, 0.0  ;;  %v691_v6 = vmax.f32 %v686_v59, 0.0  ;;  %v737_v13 = vmax.f32 %v647_v10, %v690_v4  ;;  %v4708_v4 = vld [vmem:[%s7081_s8 + $0x28] sm:$0xff] }
  0xa8   : > { %v732_v60 = vmax.f32 %v727_v54, 0.0 }
  0xa9   : > { %v5827_v5 = vmax.f32 %v735_v61, %v731_v56  ;;  %v738_v16 = vmax.f32 %v638_v11, %v691_v6 }
  0xaa   : > { %v5825_v2 = vmax.f32 %v736_v58, %v732_v60 }
  0xab   : > { %v787_v14 = vmul.f32 %v770_v0, %v5827_v5 }
  0xac   : > { %v714_v7 = vpop.f32.mrf.mxu0  ;;  %v788_v17 = vmul.f32 %v770_v0, %v5825_v2  ;;  %v4707_v0 = vld [vmem:[%s7081_s8 + $0x20] sm:$0xff] }
  0xad   : > { %v715_v8 = vadd.f32 %v714_v7, %v596_v39  ;;  %v728_v9 = vpop.f32.mrf.mxu1  ;;  %v811_v24 = vadd.f32 %v797_v19, %v787_v14 }
  0xae   : > { %v729_v12 = vadd.f32 %v728_v9, %v596_v39  ;;  %v812_v26 = vadd.f32 %v797_v19, %v788_v17  ;;  %v4883_v17 = vld [vmem:[%s7088_s15 + $0x4c] sm:$0xf] }
  0xaf   : > { %v733_v15 = vmax.f32 %v715_v8, 0.0  ;;  %v819_v30 = vmax.f32 %v811_v24, 0.0  ;;  %v4681_v24 = vld [vmem:[%s7088_s15 + $0x4] sm:$0xf] }
  0xb0   : > { %v734_v18 = vmax.f32 %v729_v12, 0.0  ;;  %v820_v32 = vmax.f32 %v812_v26, 0.0 }
  0xb1   : > { %v5833_v20 = vmax.f32 %v737_v13, %v733_v15 }
  0xb2   : > { %v5836_v22 = vmax.f32 %v738_v16, %v734_v18 }
  0xb3   : > { %v789_v25 = vmul.f32 %v775_v21, %v5833_v20 }
  0xb4   : > { %v790_v27 = vmul.f32 %v775_v21, %v5836_v22  ;;  %v583_v21 = vadd.s32 128, %v5819_v41  ;;  %v4843_v41 = vld [vmem:[%s7088_s15 + $0x34] sm:$0xf] }
  0xb5   : > { %v813_v28 = vadd.f32 %v801_v23, %v789_v25 }
  0xb6   : > { %v814_v29 = vadd.f32 %v801_v23, %v790_v27  ;;  %vm1056_vm8 = vcmp.lt.s32.totalorder %v583_v21, 255  ;;  %vm1114_vm12 = vcmp.lt.s32.totalorder %v583_v21, 254 }
  0xb7   : > { %v821_v31 = vmax.f32 %v813_v28, 0.0  ;;  %vm5923_vm10 = vmpackc.low %vm1056_vm8, %vm1056_vm8  ;;  %vm2589_vm8 = vcmask 7168  }
  0xb8   : > { %v822_v33 = vmax.f32 %v814_v29, 0.0  ;;  %vm5951_vm13 = vmpackc.low %vm1114_vm12, %vm1114_vm12 }
  0xb9   : > { %v829_v34 = vpack.c.bf16 %v821_v31, %v819_v30 }
  0xba   : > { %v830_v35 = vpack.c.bf16 %v822_v33, %v820_v32 }
  0xbb   : > { %849 = vmatpush.bf16.msrb.mxu2 %v829_v34 }
  0xbc   : > { %863 = vmatpush.bf16.msrb.mxu3 %v830_v35 }
  0xbe   : > { %4679 = vmatmul.msk.bf16.vlgmr.msrb.gmra.mxu2 %vm838_vm2, %v5246_v36 }
  0xbf   : > { %4680 = vmatmul.msk.bf16.vlgmr.msrb.gmra.mxu3 %vm838_vm2, %v5246_v36 }
 0x141   : > { %v851_v39 = vpop.f32.mrf.mxu2 }
 0x142   : > { %v865_v40 = vpop.f32.mrf.mxu3  ;;  %v882_v42 = vmul.f32 %v875_v37, %v851_v39 }
 0x143   : > { %v883_v43 = vmul.f32 %v875_v37, %v865_v40 }
 0x144   : > { %v894_v47 = vadd.f32 %v888_v44, %v882_v42 }
 0x145   : > { %v895_v50 = vadd.f32 %v888_v44, %v883_v43 }
 0x146   : > { %v898_v54 = vmax.f32 %v894_v47, 0.0 }
 0x147   : > { %v899_v56 = vmax.f32 %v895_v50, 0.0  ;;  %v4720_v50 = vld [vmem:[%s7082_s9 + $0x18] sm:$0xff] }
 0x149   : > { %v853_v45 = vpop.f32.mrf.mxu2 }
 0x14a   : > { %v884_v48 = vmul.f32 %v880_v38, %v853_v45  ;;  %v867_v49 = vpop.f32.mrf.mxu3 }
 0x14b   : > { %v885_v51 = vmul.f32 %v880_v38, %v867_v49 }
 0x14c   : > { %v896_v52 = vadd.f32 %v892_v46, %v884_v48 }
 0x14d   : > { %v897_v53 = vadd.f32 %v892_v46, %v885_v51  ;;  %v4719_v51 = vld [vmem:[%s7082_s9 + $0x10] sm:$0xff] }
 0x14e   : > { %v900_v55 = vmax.f32 %v896_v52, 0.0  ;;  %v925_v52 = vld [vmem:[%s7088_s15] sm:$0xf] }
 0x14f   : > { %v901_v57 = vmax.f32 %v897_v53, 0.0 }
 0x150   : > { %v5326_v58 = vpack.i.bf16 %v900_v55, %v898_v54  ;;  %v1009_v60 = vpack.c.bf16 %v900_v55, %v898_v54 }
 0x151   : > { %v5321_v59 = vpack.i.bf16 %v901_v57, %v899_v56  ;;  %v1010_v61 = vpack.c.bf16 %v901_v57, %v899_v56 }
 0x152   : > { %5327 = vrot.lane.b32.xlu2 %v5326_v58, %s5660_s19  ;;  %5317 = vrot.lane.b32.xlu0 %v5326_v58, %s7096_s1 }
 0x153   : > { %5322 = vrot.lane.b32.xlu1 %v5321_v59, %s7096_s1 }
 0x15a   : > { %5342 = vrot.lane.b32.xlu2 %v5321_v59, %s7098_s20  ;;  %5332 = vrot.lane.b32.xlu0 %v5321_v59, %s5660_s19 }
 0x15b   : > { %5337 = vrot.lane.b32.xlu1 %v5326_v58, %s7098_s20 }
 0x162   : > { %1185 = vperm.xlu2 %5356, %v4709_v62   ;;  %5347 = vrot.lane.b32.xlu0 %v5326_v58, %s7094_s2 }
 0x163   : > { %5352 = vrot.lane.b32.xlu1 %v5321_v59, %s7094_s2 }
 0x16a   : > { %5358 = vset.pattern.permute.xlu2 %v5659_v3  ;;  %1190 = vperm.xlu0 %5357, %v4710_v63  }
 0x16b   : > { %1210 = vperm.xlu1 %5314, %v4709_v62   ;;  %1214 = vperm.xlu2 %5358, %v4710_v63  }
 0x172   : > { %5361 = vset.pattern.permute.xlu0 %v5659_v3 }
 0x173   : > { %5359 = vset.pattern.permute.xlu1 %v5658_v1  ;;  %5360 = vset.pattern.permute.xlu2 %v5658_v1 }
 0x174   : > { %1175 = vperm.xlu1 %5359, %v4707_v0   ;;  %1180 = vperm.xlu2 %5360, %v4708_v4  }
 0x175   : > { %1202 = vperm.xlu0 %5361, %v4707_v0  }
 0x17c   : > { %5362 = vset.pattern.permute.xlu1 %v5659_v3  ;;  %1281 = vperm.xlu2 %5360, %v4719_v51  }
 0x17d   : > { %1206 = vperm.xlu1 %5362, %v4708_v4   ;;  %1298 = vperm.xlu0 %5361, %v4720_v50  }
 0x184   : > { %5364 = vset.pattern.permute.xlu2 %v5659_v3 }
 0x185   : > { %5363 = vset.pattern.permute.xlu1 %v5658_v1  ;;  %5405 = vset.pattern.permute.xlu0 %v5658_v1 }
 0x186   : > { %1286 = vperm.xlu1 %5363, %v4720_v50   ;;  %1294 = vperm.xlu2 %5364, %v4719_v51  }
 0x1ac   : > { %v5328_v6 = vpop.permute.xlu2 %5327 }
 0x1ad   : > { %v5330_v25 = vunpack.i.h.bf16 %v5328_v6  ;;  %v5329_v26 = vunpack.i.l.bf16 %v5328_v6  ;;  %v4692_v6 = vld [vmem:[%s7088_s15 + $0x8] sm:$0xf] }
 0x1b4   : > { %v5343_v23 = vpop.permute.xlu2 %5342 }
 0x1b5   : > { %v5345_v31 = vunpack.i.h.bf16 %v5343_v23  ;;  %v5344_v32 = vunpack.i.l.bf16 %v5343_v23 }
 0x1c4   : > { %v5318_v7 = vpop.permute.xlu0 %5317 }
 0x1c5   : > { %v5323_v8 = vpop.permute.xlu1 %5322  ;;  %v5320_v9 = vunpack.i.h.bf16 %v5318_v7  ;;  %v5319_v10 = vunpack.i.l.bf16 %v5318_v7  ;;  %v4695_v7 = vld [vmem:[%s7088_s15 + $0xc] sm:$0xf] }
 0x1c6   : > { %v5325_v11 = vunpack.i.h.bf16 %v5323_v8  ;;  %v5324_v12 = vunpack.i.l.bf16 %v5323_v8  ;;  %v4701_v8 = vld [vmem:[%s7088_s15 + $0x10] sm:$0xf] }
 0x1c8   : > { %v938_v13 = vsel %vm936_vm3, %v5320_v9, %v5325_v11  ;;  %v940_v14 = vsel %vm936_vm3, %v5325_v11, %v5320_v9  ;;  %v937_v15 = vsel %vm936_vm3, %v5319_v10, %v5324_v12  ;;  %v939_v16 = vsel %vm936_vm3, %v5324_v12, %v5319_v10 }
 0x1c9   : > { %v4683_v18 = vpack.c.bf16 %v940_v14, %v939_v16  ;;  %v948_v19 = vpack.c.bf16 %v938_v13, %v937_v15  ;;  %v1186_v13 = vpop.permute.xlu2 %1185 }
 0x1cb   : > { %4684 = vmatpush.bf16.msk.msra.mxu0 %vm5883_vm4, %v4683_v18  ;;  %972 = vmatpush.bf16.msra.mxu1 %v948_v19 }
 0x1cc   : > { %v5333_v27 = vpop.permute.xlu0 %5332 }
 0x1cd   : > { %v5338_v28 = vpop.permute.xlu1 %5337  ;;  %v5335_v29 = vunpack.i.h.bf16 %v5333_v27  ;;  %v5334_v30 = vunpack.i.l.bf16 %v5333_v27 }
 0x1ce   : > { %v5340_v33 = vunpack.i.h.bf16 %v5338_v28  ;;  %v5339_v34 = vunpack.i.l.bf16 %v5338_v28  ;;  %4685 = vmatmul.msk.bf16.vlgmr.msra.gmra.mxu0 %vm603_vm0, %v4681_v24  ;;  %4686 = vmatmul.msk.bf16.vlgmr.msra.gmra.mxu1 %vm603_vm0, %v4681_v24 }
 0x1cf   : > { %1021 = vmatpush.bf16.msrb.mxu0 %v1009_v60  ;;  %1034 = vmatpush.bf16.msrb.mxu1 %v1010_v61  ;;  %v912_v35 = vsel %vm910_vm6, %v5330_v25, %v5335_v29  ;;  %v914_v36 = vsel %vm910_vm6, %v5335_v29, %v5330_v25  ;;  %v911_v37 = vsel %vm910_vm6, %v5329_v26, %v5334_v30 }
 0x1d0   : > { %v913_v38 = vsel %vm910_vm6, %v5334_v30, %v5329_v26  ;;  %v1051_v39 = vsel %vm1050_vm5, %v5339_v34, %v5344_v32  ;;  %v1052_v40 = vsel %vm1050_vm5, %v5340_v33, %v5345_v31  ;;  %v1053_v42 = vsel %vm1050_vm5, %v5344_v32, %v5339_v34 }
 0x1d1   : > { %v1054_v43 = vsel %vm1050_vm5, %v5345_v31, %v5340_v33  ;;  %v4688_v46 = vpack.c.bf16 %v914_v36, %v913_v38  ;;  %v927_v47 = vpack.c.bf16 %v912_v35, %v911_v37  ;;  %v1067_v48 = vpack.c.bf16 %v1052_v40, %v1051_v39  ;;  %v1215_v21 = vpop.permute.xlu2 %1214 }
 0x1d2   : > { %v4698_v45 = vpack.c.bf16 %v1054_v43, %v1053_v42 }
 0x1d3   : > { %4689 = vmatpush.bf16.msk.msra.mxu2 %vm5917_vm9, %v4688_v46  ;;  %1001 = vmatpush.bf16.msra.mxu3 %v927_v47 }
 0x1d4   : > { %v5348_v53 = vpop.permute.xlu0 %5347 }
 0x1d5   : > { %v5353_v54 = vpop.permute.xlu1 %5352  ;;  %v5350_v55 = vunpack.i.h.bf16 %v5348_v53  ;;  %v5349_v56 = vunpack.i.l.bf16 %v5348_v53 }
 0x1d6   : > { %v5355_v57 = vunpack.i.h.bf16 %v5353_v54  ;;  %v5354_v58 = vunpack.i.l.bf16 %v5353_v54  ;;  %4690 = vmatmul.msk.bf16.vlgmr.msra.gmra.mxu2 %vm603_vm0, %v925_v52  ;;  %4691 = vmatmul.msk.bf16.vlgmr.msra.gmra.mxu3 %vm603_vm0, %v925_v52 }
 0x1d7   : > { %1079 = vmatpush.bf16.msrb.mxu2 %v1067_v48  ;;  %4699 = vmatpush.bf16.msk.msrb.mxu3 %vm5923_vm10, %v4698_v45 }
 0x1d8   : > { %v1110_v59 = vsel %vm1108_vm11, %v5350_v55, %v5355_v57  ;;  %v1112_v60 = vsel %vm1108_vm11, %v5355_v57, %v5350_v55  ;;  %v1109_v61 = vsel %vm1108_vm11, %v5349_v56, %v5354_v58  ;;  %v1111_v62 = vsel %vm1108_vm11, %v5354_v58, %v5349_v56 }
 0x1d9   : > { %v4704_v0 = vpack.c.bf16 %v1112_v60, %v1111_v62  ;;  %v1125_v4 = vpack.c.bf16 %v1110_v59, %v1109_v61  ;;  %v1181_v34 = vpop.permute.xlu2 %1180 }
 0x1da   : > { %v1195_v46 = vmul.f32 %v1181_v34, %v5833_v20  ;;  %v1196_v51 = vmul.f32 %v1181_v34, %v5836_v22 }
 0x1db   : > { %1137 = vmatpush.bf16.msra.mxu0 %v1125_v4  ;;  %4705 = vmatpush.bf16.msk.msra.mxu1 %vm5951_vm13, %v4704_v0 }
 0x1dc   : > { %v1191_v29 = vpop.permute.xlu0 %1190 }
 0x1dd   : > { %v1211_v14 = vpop.permute.xlu1 %1210  ;;  %v1199_v35 = vmul.f32 0.0, %v1191_v29 }
 0x1de   : > { %4693 = vmatmul.msk.bf16.vlgmr.msrb.gmra.mxu0 %vm603_vm0, %v4692_v6  ;;  %4694 = vmatmul.msk.bf16.vlgmr.msrb.gmra.mxu1 %vm603_vm0, %v4692_v6 }
 0x1df   : > { %v1223_v47 = vadd.f32 %v1215_v21, %v1199_v35 }
 0x1e1   : > { %v1231_v60 = vmax.f32 %v1223_v47, 0.0 }
 0x1e6   : > { %4696 = vmatmul.msk.bf16.vlgmr.msrb.gmra.mxu2 %vm603_vm0, %v4695_v7  ;;  %4700 = vmatmul.msk.bf16.vlgmr.msrb.gmra.mxu3 %vm603_vm0, %v4695_v7  ;;  %v1176_v24 = vpop.permute.xlu1 %1175 }
 0x1e7   : > { %v1193_v48 = vmul.f32 %v1176_v24, %v5827_v5  ;;  %v1194_v52 = vmul.f32 %v1176_v24, %v5825_v2  ;;  %v1203_v53 = vpop.permute.xlu0 %1202 }
 0x1e9   : > { %v1217_v61 = vadd.f32 %v1203_v53, %v1193_v48  ;;  %v1218_v4 = vadd.f32 %v1203_v53, %v1194_v52  ;;  %v1557_v52 = vld [vmem:[%s7084_s11 + $0x18] sm:$0xff]  ;;  %v4820_v53 = vld [vmem:[%s7081_s8 + $0x50] sm:$0xff] }
 0x1ee   : > { %4702 = vmatmul.msk.bf16.vlgmr.msra.gmra.mxu0 %vm603_vm0, %v4701_v8  ;;  %4706 = vmatmul.msk.bf16.vlgmr.msra.gmra.mxu1 %vm603_vm0, %v4701_v8 }
 0x1ef   : > { %v1207_v43 = vpop.permute.xlu1 %1206 }
 0x1f0   : > { %v1219_v55 = vadd.f32 %v1207_v43, %v1195_v46  ;;  %v1220_v57 = vadd.f32 %v1207_v43, %v1196_v51  ;;  %v1555_v51 = vld [vmem:[%s7084_s11 + $0x8] sm:$0xff] }
 0x24b   : > { %v961_v9 = vpop.f32.mrf.mxu0  ;;  %v974_v10 = vpop.f32.mrf.mxu1 }
 0x253   : > { %v963_v11 = vpop.f32.mrf.mxu0  ;;  %v976_v12 = vpop.f32.mrf.mxu1 }
 0x254   : > { %v1228_v11 = vmax.f32 %v1220_v57, 0.0 }
 0x259   : > { %v990_v15 = vpop.f32.mrf.mxu2  ;;  %v1003_v16 = vpop.f32.mrf.mxu3 }
 0x25a   : > { %v991_v28 = vadd.f32 %v990_v15, %v961_v9  ;;  %v1004_v30 = vadd.f32 %v1003_v16, %v974_v10  ;;  %v1227_v9 = vmax.f32 %v1219_v55, 0.0  ;;  %v1225_v15 = vmax.f32 %v1217_v61, 0.0 }
 0x25b   : > { %v1023_v18 = vpop.f32.mrf.mxu0  ;;  %v1036_v19 = vpop.f32.mrf.mxu1 }
 0x25c   : > { %v1040_v31 = vadd.f32 %v1023_v18, %v991_v28  ;;  %v1041_v32 = vadd.f32 %v1036_v19, %v1004_v30  ;;  %v1236_v16 = vpack.c.bf16 %v1227_v9, %v1225_v15  ;;  %v1282_v19 = vpop.permute.xlu2 %1281 }
 0x261   : > { %v992_v23 = vpop.f32.mrf.mxu2  ;;  %v1005_v25 = vpop.f32.mrf.mxu3 }
 0x263   : > { %v1025_v26 = vpop.f32.mrf.mxu0  ;;  %v1038_v27 = vpop.f32.mrf.mxu1 }
 0x264   : > { %v1295_v26 = vpop.permute.xlu2 %1294  ;;  %v1287_v27 = vpop.permute.xlu1 %1286 }
 0x269   : > { %v1081_v33 = vpop.f32.mrf.mxu2  ;;  %v1094_v37 = vpop.f32.mrf.mxu3 }
 0x26a   : > { %v1098_v36 = vadd.f32 %v1081_v33, %v1040_v31  ;;  %v1099_v38 = vadd.f32 %v1094_v37, %v1041_v32  ;;  %v1299_v32 = vpop.permute.xlu0 %1298 }
 0x26b   : > { %v1139_v39 = vpop.f32.mrf.mxu0  ;;  %v1152_v40 = vpop.f32.mrf.mxu1 }
 0x26c   : > { %v5974_v42 = vadd.f32 %v1139_v39, %v1098_v36  ;;  %v5976_v45 = vadd.f32 %v1152_v40, %v1099_v38 }
 0x26e   : > { %v1197_v50 = vmul.f32 %v1186_v13, %v5974_v42  ;;  %v1198_v54 = vmul.f32 %v1186_v13, %v5976_v45  ;;  %v1226_v13 = vmax.f32 %v1218_v4, 0.0 }
 0x270   : > { %v1221_v56 = vadd.f32 %v1211_v14, %v1197_v50  ;;  %v1222_v59 = vadd.f32 %v1211_v14, %v1198_v54  ;;  %v1237_v18 = vpack.c.bf16 %v1228_v11, %v1226_v13  ;;  %v5247_v14 = vld [vmem:[%s7087_s14 + $0x8] sm:$0xff]  ;;  %v1556_v50 = vld [vmem:[%s7084_s11 + $0x10] sm:$0xff]  ;;  %v1554_v54 = vld [vmem:[%s7084_s11] sm:$0xff] }
 0x271   : > { %v1083_v58 = vpop.f32.mrf.mxu2  ;;  %v1096_v62 = vpop.f32.mrf.mxu3 }
 0x272   : > { %v1229_v0 = vmax.f32 %v1221_v56, 0.0  ;;  %v1230_v8 = vmax.f32 %v1222_v59, 0.0 }
 0x273   : > { %v1141_v6 = vpop.f32.mrf.mxu0  ;;  %v1154_v7 = vpop.f32.mrf.mxu1 }
 0x274   : > { %v1238_v10 = vpack.c.bf16 %v1231_v60, %v1229_v0  ;;  %v1239_v12 = vpack.c.bf16 %v1231_v60, %v1230_v8 }
 0x276   : > { %1254 = vmatpush.bf16.msra.mxu2 %v1238_v10  ;;  %1268 = vmatpush.bf16.msra.mxu3 %v1239_v12  ;;  %v4722_v10 = vld [vmem:[%s7088_s15 + $0x18] sm:$0xf] }
 0x27a   : > { %1255 = vmatpush.bf16.msra.mxu2 %v1236_v16  ;;  %1269 = vmatpush.bf16.msra.mxu3 %v1237_v18 }
 0x27d   : > { %4717 = vmatmul.msk.bf16.vlgmr.msra.gmra.mxu2 %vm838_vm2, %v5247_v14  ;;  %4718 = vmatmul.msk.bf16.vlgmr.msra.gmra.mxu3 %vm838_vm2, %v5247_v14 }
 0x300   : > { %v1257_v21 = vpop.f32.mrf.mxu2  ;;  %v1271_v23 = vpop.f32.mrf.mxu3 }
 0x301   : > { %v1289_v24 = vmul.f32 %v1282_v19, %v1257_v21  ;;  %v1290_v25 = vmul.f32 %v1282_v19, %v1271_v23 }
 0x303   : > { %v1301_v29 = vadd.f32 %v1295_v26, %v1289_v24  ;;  %v1302_v33 = vadd.f32 %v1295_v26, %v1290_v25 }
 0x305   : > { %v1305_v37 = vmax.f32 %v1301_v29, 0.0  ;;  %v1306_v39 = vmax.f32 %v1302_v33, 0.0 }
 0x308   : > { %v1259_v28 = vpop.f32.mrf.mxu2  ;;  %v1273_v31 = vpop.f32.mrf.mxu3 }
 0x309   : > { %v1291_v30 = vmul.f32 %v1287_v27, %v1259_v28  ;;  %v1292_v34 = vmul.f32 %v1287_v27, %v1273_v31 }
 0x30b   : > { %v1303_v35 = vadd.f32 %v1299_v32, %v1291_v30  ;;  %v1304_v36 = vadd.f32 %v1299_v32, %v1292_v34  ;;  %v4821_v32 = vld [vmem:[%s7081_s8 + $0x58] sm:$0xff] }
 0x30d   : > { %v1307_v38 = vmax.f32 %v1303_v35, 0.0  ;;  %v1308_v40 = vmax.f32 %v1304_v36, 0.0 }
 0x30f   : > { %v5375_v43 = vpack.i.bf16 %v1307_v38, %v1305_v37  ;;  %v5370_v46 = vpack.i.bf16 %v1308_v40, %v1306_v39  ;;  %v1409_v47 = vpack.c.bf16 %v1307_v38, %v1305_v37  ;;  %v1410_v48 = vpack.c.bf16 %v1308_v40, %v1306_v39  ;;  %v4721_v38 = vld [vmem:[%s7088_s15 + $0x14] sm:$0xf] }
 0x311   : > { %5376 = vrot.lane.b32.xlu0 %v5375_v43, %s5660_s19  ;;  %5366 = vrot.lane.b32.xlu1 %v5375_v43, %s7096_s1 }
 0x312   : > { %5371 = vrot.lane.b32.xlu2 %v5370_v46, %s7096_s1  ;;  %s4652_s1 = sshll.u32 %s7136_s28, 3 }
 0x319   : > { %5391 = vrot.lane.b32.xlu0 %v5370_v46, %s7098_s20  ;;  %5381 = vrot.lane.b32.xlu1 %v5370_v46, %s5660_s19 }
 0x31a   : > { %5386 = vrot.lane.b32.xlu2 %v5375_v43, %s7098_s20 }
 0x321   : > { %1570 = vperm.xlu0 %5405, %v1556_v50   ;;  %5396 = vrot.lane.b32.xlu1 %v5375_v43, %s7094_s2 }
 0x322   : > { %5401 = vrot.lane.b32.xlu2 %v5370_v46, %s7094_s2 }
 0x329   : > { %1565 = vperm.xlu0 %5405, %v1555_v51   ;;  %1575 = vperm.xlu1 %5363, %v1557_v52  }
 0x32a   : > { %1595 = vperm.xlu2 %5364, %v1556_v50  }
 0x331   : > { %1841 = vperm.xlu0 %5405, %v4820_v53   ;;  %5406 = vset.pattern.permute.xlu1 %v5659_v3 }
 0x332   : > { %5407 = vset.pattern.permute.xlu2 %v5658_v1  ;;  %1599 = vperm.xlu1 %5406, %v1557_v52  }
 0x333   : > { %1560 = vperm.xlu2 %5407, %v1554_v54  }
 0x339   : > { %5410 = vset.pattern.permute.xlu0 %v5659_v3 }
 0x33a   : > { %1587 = vperm.xlu1 %5406, %v1554_v54   ;;  %1866 = vperm.xlu0 %5410, %v4821_v32   ;;  %v4733_v54 = vld [vmem:[%s7088_s15 + $0x1c] sm:$0xf] }
 0x33b   : > { %5408 = vset.pattern.permute.xlu2 %v5659_v3 }
 0x33c   : > { %1591 = vperm.xlu2 %5408, %v1555_v51  }
 0x342   : > { %5409 = vset.pattern.permute.xlu1 %v5658_v1  ;;  %5414 = vset.pattern.permute.xlu0 %v5658_v1 }
 0x343   : > { %1846 = vperm.xlu1 %5409, %v4821_v32  }
 0x344   : > { %1862 = vperm.xlu2 %5408, %v4820_v53  }
 0x34c   : > { %5411 = vset.pattern.permute.xlu2 %v5658_v1 }
 0x36c   : > { %v5372_v55 = vpop.permute.xlu2 %5371 }
 0x36d   : > { %v5374_v58 = vunpack.i.h.bf16 %v5372_v55  ;;  %v5373_v59 = vunpack.i.l.bf16 %v5372_v55  ;;  %v4736_v55 = vld [vmem:[%s7088_s15 + $0x20] sm:$0xf] }
 0x374   : > { %v5387_v7 = vpop.permute.xlu2 %5386 }
 0x375   : > { %v5389_v11 = vunpack.i.h.bf16 %v5387_v7  ;;  %v5388_v12 = vunpack.i.l.bf16 %v5387_v7 }
 0x37c   : > { %v5402_v35 = vpop.permute.xlu2 %5401 }
 0x37d   : > { %v5404_v40 = vunpack.i.h.bf16 %v5402_v35 }
 0x383   : > { %v5377_v56 = vpop.permute.xlu0 %5376  ;;  %v5367_v57 = vpop.permute.xlu1 %5366 }
 0x384   : > { %v5369_v60 = vunpack.i.h.bf16 %v5367_v57  ;;  %v5368_v61 = vunpack.i.l.bf16 %v5367_v57  ;;  %v5379_v21 = vunpack.i.h.bf16 %v5377_v56  ;;  %v5378_v23 = vunpack.i.l.bf16 %v5377_v56  ;;  %v4742_v56 = vld [vmem:[%s7088_s15 + $0x24] sm:$0xf] }
 0x386   : > { %v1338_v62 = vsel %vm936_vm3, %v5369_v60, %v5374_v58  ;;  %v1340_v0 = vsel %vm936_vm3, %v5374_v58, %v5369_v60  ;;  %v1337_v4 = vsel %vm936_vm3, %v5368_v61, %v5373_v59  ;;  %v1339_v6 = vsel %vm936_vm3, %v5373_v59, %v5368_v61 }
 0x387   : > { %v4724_v8 = vpack.c.bf16 %v1340_v0, %v1339_v6  ;;  %v1348_v9 = vpack.c.bf16 %v1338_v62, %v1337_v4  ;;  %v1596_v62 = vpop.permute.xlu2 %1595  ;;  %vm2577_vm3 = vcmask 15360  }
 0x389   : > { %4725 = vmatpush.bf16.msk.msrb.mxu0 %vm5883_vm4, %v4724_v8  ;;  %1372 = vmatpush.bf16.msrb.mxu1 %v1348_v9 }
 0x38b   : > { %v5392_v15 = vpop.permute.xlu0 %5391  ;;  %v5382_v13 = vpop.permute.xlu1 %5381 }
 0x38c   : > { %v5394_v16 = vunpack.i.h.bf16 %v5392_v15  ;;  %v5393_v18 = vunpack.i.l.bf16 %v5392_v15  ;;  %v5384_v14 = vunpack.i.h.bf16 %v5382_v13  ;;  %v5383_v19 = vunpack.i.l.bf16 %v5382_v13  ;;  %4726 = vmatmul.msk.bf16.vlgmr.msrb.gmra.mxu0 %vm603_vm0, %v4722_v10  ;;  %4727 = vmatmul.msk.bf16.vlgmr.msrb.gmra.mxu1 %vm603_vm0, %v4722_v10  ;;  %v5256_v10 = vld [vmem:[%s7112_s24 + $0x38] sm:$0xff]  ;;  %v5255_v15 = vld [vmem:[%s7112_s24 + $0x30] sm:$0xff] }
 0x38d   : > { %1421 = vmatpush.bf16.msra.mxu0 %v1409_v47  ;;  %1434 = vmatpush.bf16.msra.mxu1 %v1410_v48  ;;  %v5403_v47 = vunpack.i.l.bf16 %v5402_v35  ;;  %v5263_v13 = vld [vmem:[%s7112_s24 + $0x70] sm:$0xff] }
 0x38e   : > { %v1451_v24 = vsel %vm1050_vm5, %v5389_v11, %v5394_v16  ;;  %v1453_v25 = vsel %vm1050_vm5, %v5394_v16, %v5389_v11  ;;  %v1450_v26 = vsel %vm1050_vm5, %v5388_v12, %v5393_v18  ;;  %v1452_v27 = vsel %vm1050_vm5, %v5393_v18, %v5388_v12  ;;  %v5264_v11 = vld [vmem:[%s7112_s24 + $0x78] sm:$0xff] }
 0x38f   : > { %v4739_v28 = vpack.c.bf16 %v1453_v25, %v1452_v27  ;;  %v1318_v29 = vsel %vm910_vm6, %v5379_v21, %v5384_v14  ;;  %v1320_v30 = vsel %vm910_vm6, %v5384_v14, %v5379_v21  ;;  %v1317_v31 = vsel %vm910_vm6, %v5378_v23, %v5383_v19  ;;  %v1561_v12 = vpop.permute.xlu2 %1560  ;;  %v5262_v25 = vld [vmem:[%s7112_s24 + $0x68] sm:$0xff] }
 0x390   : > { %v1319_v33 = vsel %vm910_vm6, %v5383_v19, %v5378_v23  ;;  %v1328_v34 = vpack.c.bf16 %v1318_v29, %v1317_v31  ;;  %v1460_v37 = vpack.c.bf16 %v1451_v24, %v1450_v26  ;;  %v5254_v24 = vld [vmem:[%s7112_s24 + $0x28] sm:$0xff]  ;;  %v5261_v31 = vld [vmem:[%s7112_s24 + $0x60] sm:$0xff]  ;;  %vm2682_vm6 = vcmask 506880  }
 0x391   : > { %v4729_v36 = vpack.c.bf16 %v1320_v30, %v1319_v33  ;;  %v5253_v30 = vld [vmem:[%s7112_s24 + $0x20] sm:$0xff]  ;;  %vm6474_vm7 = vmpackc.low %vm2682_vm6, %vm2682_vm6  ;;  %vm4515_vm6 = vcmask 1043456  }
 0x392   : > { %1401 = vmatpush.bf16.msrb.mxu3 %v1328_v34 }
 0x393   : > { %4730 = vmatpush.bf16.msk.msrb.mxu2 %vm5917_vm9, %v4729_v36  ;;  %v5397_v39 = vpop.permute.xlu1 %5396  ;;  %v1571_v61 = vpop.permute.xlu0 %1570 }
 0x394   : > { %v5399_v43 = vunpack.i.h.bf16 %v5397_v39  ;;  %v5398_v46 = vunpack.i.l.bf16 %v5397_v39  ;;  %v1583_v34 = vmul.f32 %v1571_v61, %v5976_v45  ;;  %v1578_v45 = vmul.f32 %v1561_v12, %v5827_v5 }
 0x395   : > { %4732 = vmatmul.msk.bf16.vlgmr.msrb.gmra.mxu3 %vm603_vm0, %v4721_v38 }
 0x396   : > { %4740 = vmatpush.bf16.msk.msra.mxu3 %vm5923_vm10, %v4739_v28  ;;  %v1502_v48 = vsel %vm1108_vm11, %v5399_v43, %v5404_v40  ;;  %v1504_v50 = vsel %vm1108_vm11, %v5404_v40, %v5399_v43  ;;  %4731 = vmatmul.msk.bf16.vlgmr.msrb.gmra.mxu2 %vm603_vm0, %v4721_v38  ;;  %v1501_v49 = vsel %vm1108_vm11, %v5398_v46, %v5403_v47 }
 0x397   : > { %1472 = vmatpush.bf16.msra.mxu2 %v1460_v37  ;;  %v1503_v51 = vsel %vm1108_vm11, %v5403_v47, %v5398_v46  ;;  %v1511_v53 = vpack.c.bf16 %v1502_v48, %v1501_v49  ;;  %v1592_v27 = vpop.permute.xlu2 %1591  ;;  %v1582_v38 = vmul.f32 %v1571_v61, %v5974_v42  ;;  %v5252_v47 = vld [vmem:[%s7112_s24 + $0x18] sm:$0xff]  ;;  %v1579_v49 = vmul.f32 %v1561_v12, %v5825_v2 }
 0x398   : > { %v4745_v52 = vpack.c.bf16 %v1504_v50, %v1503_v51  ;;  %v5260_v48 = vld [vmem:[%s7112_s24 + $0x58] sm:$0xff]  ;;  %v1607_v51 = vadd.f32 %v1596_v62, %v1583_v34  ;;  %v4819_v34 = vld [vmem:[%s7081_s8 + $0x48] sm:$0xff]  ;;  %vm2653_vm11 = vcmask 515072  }
 0x399   : > { %1523 = vmatpush.bf16.msrb.mxu0 %v1511_v53  ;;  %1836 = vperm.xlu2 %5411, %v4819_v34   ;;  %vm6500_vm12 = vmpackc.low %vm2653_vm11, %vm2653_vm11 }
 0x39a   : > { %4746 = vmatpush.bf16.msk.msrb.mxu1 %vm5951_vm13, %v4745_v52  ;;  %vm3251_vm13 = vcmask 252928  }
 0x39b   : > { %v1576_v58 = vpop.permute.xlu1 %1575  ;;  %v1566_v9 = vpop.permute.xlu0 %1565 }
 0x39c   : > { %4734 = vmatmul.msk.bf16.vlgmr.msra.gmra.mxu0 %vm603_vm0, %v4733_v54  ;;  %4735 = vmatmul.msk.bf16.vlgmr.msra.gmra.mxu1 %vm603_vm0, %v4733_v54  ;;  %v1581_v52 = vmul.f32 %v1566_v9, %v5836_v22  ;;  %v1606_v54 = vadd.f32 %v1596_v62, %v1582_v38  ;;  %v1615_v62 = vmax.f32 %v1607_v51, 0.0 }
 0x39d   : > { %1790 = vmatpush.bf16.msra.mxu0 %v5256_v10 }
 0x39e   : > { %1804 = vmatpush.bf16.msra.mxu1 %v5264_v11  ;;  %v1614_v10 = vmax.f32 %v1606_v54, 0.0 }
 0x39f   : > { %v1863_v2 = vpop.permute.xlu2 %1862 }
 0x3a1   : > { %1791 = vmatpush.bf16.msra.mxu0 %v5255_v15  ;;  %5413 = vset.pattern.permute.xlu2 %v5659_v3 }
 0x3a2   : > { %1805 = vmatpush.bf16.msra.mxu1 %v5263_v13  ;;  %1858 = vperm.xlu2 %5413, %v4819_v34  }
 0x3a3   : > { %v1842_v28 = vpop.permute.xlu0 %1841 }
 0x3a4   : > { %v6087_v0 = vpop.permute.xlu1 %1599 }
 0x3a5   : > { %4741 = vmatmul.msk.bf16.vlgmr.msra.gmra.mxu3 %vm603_vm0, %v4736_v55  ;;  %1792 = vmatpush.bf16.msra.mxu0 %v5254_v24 }
 0x3a6   : > { %4737 = vmatmul.msk.bf16.vlgmr.msra.gmra.mxu2 %vm603_vm0, %v4736_v55  ;;  %1806 = vmatpush.bf16.msra.mxu1 %v5262_v25  ;;  %v1580_v55 = vmul.f32 %v1566_v9, %v5833_v20  ;;  %v5248_v25 = vld [vmem:[%s7090_s17] sm:$0xff] }
 0x3a9   : > { %1793 = vmatpush.bf16.msra.mxu0 %v5253_v30  ;;  %v5258_v30 = vld [vmem:[%s7112_s24 + $0x48] sm:$0xff] }
 0x3aa   : > { %1807 = vmatpush.bf16.msra.mxu1 %v5261_v31  ;;  %v5249_v31 = vld [vmem:[%s7112_s24] sm:$0xff] }
 0x3ac   : > { %4743 = vmatmul.msk.bf16.vlgmr.msrb.gmra.mxu0 %vm603_vm0, %v4742_v56  ;;  %4747 = vmatmul.msk.bf16.vlgmr.msrb.gmra.mxu1 %vm603_vm0, %v4742_v56  ;;  %v1588_v21 = vpop.permute.xlu1 %1587 }
 0x3ad   : > { %1794 = vmatpush.bf16.msra.mxu0 %v5252_v47  ;;  %v1602_v61 = vadd.f32 %v1588_v21, %v1578_v45 }
 0x3ae   : > { %1808 = vmatpush.bf16.msra.mxu1 %v5260_v48 }
 0x3b5   : > { %v1847_v46 = vpop.permute.xlu1 %1846 }
 0x3f3   : > { %v1837_v51 = vpop.permute.xlu2 %1836 }
 0x409   : > { %v1361_v63 = vpop.f32.mrf.mxu0  ;;  %v1374_v57 = vpop.f32.mrf.mxu1 }
 0x411   : > { %v1363_v59 = vpop.f32.mrf.mxu0  ;;  %v1376_v60 = vpop.f32.mrf.mxu1 }
 0x412   : > { %v1851_v59 = vmul.f32 %v1842_v28, %v5974_v42  ;;  %v1603_v60 = vadd.f32 %v1588_v21, %v1579_v49  ;;  %v5259_v28 = vld [vmem:[%s7112_s24 + $0x50] sm:$0xff] }
 0x413   : > { %1809 = vmatpush.bf16.msra.mxu1 %v5259_v28 }
 0x414   : > { %v1871_v12 = vadd.f32 %v1863_v2, %v1851_v59  ;;  %v1611_v15 = vmax.f32 %v1603_v60, 0.0  ;;  %v1859_v59 = vpop.permute.xlu2 %1858 }
 0x417   : > { %1810 = vmatpush.bf16.msra.mxu1 %v5258_v30 }
 0x418   : > { %v1403_v4 = vpop.f32.mrf.mxu3 }
 0x419   : > { %v1390_v6 = vpop.f32.mrf.mxu2  ;;  %v1423_v7 = vpop.f32.mrf.mxu0  ;;  %v1404_v23 = vadd.f32 %v1403_v4, %v1374_v57 }
 0x41a   : > { %v1436_v8 = vpop.f32.mrf.mxu1  ;;  %v1391_v26 = vadd.f32 %v1390_v6, %v1361_v63  ;;  %v1867_v63 = vpop.permute.xlu0 %1866  ;;  %v1605_v6 = vadd.f32 %v1592_v27, %v1581_v52 }
 0x41b   : > { %v1441_v29 = vadd.f32 %v1436_v8, %v1404_v23 }
 0x41c   : > { %v1440_v32 = vadd.f32 %v1423_v7, %v1391_v26 }
 0x420   : > { %v1405_v16 = vpop.f32.mrf.mxu3 }
 0x421   : > { %v1392_v18 = vpop.f32.mrf.mxu2  ;;  %v1425_v14 = vpop.f32.mrf.mxu0  ;;  %v1610_v16 = vmax.f32 %v1602_v61, 0.0 }
 0x422   : > { %v1438_v19 = vpop.f32.mrf.mxu1  ;;  %v1613_v14 = vmax.f32 %v1605_v6, 0.0 }
 0x424   : > { %v1621_v23 = vpack.c.bf16 %v1613_v14, %v1611_v15  ;;  %v4853_v14 = vld [vmem:[%s7081_s8 + $0x60] sm:$0xff] }
 0x428   : > { %v1487_v33 = vpop.f32.mrf.mxu3 }
 0x429   : > { %v1474_v35 = vpop.f32.mrf.mxu2  ;;  %v1492_v36 = vadd.f32 %v1487_v33, %v1441_v29  ;;  %v1525_v37 = vpop.f32.mrf.mxu0  ;;  %v5250_v29 = vld [vmem:[%s7112_s24 + $0x8] sm:$0xff]  ;;  %v4818_v33 = vld [vmem:[%s7081_s8 + $0x40] sm:$0xff] }
 0x42a   : > { %v1491_v39 = vadd.f32 %v1474_v35, %v1440_v32  ;;  %v1538_v40 = vpop.f32.mrf.mxu1  ;;  %v5257_v32 = vld [vmem:[%s7112_s24 + $0x40] sm:$0xff]  ;;  %1831 = vperm.xlu1 %5409, %v4818_v33  }
 0x42b   : > { %v1543_v43 = vadd.f32 %v1538_v40, %v1492_v36  ;;  %1811 = vmatpush.bf16.msra.mxu1 %v5257_v32  ;;  %v4829_v35 = vld [vmem:[%s7082_s9 + $0x20] sm:$0xff]  ;;  %v4864_v32 = vld [vmem:[%s7082_s9 + $0x30] sm:$0xff] }
 0x42c   : > { %v6122_v50 = vadd.f32 %v1525_v37, %v1491_v39  ;;  %1909 = vperm.xlu0 %5414, %v4829_v35   ;;  %1920 = vperm.xlu2 %5413, %v4829_v35  }
 0x42d   : > { %v1585_v53 = vmul.f32 %v1576_v58, %v1543_v43 }
 0x42e   : > { %v1852_v56 = vmul.f32 %v1847_v46, %v6122_v50  ;;  %v1584_v57 = vmul.f32 %v1576_v58, %v6122_v50  ;;  %v1604_v58 = vadd.f32 %v1592_v27, %v1580_v55  ;;  %v5251_v27 = vld [vmem:[%s7112_s24 + $0x10] sm:$0xff]  ;;  %v4830_v46 = vld [vmem:[%s7082_s9 + $0x28] sm:$0xff] }
 0x42f   : > { %v1609_v5 = vadd.f32 %v6087_v0, %v1585_v53  ;;  %1795 = vmatpush.bf16.msra.mxu0 %v5251_v27 }
 0x430   : > { %v1489_v4 = vpop.f32.mrf.mxu3  ;;  %v1608_v22 = vadd.f32 %v6087_v0, %v1584_v57  ;;  %v1872_v8 = vadd.f32 %v1867_v63, %v1852_v56  ;;  %v1612_v21 = vmax.f32 %v1604_v58, 0.0  ;;  %v1875_v0 = vmax.f32 %v1871_v12, 0.0 }
 0x431   : > { %v1476_v20 = vpop.f32.mrf.mxu2  ;;  %v1527_v7 = vpop.f32.mrf.mxu0  ;;  %v1617_v9 = vmax.f32 %v1609_v5, 0.0  ;;  %v5265_v4 = vld [vmem:[%s7087_s14 + $0x10] sm:$0xff] }
 0x432   : > { %v1540_v11 = vpop.f32.mrf.mxu1  ;;  %v1616_v42 = vmax.f32 %v1608_v22, 0.0  ;;  %v1876_v19 = vmax.f32 %v1872_v8, 0.0  ;;  %v1620_v24 = vpack.c.bf16 %v1612_v21, %v1610_v16  ;;  %5412 = vset.pattern.permute.xlu1 %v5659_v3  ;;  %v4856_v16 = vld [vmem:[%s7081_s8 + $0x78] sm:$0xff] }
 0x433   : > { %v1623_v13 = vpack.c.bf16 %v1617_v9, %v1615_v62  ;;  %1796 = vmatpush.bf16.msra.mxu0 %v5250_v29  ;;  %1854 = vperm.xlu1 %5412, %v4818_v33   ;;  %v4841_v33 = vld [vmem:[%s7088_s15 + $0x30] sm:$0xf] }
 0x434   : > { %v1622_v18 = vpack.c.bf16 %v1616_v42, %v1614_v10  ;;  %v1881_v26 = vpack.c.bf16 %v1876_v19, %v1875_v0  ;;  %v4854_v19 = vld [vmem:[%s7081_s8 + $0x68] sm:$0xff] }
 0x435   : > { %1652 = vmatpush.bf16.msrb.mxu3 %v1623_v13 }
 0x436   : > { %1638 = vmatpush.bf16.msrb.mxu2 %v1622_v18  ;;  %v4855_v18 = vld [vmem:[%s7081_s8 + $0x70] sm:$0xff] }
 0x437   : > { %1797 = vmatpush.bf16.msra.mxu0 %v5249_v31  ;;  %v4848_v31 = vld [vmem:[%s7088_s15 + $0x38] sm:$0xf] }
 0x439   : > { %1653 = vmatpush.bf16.msrb.mxu3 %v1621_v23 }
 0x43a   : > { %1639 = vmatpush.bf16.msrb.mxu2 %v1620_v24 }
 0x43b   : > { %5415 = vset.pattern.permute.xlu1 %v5658_v1 }
 0x43c   : > { %4753 = vmatmul.msk.bf16.vlgmr.msrb.gmra.mxu3 %vm838_vm2, %v5248_v25  ;;  %1914 = vperm.xlu1 %5415, %v4830_v46  }
 0x43d   : > { %4752 = vmatmul.msk.bf16.vlgmr.msrb.gmra.mxu2 %vm838_vm2, %v5248_v25  ;;  %v4832_v25 = vld [vmem:[%s7088_s15 + $0x2c] sm:$0xf] }
 0x43e   : > { %1896 = vmatpush.bf16.msra.mxu2 %v1881_v26 }
 0x444   : > { %5416 = vset.pattern.permute.xlu1 %v5659_v3 }
 0x445   : > { %1924 = vperm.xlu1 %5416, %v4830_v46  }
 0x44d   : > { %5437 = vset.pattern.permute.xlu1 %v5658_v1 }
 0x486   : > { %v1921_v7 = vpop.permute.xlu2 %1920 }
 0x49c   : > { %v1832_v47 = vpop.permute.xlu1 %1831 }
 0x49e   : > { %v1910_v6 = vpop.permute.xlu0 %1909 }
 0x4a5   : > { %v1855_v55 = vpop.permute.xlu1 %1854 }
 0x4ae   : > { %v1915_v22 = vpop.permute.xlu1 %1914 }
 0x4b7   : > { %v1925_v9 = vpop.permute.xlu1 %1924 }
 0x4bf   : > { %v1655_v36 = vpop.f32.mrf.mxu3 }
 0x4c0   : > { %v1641_v37 = vpop.f32.mrf.mxu2 }
 0x4c7   : > { %v1657_v38 = vpop.f32.mrf.mxu3 }
 0x4c8   : > { %v1643_v39 = vpop.f32.mrf.mxu2  ;;  %v1693_v40 = vpack.c.bf16 %v1657_v38, %v1655_v36 }
 0x4c9   : > { %v1692_v43 = vpack.c.bf16 %v1643_v39, %v1641_v37 }
 0x4ca   : > { %1812 = vmatmul.bf16.vlgmr.msra.gmra.mxu1 %v1693_v40 }
 0x4cb   : > { %1798 = vmatmul.bf16.vlgmr.msra.gmra.mxu0 %v1692_v43 }
 0x547   : > { %v1813_v48 = vpop.f32.mrf.mxu1 }
 0x548   : > { %v1799_v45 = vpop.f32.mrf.mxu0 }
 0x549   : > { %v6171_v49 = vadd.f32 %v1813_v48, %v1799_v45 }
 0x54b   : > { %1818 = vst [vmem:[#allocation2] sm:$0xff] %v6171_v49  ;;  %v1849_v52 = vmul.f32 %v1832_v47, %v6171_v49  ;;  %v4831_v47 = vld [vmem:[%s7088_s15 + $0x28] sm:$0xf] }
 0x54d   : > { %v1869_v57 = vadd.f32 %v1855_v55, %v1849_v52  ;;  %v4865_v55 = vld [vmem:[%s7082_s9 + $0x38] sm:$0xff] }
 0x54f   : > { %v1815_v53 = vpop.f32.mrf.mxu1  ;;  %v1873_v2 = vmax.f32 %v1869_v57, 0.0 }
 0x550   : > { %v1801_v54 = vpop.f32.mrf.mxu0 }
 0x551   : > { %v6176_v56 = vadd.f32 %v1815_v53, %v1801_v54 }
 0x553   : > { %1819 = vst [vmem:[#allocation2 + $0x10] sm:$0xff] %v6176_v56  ;;  %v1850_v63 = vmul.f32 %v1837_v51, %v6176_v56 }
 0x555   : > { %v1870_v60 = vadd.f32 %v1859_v59, %v1850_v63 }
 0x557   : > { %v1874_v5 = vmax.f32 %v1870_v60, 0.0 }
 0x559   : > { %v1880_v61 = vpack.c.bf16 %v1874_v5, %v1873_v2 }
 0x55b   : > { %1897 = vmatpush.bf16.msra.mxu2 %v1880_v61 }
 0x55e   : > { %4828 = vmatmul.msk.bf16.vlgmr.msra.gmra.mxu2 %vm838_vm2, %v5265_v4 }
 0x5e1   : > { %v1899_v62 = vpop.f32.mrf.mxu2 }
 0x5e2   : > { %v1917_v20 = vmul.f32 %v1910_v6, %v1899_v62 }
 0x5e4   : > { %v1927_v10 = vadd.f32 %v1921_v7, %v1917_v20 }
 0x5e6   : > { %v1929_v42 = vmax.f32 %v1927_v10, 0.0 }
 0x5e9   : > { %v1901_v8 = vpop.f32.mrf.mxu2 }
 0x5ea   : > { %v1918_v58 = vmul.f32 %v1915_v22, %v1901_v8 }
 0x5ec   : > { %v1928_v11 = vadd.f32 %v1925_v9, %v1918_v58 }
 0x5ee   : > { %v1930_v12 = vmax.f32 %v1928_v11, 0.0 }
 0x5f0   : > { %v5427_v15 = vpack.i.bf16 %v1930_v12, %v1929_v42  ;;  %v1983_v13 = vpack.c.bf16 %v1930_v12, %v1929_v42 }
 0x5f2   : > { %5428 = vrot.lane.b32.xlu1 %v5427_v15, %s7098_s20  ;;  %5423 = vrot.lane.b32.xlu0 %v5427_v15, %s5660_s19 }
 0x5f3   : > { %5418 = vrot.lane.b32.xlu2 %v5427_v15, %s7113_s22 }
 0x5fa   : > { %2084 = vperm.xlu1 %5437, %v4856_v16   ;;  %2079 = vperm.xlu0 %5414, %v4855_v18  }
 0x5fb   : > { %5433 = vrot.lane.b32.xlu2 %v5427_v15, %s7114_s30 }
 0x602   : > { %2069 = vperm.xlu1 %5437, %v4853_v14   ;;  %5438 = vset.pattern.permute.xlu0 %v5659_v3 }
 0x603   : > { %2100 = vperm.xlu2 %5413, %v4855_v18   ;;  %2104 = vperm.xlu0 %5438, %v4856_v16  }
 0x60a   : > { %5440 = vset.pattern.permute.xlu1 %v5659_v3 }
 0x60b   : > { %5439 = vset.pattern.permute.xlu2 %v5658_v1  ;;  %2092 = vperm.xlu1 %5440, %v4853_v14  }
 0x60c   : > { %2074 = vperm.xlu2 %5439, %v4854_v19   ;;  %5442 = vset.pattern.permute.xlu0 %v5658_v1 }
 0x60d   : > { %2147 = vperm.xlu0 %5442, %v4864_v32  }
 0x613   : > { %5443 = vset.pattern.permute.xlu1 %v5658_v1 }
 0x614   : > { %5441 = vset.pattern.permute.xlu2 %v5659_v3  ;;  %2152 = vperm.xlu1 %5443, %v4865_v55  }
 0x615   : > { %2096 = vperm.xlu2 %5441, %v4854_v19  }
 0x61c   : > { %5444 = vset.pattern.permute.xlu1 %v5659_v3 }
 0x61d   : > { %2158 = vperm.xlu2 %5441, %v4864_v32   ;;  %2162 = vperm.xlu1 %5444, %v4865_v55   ;;  %v4867_v55 = vld [vmem:[%s7088_s15 + $0x40] sm:$0xf] }
 0x625   : > { %5465 = vset.pattern.permute.xlu1 %v5658_v1 }
 0x64d   : > { %v5419_v21 = vpop.permute.xlu2 %5418 }
 0x64e   : > { %v5421_v0 = vunpack.i.h.bf16 %v5419_v21  ;;  %v5420_v23 = vunpack.i.l.bf16 %v5419_v21 }
 0x650   : > { %v4834_v24 = vpack.c.bf16 %v5421_v0, %v5420_v23 }
 0x652   : > { %4835 = vmatpush.bf16.msk.msra.mxu3 %vm5883_vm4, %v4834_v24  ;;  %v5266_v24 = vld [vmem:[%s7087_s14 + $0x18] sm:$0xff] }
 0x655   : > { %v5434_v26 = vpop.permute.xlu2 %5433  ;;  %4836 = vmatmul.msk.bf16.vlgmr.msra.gmra.mxu3 %vm603_vm0, %v4832_v25 }
 0x656   : > { %1994 = vmatpush.bf16.msrb.mxu3 %v1983_v13  ;;  %v5436_v27 = vunpack.i.h.bf16 %v5434_v26  ;;  %v5435_v28 = vunpack.i.l.bf16 %v5434_v26 }
 0x658   : > { %v4850_v30 = vpack.c.bf16 %v5436_v27, %v5435_v28 }
 0x65a   : > { %4851 = vmatpush.bf16.msk.msrb.mxu1 %vm6215_vm14, %v4850_v30 }
 0x65d   : > { %4852 = vmatmul.msk.bf16.vlgmr.msrb.gmra.mxu1 %vm603_vm0, %v4848_v31  ;;  %v2101_v54 = vpop.permute.xlu2 %2100 }
 0x664   : > { %v5429_v34 = vpop.permute.xlu1 %5428  ;;  %v5424_v35 = vpop.permute.xlu0 %5423 }
 0x665   : > { %v5431_v36 = vunpack.i.h.bf16 %v5429_v34  ;;  %v5430_v37 = vunpack.i.l.bf16 %v5429_v34  ;;  %v5426_v38 = vunpack.i.h.bf16 %v5424_v35  ;;  %v5425_v39 = vunpack.i.l.bf16 %v5424_v35  ;;  %4842 = vmatmul.msk.bf16.vlgmr.msrb.gmra.mxu3 %vm603_vm0, %v4841_v33 }
 0x666   : > { %v2075_v5 = vpop.permute.xlu2 %2074 }
 0x667   : > { %v4845_v43 = vpack.c.bf16 %v5431_v36, %v5430_v37  ;;  %v4838_v46 = vpack.c.bf16 %v5426_v38, %v5425_v39  ;;  %v2088_v15 = vmul.f32 %v2075_v5, %v6176_v56  ;;  %v4934_v5 = vld [vmem:[%s7081_s8 + $0x98] sm:$0xff] }
 0x669   : > { %4839 = vmatpush.bf16.msk.msrb.mxu2 %vm5917_vm9, %v4838_v46  ;;  %4846 = vmatpush.bf16.msk.msrb.mxu0 %vm6235_vm15, %v4845_v43  ;;  %v4891_v43 = vld [vmem:[%s7084_s11 + $0x38] sm:$0xff]  ;;  %v4890_v46 = vld [vmem:[%s7084_s11 + $0x30] sm:$0xff] }
 0x66c   : > { %4840 = vmatmul.msk.bf16.vlgmr.msrb.gmra.mxu2 %vm603_vm0, %v4831_v47  ;;  %4847 = vmatmul.msk.bf16.vlgmr.msrb.gmra.mxu0 %vm603_vm0, %v4843_v41  ;;  %v2085_v53 = vpop.permute.xlu1 %2084  ;;  %v2080_v59 = vpop.permute.xlu0 %2079  ;;  %v4888_v47 = vld [vmem:[%s7084_s11 + $0x20] sm:$0xff]  ;;  %v4889_v41 = vld [vmem:[%s7084_s11 + $0x28] sm:$0xff] }
 0x66d   : > { %v2090_v7 = vmul.f32 %v2085_v53, %v6122_v50 }
 0x66f   : > { %v2097_v12 = vpop.permute.xlu2 %2096 }
 0x670   : > { %v2108_v18 = vadd.f32 %v2097_v12, %v2088_v15 }
 0x672   : > { %v2112_v0 = vmax.f32 %v2108_v18, 0.0 }
 0x674   : > { %v2070_v60 = vpop.permute.xlu1 %2069 }
 0x675   : > { %v2105_v20 = vpop.permute.xlu0 %2104  ;;  %v2087_v58 = vmul.f32 %v2070_v60, %v6171_v49 }
 0x676   : > { %v2110_v11 = vadd.f32 %v2105_v20, %v2090_v7  ;;  %v4866_v7 = vld [vmem:[%s7088_s15 + $0x3c] sm:$0xf] }
 0x677   : > { %v2159_v30 = vpop.permute.xlu2 %2158 }
 0x678   : > { %v2114_v50 = vmax.f32 %v2110_v11, 0.0 }
 0x67d   : > { %v2093_v9 = vpop.permute.xlu1 %2092 }
 0x67e   : > { %v2107_v13 = vadd.f32 %v2093_v9, %v2087_v58  ;;  %v4878_v9 = vld [vmem:[%s7088_s15 + $0x48] sm:$0xf] }
 0x67f   : > { %v2148_v27 = vpop.permute.xlu0 %2147 }
 0x680   : > { %v2111_v19 = vmax.f32 %v2107_v13, 0.0 }
 0x682   : > { %v2118_v23 = vpack.c.bf16 %v2112_v0, %v2111_v19  ;;  %v5274_v19 = vld [vmem:[%s7119_s26 + $0x30] sm:$0xff] }
 0x686   : > { %v2153_v25 = vpop.permute.xlu1 %2152 }
 0x68f   : > { %v2163_v32 = vpop.permute.xlu1 %2162 }
 0x6d8   : > { %v1961_v48 = vpop.f32.mrf.mxu3 }
 0x6da   : > { %v2052_v45 = vpop.f32.mrf.mxu1 }
 0x6e0   : > { %v1963_v51 = vpop.f32.mrf.mxu3 }
 0x6e2   : > { %v2054_v52 = vpop.f32.mrf.mxu1 }
 0x6e8   : > { %v1996_v63 = vpop.f32.mrf.mxu3 }
 0x6e9   : > { %v2024_v57 = vpop.f32.mrf.mxu0 }
 0x6ef   : > { %v1977_v2 = vpop.f32.mrf.mxu2 }
 0x6f0   : > { %v1978_v61 = vadd.f32 %v1977_v2, %v1961_v48  ;;  %v1998_v4 = vpop.f32.mrf.mxu3  ;;  %v4933_v48 = vld [vmem:[%s7081_s8 + $0x90] sm:$0xff] }
 0x6f1   : > { %v2026_v22 = vpop.f32.mrf.mxu0 }
 0x6f2   : > { %v2000_v62 = vadd.f32 %v1996_v63, %v1978_v61 }
 0x6f4   : > { %v2028_v6 = vadd.f32 %v2024_v57, %v2000_v62 }
 0x6f6   : > { %v6256_v8 = vadd.f32 %v2052_v45, %v2028_v6  ;;  %v4876_v45 = vld [vmem:[%s7088_s15 + $0x44] sm:$0xf] }
 0x6f7   : > { %v1979_v10 = vpop.f32.mrf.mxu2 }
 0x6f8   : > { %2057 = vst [vmem:[#allocation2 + $0x20] sm:$0xff] %v6256_v8  ;;  %v2089_v42 = vmul.f32 %v2080_v59, %v6256_v8 }
 0x6fa   : > { %v2109_v16 = vadd.f32 %v2101_v54, %v2089_v42 }
 0x6fc   : > { %v2113_v14 = vmax.f32 %v2109_v16, 0.0 }
 0x6fe   : > { %v2119_v21 = vpack.c.bf16 %v2114_v50, %v2113_v14  ;;  %v6328_v50 = vld [vmem:[%s7081_s8 + $0x88] sm:$0xff]  ;;  %v5275_v14 = vld [vmem:[%s7119_s26 + $0x38] sm:$0xff] }
 0x700   : > { %2134 = vmatpush.bf16.msra.mxu2 %v2119_v21 }
 0x704   : > { %2135 = vmatpush.bf16.msra.mxu2 %v2118_v23 }
 0x707   : > { %4863 = vmatmul.msk.bf16.vlgmr.msra.gmra.mxu2 %vm838_vm2, %v5266_v24 }
 0x78a   : > { %v2137_v26 = vpop.f32.mrf.mxu2 }
 0x78b   : > { %v2155_v28 = vmul.f32 %v2148_v27, %v2137_v26  ;;  %v5273_v26 = vld [vmem:[%s7119_s26 + $0x28] sm:$0xff] }
 0x78d   : > { %v2165_v33 = vadd.f32 %v2159_v30, %v2155_v28  ;;  %v5272_v30 = vld [vmem:[%s7119_s26 + $0x20] sm:$0xff] }
 0x78f   : > { %v2167_v36 = vmax.f32 %v2165_v33, 0.0 }
 0x792   : > { %v2139_v31 = vpop.f32.mrf.mxu2 }
 0x793   : > { %v2156_v34 = vmul.f32 %v2153_v25, %v2139_v31  ;;  %v6340_v25 = vld [vmem:[%s7082_s9 + $0x40] sm:$0xff] }
 0x795   : > { %v2166_v35 = vadd.f32 %v2163_v32, %v2156_v34 }
 0x797   : > { %v2168_v37 = vmax.f32 %v2166_v35, 0.0 }
 0x799   : > { %v5455_v38 = vpack.i.bf16 %v2168_v37, %v2167_v36  ;;  %v2221_v39 = vpack.c.bf16 %v2168_v37, %v2167_v36 }
 0x79b   : > { %5456 = vrot.lane.b32.xlu1 %v5455_v38, %s5660_s19  ;;  %5451 = vrot.lane.b32.xlu0 %v5455_v38, %s7098_s20 }
 0x79c   : > { %5446 = vrot.lane.b32.xlu2 %v5455_v38, %s7113_s22  ;;  %2232 = vmatpush.bf16.msra.mxu1 %v2221_v39  ;;  %v5271_v39 = vld [vmem:[%s7119_s26 + $0x18] sm:$0xff] }
 0x79f   : > { %4877 = vmatmul.msk.bf16.vlgmr.msra.gmra.mxu1 %vm603_vm0, %v4876_v45 }
 0x7a0   : > { %2441 = vmatpush.bf16.msrb.mxu1 %v5275_v14 }
 0x7a3   : > { %2318 = vperm.xlu1 %5465, %v4891_v43   ;;  %2313 = vperm.xlu0 %5442, %v4890_v46  }
 0x7a4   : > { %5461 = vrot.lane.b32.xlu2 %v5455_v38, %s7114_s30  ;;  %2442 = vmatpush.bf16.msrb.mxu1 %v5274_v19 }
 0x7a8   : > { %2443 = vmatpush.bf16.msrb.mxu1 %v5273_v26 }
 0x7ab   : > { %2303 = vperm.xlu1 %5465, %v4888_v47   ;;  %5466 = vset.pattern.permute.xlu0 %v5659_v3 }
 0x7ac   : > { %2334 = vperm.xlu2 %5441, %v4890_v46   ;;  %2338 = vperm.xlu0 %5466, %v4891_v43   ;;  %v4943_v46 = vld [vmem:[%s7082_s9 + $0x48] sm:$0xff] }
 0x7ad   : > { %2444 = vmatpush.bf16.msrb.mxu1 %v5272_v30  ;;  %v5276_v30 = vld [vmem:[%s7087_s14 + $0x20] sm:$0xff] }
 0x7b1   : > { %2445 = vmatpush.bf16.msrb.mxu1 %v5271_v39 }
 0x7b3   : > { %5468 = vset.pattern.permute.xlu1 %v5659_v3 }
 0x7b4   : > { %5467 = vset.pattern.permute.xlu2 %v5658_v1  ;;  %2326 = vperm.xlu1 %5468, %v4888_v47  }
 0x7b5   : > { %5470 = vset.pattern.permute.xlu0 %v5658_v1  ;;  %2308 = vperm.xlu2 %5467, %v4889_v41  }
 0x7b6   : > { %2479 = vperm.xlu0 %5470, %v4933_v48  }
 0x7bc   : > { %5471 = vset.pattern.permute.xlu1 %v5658_v1 }
 0x7bd   : > { %5469 = vset.pattern.permute.xlu2 %v5659_v3  ;;  %2484 = vperm.xlu1 %5471, %v4934_v5  }
 0x7be   : > { %2330 = vperm.xlu2 %5469, %v4889_v41   ;;  %2474 = vperm.xlu0 %5470, %v6328_v50  }
 0x7c5   : > { %5472 = vset.pattern.permute.xlu1 %v5659_v3 }
 0x7c6   : > { %2500 = vperm.xlu2 %5469, %v4933_v48   ;;  %2504 = vperm.xlu1 %5472, %v4934_v5  }
 0x7c7   : > { %2547 = vperm.xlu0 %5470, %v6340_v25  }
 0x7ce   : > { %5473 = vset.pattern.permute.xlu2 %v5658_v1 }
 0x7cf   : > { %5476 = vset.pattern.permute.xlu0 %v5659_v3 }
 0x7d0   : > { %2562 = vperm.xlu0 %5476, %v4943_v46  }
 0x7d8   : > { %5497 = vset.pattern.permute.xlu0 %v5658_v1 }
 0x7f6   : > { %v5447_v51 = vpop.permute.xlu2 %5446 }
 0x7f7   : > { %v5449_v52 = vunpack.i.h.bf16 %v5447_v51  ;;  %v5448_v53 = vunpack.i.l.bf16 %v5447_v51 }
 0x7f9   : > { %v4869_v54 = vpack.c.bf16 %v5449_v52, %v5448_v53 }
 0x7fb   : > { %4870 = vmatpush.bf16.msk.msra.mxu3 %vm5883_vm4, %v4869_v54  ;;  %vm6454_vm4 = vmneg %vm2577_vm3  ;;  %vm4070_vm3 = vcmask 64512  }
 0x7fc   : > { %vm4954_vm5 = vmpackc.low %vm6454_vm4, %vm6454_vm4  ;;  %vm4238_vm4 = vcmask 56320  }
 0x7fe   : > { %v5462_v63 = vpop.permute.xlu2 %5461  ;;  %4871 = vmatmul.msk.bf16.vlgmr.msra.gmra.mxu3 %vm603_vm0, %v4867_v55 }
 0x7ff   : > { %v5464_v57 = vunpack.i.h.bf16 %v5462_v63  ;;  %v5463_v59 = vunpack.i.l.bf16 %v5462_v63 }
 0x801   : > { %v4885_v60 = vpack.c.bf16 %v5464_v57, %v5463_v59 }
 0x803   : > { %4886 = vmatpush.bf16.msk.msrb.mxu3 %vm6215_vm14, %v4885_v60  ;;  %vm6694_vm14 = vmpackc.low %vm3251_vm13, %vm3251_vm13 }
 0x806   : > { %v2335_v44 = vpop.permute.xlu2 %2334 }
 0x80d   : > { %v5457_v2 = vpop.permute.xlu1 %5456  ;;  %v5452_v61 = vpop.permute.xlu0 %5451 }
 0x80e   : > { %v5459_v4 = vunpack.i.h.bf16 %v5457_v2  ;;  %v5458_v22 = vunpack.i.l.bf16 %v5457_v2  ;;  %v5454_v62 = vunpack.i.h.bf16 %v5452_v61  ;;  %v5453_v6 = vunpack.i.l.bf16 %v5452_v61  ;;  %4887 = vmatmul.msk.bf16.vlgmr.msrb.gmra.mxu3 %vm603_vm0, %v4883_v17 }
 0x80f   : > { %v2309_v15 = vpop.permute.xlu2 %2308 }
 0x810   : > { %v4873_v29 = vpack.c.bf16 %v5459_v4, %v5458_v22  ;;  %v4880_v20 = vpack.c.bf16 %v5454_v62, %v5453_v6  ;;  %v2322_v52 = vmul.f32 %v2309_v15, %v6176_v56  ;;  %v6368_v4 = vld [vmem:[%s7081_s8 + $0xb0] sm:$0xff]  ;;  %v5267_v62 = vld [vmem:[%s7090_s17 + $0x8] sm:$0xff] }
 0x811   : > { %2727 = vperm.xlu0 %5497, %v6368_v4   ;;  %v5270_v6 = vld [vmem:[%s7119_s26 + $0x10] sm:$0xff] }
 0x812   : > { %4874 = vmatpush.bf16.msk.msra.mxu0 %vm5917_vm9, %v4873_v29  ;;  %4881 = vmatpush.bf16.msk.msrb.mxu2 %vm6235_vm15, %v4880_v20  ;;  %v6382_v29 = vld [vmem:[%s7081_s8 + $0xa8] sm:$0xff]  ;;  %vm4946_vm9 = vmneg %vm2589_vm8  ;;  %vm3748_vm15 = vcmask 121856  }
 0x813   : > { %2446 = vmatpush.bf16.msrb.mxu1 %v5270_v6  ;;  %v5269_v20 = vld [vmem:[%s7119_s26 + $0x8] sm:$0xff]  ;;  %vm6484_vm10 = vmpackc.low %vm4946_vm9, %vm4946_vm9 }
 0x815   : > { %4875 = vmatmul.msk.bf16.vlgmr.msra.gmra.mxu0 %vm603_vm0, %v4866_v7  ;;  %4882 = vmatmul.msk.bf16.vlgmr.msrb.gmra.mxu2 %vm603_vm0, %v4878_v9  ;;  %v2319_v58 = vpop.permute.xlu1 %2318  ;;  %v2314_v40 = vpop.permute.xlu0 %2313  ;;  %v5268_v7 = vld [vmem:[%s7119_s26] sm:$0xff]  ;;  %v6394_v9 = vld [vmem:[%s7082_s9 + $0x50] sm:$0xff] }
 0x816   : > { %v2323_v32 = vmul.f32 %v2314_v40, %v6256_v8 }
 0x817   : > { %2447 = vmatpush.bf16.msrb.mxu1 %v5269_v20  ;;  %v6496_v20 = vld [vmem:[%s7081_s8 + $0xd0] sm:$0xff] }
 0x818   : > { %v2331_v21 = vpop.permute.xlu2 %2330  ;;  %v2343_v47 = vadd.f32 %v2335_v44, %v2323_v32 }
 0x819   : > { %v2342_v63 = vadd.f32 %v2331_v21, %v2322_v52  ;;  %2722 = vperm.xlu0 %5497, %v6382_v29   ;;  %v4999_v52 = vld [vmem:[%s7088_s15 + $0x70] sm:$0xf] }
 0x81b   : > { %v2346_v56 = vmax.f32 %v2342_v63, 0.0  ;;  %2448 = vmatpush.bf16.msrb.mxu1 %v5268_v7  ;;  %v4958_v63 = vld [vmem:[%s7088_s15 + $0x58] sm:$0xf] }
 0x81c   : > { %v2234_v10 = vpop.f32.mrf.mxu1 }
 0x81d   : > { %v2304_v42 = vpop.permute.xlu1 %2303 }
 0x81e   : > { %v2339_v18 = vpop.permute.xlu0 %2338  ;;  %v2321_v41 = vmul.f32 %v2304_v42, %v6171_v49  ;;  %v2347_v49 = vmax.f32 %v2343_v47, 0.0  ;;  %v6421_v42 = vld [vmem:[%s7084_s11 + $0x48] sm:$0xff] }
 0x820   : > { %v2501_v37 = vpop.permute.xlu2 %2500 }
 0x821   : > { %2795 = vperm.xlu0 %5497, %v6394_v9  }
 0x824   : > { %v2236_v11 = vpop.f32.mrf.mxu1 }
 0x825   : > { %v6413_v11 = vld [vmem:[%s7084_s11 + $0x50] sm:$0xff] }
 0x826   : > { %v2327_v16 = vpop.permute.xlu1 %2326 }
 0x827   : > { %v2341_v53 = vadd.f32 %v2327_v16, %v2321_v41 }
 0x828   : > { %v2480_v28 = vpop.permute.xlu0 %2479 }
 0x829   : > { %v2489_v34 = vmul.f32 %v2480_v28, %v6256_v8  ;;  %v2345_v17 = vmax.f32 %v2341_v53, 0.0  ;;  %5502 = vset.pattern.permute.xlu0 %v5659_v3 }
 0x82b   : > { %v2509_v8 = vadd.f32 %v2501_v37, %v2489_v34  ;;  %v2352_v22 = vpack.c.bf16 %v2346_v56, %v2345_v17 }
 0x82d   : > { %v2513_v59 = vmax.f32 %v2509_v8, 0.0 }
 0x82f   : > { %v2485_v24 = vpop.permute.xlu1 %2484 }
 0x830   : > { %v2475_v19 = vpop.permute.xlu0 %2474 }
 0x838   : > { %v2505_v48 = vpop.permute.xlu1 %2504 }
 0x881   : > { %v2199_v12 = vpop.f32.mrf.mxu3 }
 0x889   : > { %v2201_v13 = vpop.f32.mrf.mxu3 }
 0x891   : > { %v2286_v0 = vpop.f32.mrf.mxu3 }
 0x892   : > { %v2215_v23 = vpop.f32.mrf.mxu0 }
 0x893   : > { %v2216_v27 = vadd.f32 %v2215_v23, %v2199_v12 }
 0x895   : > { %v2238_v31 = vadd.f32 %v2234_v10, %v2216_v27  ;;  %v4931_v10 = vld [vmem:[%s7081_s8 + $0x80] sm:$0xff] }
 0x896   : > { %2492 = vperm.xlu1 %5472, %v4931_v10   ;;  %2469 = vperm.xlu2 %5473, %v4931_v10  }
 0x898   : > { %v2260_v33 = vpop.f32.mrf.mxu2 }
 0x899   : > { %v2264_v35 = vadd.f32 %v2260_v33, %v2238_v31  ;;  %v2288_v36 = vpop.f32.mrf.mxu3  ;;  %v2548_v31 = vpop.permute.xlu0 %2547 }
 0x89a   : > { %v2217_v38 = vpop.f32.mrf.mxu0 }
 0x89b   : > { %v6354_v43 = vadd.f32 %v2286_v0, %v2264_v35 }
 0x89d   : > { %2291 = vst [vmem:[#allocation2 + $0x30] sm:$0xff] %v6354_v43  ;;  %v2490_v45 = vmul.f32 %v2485_v24, %v6354_v43  ;;  %v2324_v51 = vmul.f32 %v2319_v58, %v6354_v43  ;;  %v6403_v58 = vld [vmem:[%s7082_s9 + $0x58] sm:$0xff] }
 0x89e   : > { %2810 = vperm.xlu0 %5502, %v6403_v58   ;;  %5474 = vset.pattern.permute.xlu2 %v5659_v3 }
 0x89f   : > { %v2510_v54 = vadd.f32 %v2505_v48, %v2490_v45  ;;  %v2344_v55 = vadd.f32 %v2339_v18, %v2324_v51  ;;  %2496 = vperm.xlu2 %5474, %v6328_v50   ;;  %5475 = vset.pattern.permute.xlu1 %v5658_v1  ;;  %v4973_v45 = vld [vmem:[%s7081_s8 + $0xb8] sm:$0xff]  ;;  %v4970_v51 = vld [vmem:[%s7081_s8 + $0xa0] sm:$0xff] }
 0x8a0   : > { %v2262_v57 = vpop.f32.mrf.mxu2  ;;  %2552 = vperm.xlu1 %5475, %v4943_v46  }
 0x8a1   : > { %v2514_v60 = vmax.f32 %v2510_v54, 0.0  ;;  %v2348_v5 = vmax.f32 %v2344_v55, 0.0  ;;  %v2563_v39 = vpop.permute.xlu0 %2562 }
 0x8a3   : > { %v2519_v2 = vpack.c.bf16 %v2514_v60, %v2513_v59  ;;  %v2353_v61 = vpack.c.bf16 %v2348_v5, %v2347_v49  ;;  %v4944_v49 = vld [vmem:[%s7088_s15 + $0x50] sm:$0xf] }
 0x8a5   : > { %2368 = vmatpush.bf16.msrb.mxu0 %v2353_v61  ;;  %2534 = vmatpush.bf16.msra.mxu2 %v2519_v2  ;;  %v4965_v61 = vld [vmem:[%s7088_s15 + $0x60] sm:$0xf] }
 0x8a6   : > { %5523 = vset.pattern.permute.xlu0 %v5658_v1 }
 0x8a7   : > { %2971 = vperm.xlu0 %5523, %v6413_v11   ;;  %2558 = vperm.xlu2 %5474, %v6340_v25  }
 0x8a9   : > { %2369 = vmatpush.bf16.msrb.mxu0 %v2352_v22 }
 0x8ac   : > { %4898 = vmatmul.msk.bf16.vlgmr.msrb.gmra.mxu0 %vm838_vm2, %v5267_v62 }
 0x8af   : > { %2966 = vperm.xlu0 %5523, %v6421_v42  }
 0x8b7   : > { %3107 = vperm.xlu0 %5523, %v6496_v20  }
 0x8bf   : > { %5528 = vset.pattern.permute.xlu0 %v5659_v3 }
 0x8f0   : > { %v2470_v13 = vpop.permute.xlu2 %2469 }
 0x8f9   : > { %v2497_v24 = vpop.permute.xlu2 %2496 }
 0x901   : > { %v2559_v35 = vpop.permute.xlu2 %2558 }
 0x908   : > { %v2493_v14 = vpop.permute.xlu1 %2492 }
 0x912   : > { %v2553_v34 = vpop.permute.xlu1 %2552 }
 0x929   : > { %v2371_v44 = vpop.f32.mrf.mxu0 }
 0x931   : > { %v2373_v12 = vpop.f32.mrf.mxu0 }
 0x932   : > { %v2392_v40 = vpack.c.bf16 %v2373_v12, %v2371_v44  ;;  %v4960_v12 = vld [vmem:[%s7088_s15 + $0x5c] sm:$0xf] }
 0x934   : > { %2449 = vmatmul.bf16.vlgmr.msrb.gmra.mxu1 %v2392_v40 }
 0x9b1   : > { %v2450_v15 = vpop.f32.mrf.mxu1 }
 0x9b2   : > { %2456 = vst.msk [vmem:[#allocation2] sm:$0xff] %vm2455_vm1, %v2450_v15 }
 0x9b9   : > { %v2452_v16 = vpop.f32.mrf.mxu1  ;;  %v6426_v18 = vld [vmem:[#allocation2] sm:$0xff] }
 0x9ba   : > { %2457 = vst.msk [vmem:[#allocation2 + $0x10] sm:$0xff] %vm2455_vm1, %v2452_v16  ;;  %v2487_v50 = vmul.f32 %v2470_v13, %v6426_v18 }
 0x9bc   : > { %v2507_v0 = vadd.f32 %v2493_v14, %v2487_v50 }
 0x9be   : > { %v2511_v26 = vmax.f32 %v2507_v0, 0.0 }
 0x9c1   : > { %v6429_v21 = vld [vmem:[#allocation2 + $0x10] sm:$0xff] }
 0x9c2   : > { %v2488_v23 = vmul.f32 %v2475_v19, %v6429_v21 }
 0x9c4   : > { %v2508_v25 = vadd.f32 %v2497_v24, %v2488_v23 }
 0x9c6   : > { %v2512_v27 = vmax.f32 %v2508_v25, 0.0 }
 0x9c8   : > { %v2518_v28 = vpack.c.bf16 %v2512_v27, %v2511_v26 }
 0x9ca   : > { %2535 = vmatpush.bf16.msra.mxu2 %v2518_v28 }
 0x9cd   : > { %4941 = vmatmul.msk.bf16.vlgmr.msra.gmra.mxu2 %vm838_vm2, %v5276_v30 }
 0xa50   : > { %v2537_v32 = vpop.f32.mrf.mxu2 }
 0xa51   : > { %v2555_v33 = vmul.f32 %v2548_v31, %v2537_v32  ;;  %v2728_v32 = vpop.permute.xlu0 %2727 }
 0xa53   : > { %v2565_v37 = vadd.f32 %v2559_v35, %v2555_v33 }
 0xa55   : > { %v2567_v47 = vmax.f32 %v2565_v37, 0.0 }
 0xa58   : > { %v2539_v36 = vpop.f32.mrf.mxu2 }
 0xa59   : > { %v2556_v38 = vmul.f32 %v2553_v34, %v2539_v36 }
 0xa5b   : > { %v2566_v46 = vadd.f32 %v2563_v39, %v2556_v38 }
 0xa5d   : > { %v2568_v41 = vmax.f32 %v2566_v46, 0.0 }
 0xa5f   : > { %v5482_v48 = vpack.i.bf16 %v2568_v41, %v2567_v47  ;;  %v2629_v8 = vpack.c.bf16 %v2568_v41, %v2567_v47  ;;  %v2723_v47 = vpop.permute.xlu0 %2722 }
 0xa61   : > { %5483 = vrot.lane.b32.xlu2 %v5482_v48, %s5660_s19  ;;  %5478 = vrot.lane.b32.xlu1 %v5482_v48, %s7113_s22 }
 0xa62   : > { %2640 = vmatpush.bf16.msrb.mxu2 %v2629_v8 }
 0xa65   : > { %4959 = vmatmul.msk.bf16.vlgmr.msrb.gmra.mxu2 %vm603_vm0, %v4958_v63 }
 0xa69   : > { %5493 = vrot.lane.b32.xlu2 %v5482_v48, %s7114_s30  ;;  %5488 = vrot.lane.b32.xlu1 %v5482_v48, %s7120_s0  ;;  %v2736_v48 = vmul.f32 %v2723_v47, %v6429_v21 }
 0xa71   : > { %2748 = vperm.xlu2 %5474, %v6368_v4   ;;  %2732 = vperm.xlu1 %5475, %v4973_v45  }
 0xa79   : > { %5499 = vset.pattern.permute.xlu2 %v5658_v1  ;;  %5498 = vset.pattern.permute.xlu1 %v5659_v3 }
 0xa7a   : > { %2717 = vperm.xlu2 %5499, %v4970_v51   ;;  %2752 = vperm.xlu1 %5498, %v4973_v45  }
 0xa82   : > { %5500 = vset.pattern.permute.xlu2 %v5659_v3  ;;  %2740 = vperm.xlu1 %5498, %v4970_v51  }
 0xa83   : > { %2744 = vperm.xlu2 %5500, %v6382_v29   ;;  %v4945_v29 = vld [vmem:[%s7088_s15 + $0x54] sm:$0xf] }
 0xa8a   : > { %5501 = vset.pattern.permute.xlu1 %v5658_v1 }
 0xa8b   : > { %2806 = vperm.xlu2 %5500, %v6394_v9   ;;  %2800 = vperm.xlu1 %5501, %v6403_v58   ;;  %v5040_v58 = vld [vmem:[%s7081_s8 + $0xd8] sm:$0xff] }
 0xa8c   : > { %3132 = vperm.xlu0 %5528, %v5040_v58  }
 0xa94   : > { %5532 = vset.pattern.permute.xlu0 %v5658_v1 }
 0xabb   : > { %v5484_v53 = vpop.permute.xlu2 %5483 }
 0xabc   : > { %v5486_v54 = vunpack.i.h.bf16 %v5484_v53  ;;  %v5485_v55 = vunpack.i.l.bf16 %v5484_v53 }
 0xabe   : > { %v4955_v57 = vpack.c.bf16 %v5486_v54, %v5485_v55 }
 0xac0   : > { %4956 = vmatpush.bf16.msk.msra.mxu0 %vm4954_vm5, %v4955_v57 }
 0xac3   : > { %v5494_v59 = vpop.permute.xlu2 %5493  ;;  %4957 = vmatmul.msk.bf16.vlgmr.msra.gmra.mxu0 %vm603_vm0, %v4944_v49  ;;  %v5277_v49 = vld [vmem:[%s7087_s14 + $0x28] sm:$0xff] }
 0xac4   : > { %v5496_v60 = vunpack.i.h.bf16 %v5494_v59  ;;  %v5495_v5 = vunpack.i.l.bf16 %v5494_v59  ;;  %v2796_v59 = vpop.permute.xlu0 %2795 }
 0xac6   : > { %v4967_v2 = vpack.c.bf16 %v5496_v60, %v5495_v5 }
 0xac8   : > { %4968 = vmatpush.bf16.msk.msrb.mxu0 %vm6474_vm7, %v4967_v2 }
 0xacb   : > { %v2749_v24 = vpop.permute.xlu2 %2748 }
 0xad3   : > { %v5479_v4 = vpop.permute.xlu1 %5478  ;;  %4969 = vmatmul.msk.bf16.vlgmr.msrb.gmra.mxu0 %vm603_vm0, %v4965_v61 }
 0xad4   : > { %v5481_v56 = vunpack.i.h.bf16 %v5479_v4  ;;  %v5480_v22 = vunpack.i.l.bf16 %v5479_v4  ;;  %v2718_v33 = vpop.permute.xlu2 %2717 }
 0xad5   : > { %v2735_v38 = vmul.f32 %v2718_v33, %v6426_v18  ;;  %v5004_v33 = vld [vmem:[%s7088_s15 + $0x74] sm:$0xf] }
 0xad6   : > { %v4949_v6 = vpack.c.bf16 %v5481_v56, %v5480_v22 }
 0xad8   : > { %4950 = vmatpush.bf16.msk.msra.mxu3 %vm6484_vm10, %v4949_v6  ;;  %v2811_v6 = vpop.permute.xlu0 %2810 }
 0xadb   : > { %v5489_v7 = vpop.permute.xlu1 %5488  ;;  %4951 = vmatmul.msk.bf16.vlgmr.msra.gmra.mxu3 %vm603_vm0, %v4945_v29 }
 0xadc   : > { %v5491_v9 = vunpack.i.h.bf16 %v5489_v7  ;;  %v5490_v10 = vunpack.i.l.bf16 %v5489_v7 }
 0xadd   : > { %v2745_v41 = vpop.permute.xlu2 %2744 }
 0xade   : > { %v4962_v44 = vpack.c.bf16 %v5491_v9, %v5490_v10  ;;  %v2756_v51 = vadd.f32 %v2745_v41, %v2736_v48 }
 0xae0   : > { %4963 = vmatpush.bf16.msk.msrb.mxu3 %vm6500_vm12, %v4962_v44  ;;  %v2972_v48 = vpop.permute.xlu0 %2971 }
 0xae3   : > { %v2733_v0 = vpop.permute.xlu1 %2732 }
 0xae4   : > { %v2738_v35 = vmul.f32 %v2733_v0, %v6354_v43  ;;  %v2760_v43 = vmax.f32 %v2756_v51, 0.0 }
 0xae5   : > { %v2807_v61 = vpop.permute.xlu2 %2806 }
 0xae8   : > { %v2642_v15 = vpop.f32.mrf.mxu2 }
 0xaeb   : > { %4964 = vmatmul.msk.bf16.vlgmr.msrb.gmra.mxu3 %vm603_vm0, %v4960_v12  ;;  %v5012_v12 = vld [vmem:[%s7084_s11 + $0x58] sm:$0xff] }
 0xaec   : > { %v2753_v30 = vpop.permute.xlu1 %2752 }
 0xaed   : > { %v2758_v39 = vadd.f32 %v2753_v30, %v2738_v35 }
 0xaef   : > { %v2762_v53 = vmax.f32 %v2758_v39, 0.0 }
 0xaf0   : > { %v2644_v16 = vpop.f32.mrf.mxu2 }
 0xaf4   : > { %v2741_v36 = vpop.permute.xlu1 %2740 }
 0xaf5   : > { %v2755_v8 = vadd.f32 %v2741_v36, %v2735_v38 }
 0xaf7   : > { %v2759_v55 = vmax.f32 %v2755_v8, 0.0 }
 0xaf9   : > { %v2766_v57 = vpack.c.bf16 %v2760_v43, %v2759_v55  ;;  %v5037_v55 = vld [vmem:[%s7081_s8 + $0xc0] sm:$0xff] }
 0xafd   : > { %v2801_v2 = vpop.permute.xlu1 %2800 }
 0xb40   : > { %v2623_v40 = vpop.f32.mrf.mxu0 }
 0xb48   : > { %v2625_v13 = vpop.f32.mrf.mxu0 }
 0xb50   : > { %v2700_v50 = vpop.f32.mrf.mxu0 }
 0xb58   : > { %v2702_v14 = vpop.f32.mrf.mxu0 }
 0xb5e   : > { %v2607_v19 = vpop.f32.mrf.mxu3 }
 0xb5f   : > { %v2624_v25 = vadd.f32 %v2623_v40, %v2607_v19  ;;  %v5009_v40 = vld [vmem:[%s7084_s11 + $0x40] sm:$0xff] }
 0xb61   : > { %v2646_v26 = vadd.f32 %v2642_v15, %v2624_v25 }
 0xb66   : > { %v2609_v23 = vpop.f32.mrf.mxu3 }
 0xb6e   : > { %v2671_v27 = vpop.f32.mrf.mxu3 }
 0xb6f   : > { %v2675_v28 = vadd.f32 %v2671_v27, %v2646_v26  ;;  %v4984_v27 = vld [vmem:[%s7088_s15 + $0x68] sm:$0xf] }
 0xb71   : > { %v2704_v31 = vadd.f32 %v2700_v50, %v2675_v28 }
 0xb73   : > { %2705 = vst.msk [vmem:[#allocation2 + $0x20] sm:$0xff] %vm2455_vm1, %v2704_v31 }
 0xb76   : > { %v2673_v34 = vpop.f32.mrf.mxu3 }
 0xb7a   : > { %v6513_v37 = vld [vmem:[#allocation2 + $0x20] sm:$0xff] }
 0xb7b   : > { %v2737_v46 = vmul.f32 %v6513_v37, %v2728_v32 }
 0xb7d   : > { %v2757_v45 = vadd.f32 %v2749_v24, %v2737_v46 }
 0xb7f   : > { %v2761_v54 = vmax.f32 %v2757_v45, 0.0 }
 0xb81   : > { %v2767_v63 = vpack.c.bf16 %v2762_v53, %v2761_v54  ;;  %v2967_v54 = vpop.permute.xlu0 %2966 }
 0xb83   : > { %2782 = vmatpush.bf16.msra.mxu1 %v2767_v63  ;;  %v5282_v63 = vld [vmem:[%s7076_s3 + $0x18] sm:$0xff] }
 0xb87   : > { %2783 = vmatpush.bf16.msra.mxu1 %v2766_v57 }
 0xb8a   : > { %4980 = vmatmul.msk.bf16.vlgmr.msra.gmra.mxu1 %vm838_vm2, %v5277_v49 }
 0xc07   : > { %v2785_v60 = vpop.f32.mrf.mxu1 }
 0xc08   : > { %v2803_v5 = vmul.f32 %v2796_v59, %v2785_v60 }
 0xc0a   : > { %v2813_v56 = vadd.f32 %v2807_v61, %v2803_v5 }
 0xc0c   : > { %v2815_v7 = vmax.f32 %v2813_v56, 0.0 }
 0xc0f   : > { %v2787_v4 = vpop.f32.mrf.mxu1 }
 0xc10   : > { %v2804_v22 = vmul.f32 %v2801_v2, %v2787_v4  ;;  %v3108_v2 = vpop.permute.xlu0 %3107  ;;  %v2981_v4 = vmul.f32 %v6513_v37, %v2972_v48 }
 0xc12   : > { %v2814_v29 = vadd.f32 %v2811_v6, %v2804_v22  ;;  %v3117_v6 = vmul.f32 %v3108_v2, %v6513_v37 }
 0xc14   : > { %v2816_v9 = vmax.f32 %v2814_v29, 0.0 }
 0xc16   : > { %v5508_v10 = vpack.i.bf16 %v2816_v9, %v2815_v7  ;;  %v2875_v44 = vpack.c.bf16 %v2816_v9, %v2815_v7 }
 0xc18   : > { %5509 = vrot.lane.b32.xlu2 %v5508_v10, %s5660_s19  ;;  %5504 = vrot.lane.b32.xlu1 %v5508_v10, %s7113_s22  ;;  %v3133_v9 = vpop.permute.xlu0 %3132  ;;  %s573_s19 = scalar_lea.vmem %s7091_s18, %s4652_s1 }
 0xc19   : > { %2886 = vmatpush.bf16.msra.mxu0 %v2875_v44 }
 0xc1d   : > { %3074 = vmatpush.bf16.msrb.mxu0 %v5282_v63 }
 0xc20   : > { %5519 = vrot.lane.b32.xlu2 %v5508_v10, %s7120_s0  ;;  %5514 = vrot.lane.b32.xlu1 %v5508_v10, %s7114_s30 }
 0xc28   : > { %2992 = vperm.xlu2 %5500, %v6413_v11   ;;  %2976 = vperm.xlu1 %5501, %v5012_v12  }
 0xc30   : > { %5525 = vset.pattern.permute.xlu2 %v5658_v1  ;;  %5524 = vset.pattern.permute.xlu1 %v5659_v3 }
 0xc31   : > { %2961 = vperm.xlu2 %5525, %v5009_v40   ;;  %2996 = vperm.xlu1 %5524, %v5012_v12  }
 0xc39   : > { %5526 = vset.pattern.permute.xlu2 %v5659_v3  ;;  %2984 = vperm.xlu1 %5524, %v5009_v40  }
 0xc3a   : > { %2988 = vperm.xlu2 %5526, %v6421_v42   ;;  %v4983_v42 = vld [vmem:[%s7088_s15 + $0x64] sm:$0xf] }
 0xc41   : > { %5527 = vset.pattern.permute.xlu1 %v5658_v1 }
 0xc42   : > { %3128 = vperm.xlu2 %5526, %v6496_v20   ;;  %v4997_v20 = vld [vmem:[%s7088_s15 + $0x6c] sm:$0xf]  ;;  %3112 = vperm.xlu1 %5527, %v5040_v58  }
 0xc43   : > { %4998 = vmatmul.msk.bf16.vlgmr.msra.gmra.mxu0 %vm603_vm0, %v4997_v20  ;;  %v5038_v58 = vld [vmem:[%s7081_s8 + $0xc8] sm:$0xff] }
 0xc4a   : > { %5529 = vset.pattern.permute.xlu2 %v5658_v1  ;;  %3097 = vperm.xlu1 %5527, %v5037_v55  }
 0xc4b   : > { %3102 = vperm.xlu2 %5529, %v5038_v58  }
 0xc52   : > { %5530 = vset.pattern.permute.xlu1 %v5659_v3 }
 0xc53   : > { %3120 = vperm.xlu1 %5530, %v5037_v55   ;;  %5531 = vset.pattern.permute.xlu2 %v5659_v3 }
 0xc54   : > { %3124 = vperm.xlu2 %5531, %v5038_v58  }
 0xc5b   : > { %5533 = vset.pattern.permute.xlu1 %v5658_v1 }
 0xc72   : > { %v5510_v11 = vpop.permute.xlu2 %5509 }
 0xc73   : > { %v5512_v15 = vunpack.i.h.bf16 %v5510_v11  ;;  %v5511_v13 = vunpack.i.l.bf16 %v5510_v11  ;;  %v2980_v11 = vmul.f32 %v2967_v54, %v6429_v21  ;;  %v5281_v21 = vld [vmem:[%s7076_s3 + $0x10] sm:$0xff] }
 0xc74   : > { %3075 = vmatpush.bf16.msrb.mxu0 %v5281_v21  ;;  %v5059_v21 = vld [vmem:[%s7088_s15 + $0x84] sm:$0xf] }
 0xc75   : > { %v4994_v16 = vpack.c.bf16 %v5512_v15, %v5511_v13 }
 0xc77   : > { %4995 = vmatpush.bf16.msk.msra.mxu3 %vm4954_vm5, %v4994_v16  ;;  %vm6981_vm5 = vmpackc.low %vm4238_vm4, %vm4238_vm4 }
 0xc7a   : > { %v5520_v50 = vpop.permute.xlu2 %5519  ;;  %4996 = vmatmul.msk.bf16.vlgmr.msra.gmra.mxu3 %vm603_vm0, %v4983_v42 }
 0xc7b   : > { %v5522_v14 = vunpack.i.h.bf16 %v5520_v50  ;;  %v5521_v19 = vunpack.i.l.bf16 %v5520_v50 }
 0xc7d   : > { %v5001_v0 = vpack.c.bf16 %v5522_v14, %v5521_v19 }
 0xc7f   : > { %5002 = vmatpush.bf16.msk.msrb.mxu1 %vm6500_vm12, %v5001_v0 }
 0xc82   : > { %5003 = vmatmul.msk.bf16.vlgmr.msrb.gmra.mxu1 %vm603_vm0, %v4999_v52  ;;  %v2993_v47 = vpop.permute.xlu2 %2992 }
 0xc83   : > { %v3001_v29 = vadd.f32 %v2993_v47, %v2981_v4 }
 0xc85   : > { %v3005_v42 = vmax.f32 %v3001_v29, 0.0 }
 0xc8a   : > { %v5505_v23 = vpop.permute.xlu1 %5504 }
 0xc8b   : > { %v5507_v24 = vunpack.i.h.bf16 %v5505_v23  ;;  %v5506_v25 = vunpack.i.l.bf16 %v5505_v23  ;;  %v2962_v17 = vpop.permute.xlu2 %2961 }
 0xc8c   : > { %v2979_v10 = vmul.f32 %v2962_v17, %v6426_v18 }
 0xc8d   : > { %v4988_v26 = vpack.c.bf16 %v5507_v24, %v5506_v25  ;;  %v5278_v24 = vld [vmem:[%s7090_s17 + $0x10] sm:$0xff]  ;;  %v5049_v25 = vld [vmem:[%s7082_s9 + $0x68] sm:$0xff] }
 0xc8e   : > { %3180 = vperm.xlu1 %5533, %v5049_v25  }
 0xc8f   : > { %4989 = vmatpush.bf16.msk.msra.mxu2 %vm6484_vm10, %v4988_v26  ;;  %v5280_v26 = vld [vmem:[%s7076_s3 + $0x8] sm:$0xff] }
 0xc90   : > { %3076 = vmatpush.bf16.msrb.mxu0 %v5280_v26 }
 0xc92   : > { %v5515_v28 = vpop.permute.xlu1 %5514  ;;  %4990 = vmatmul.msk.bf16.vlgmr.msra.gmra.mxu2 %vm603_vm0, %v4984_v27  ;;  %v5279_v27 = vld [vmem:[%s7076_s3] sm:$0xff] }
 0xc93   : > { %v5517_v30 = vunpack.i.h.bf16 %v5515_v28  ;;  %v5516_v31 = vunpack.i.l.bf16 %v5515_v28  ;;  %v5048_v28 = vld [vmem:[%s7082_s9 + $0x60] sm:$0xff] }
 0xc94   : > { %v2989_v57 = vpop.permute.xlu2 %2988  ;;  %3077 = vmatpush.bf16.msrb.mxu0 %v5279_v27  ;;  %3175 = vperm.xlu0 %5532, %v5048_v28  }
 0xc95   : > { %v5006_v32 = vpack.c.bf16 %v5517_v30, %v5516_v31  ;;  %v3000_v37 = vadd.f32 %v2989_v57, %v2980_v11  ;;  %v5066_v30 = vld [vmem:[%s7081_s8 + $0xf0] sm:$0xff]  ;;  %v5067_v31 = vld [vmem:[%s7081_s8 + $0xf8] sm:$0xff]  ;;  %3186 = vperm.xlu2 %5531, %v5048_v28  }
 0xc96   : > { %5534 = vset.pattern.permute.xlu1 %v5659_v3  ;;  %v5076_v11 = vld [vmem:[%s7082_s9 + $0x78] sm:$0xff] }
 0xc97   : > { %5007 = vmatpush.bf16.msk.msrb.mxu2 %vm6474_vm7, %v5006_v32  ;;  %v3004_v52 = vmax.f32 %v3000_v37, 0.0  ;;  %3190 = vperm.xlu1 %5534, %v5049_v25   ;;  %v6671_v37 = vld [vmem:[%s7084_s11 + $0x78] sm:$0xff] }
 0xc9a   : > { %v2977_v41 = vpop.permute.xlu1 %2976 }
 0xc9c   : > { %v3129_v61 = vpop.permute.xlu2 %3128  ;;  %5547 = vset.pattern.permute.xlu0 %v5659_v3 }
 0xc9d   : > { %v3137_v44 = vadd.f32 %v3129_v61, %v3117_v6  ;;  %5546 = vset.pattern.permute.xlu2 %v5658_v1 }
 0xc9f   : > { %v3141_v50 = vmax.f32 %v3137_v44, 0.0  ;;  %5545 = vset.pattern.permute.xlu1 %v5658_v1  ;;  %v5064_v44 = vld [vmem:[%s7081_s8 + $0xe0] sm:$0xff] }
 0xca0   : > { %3296 = vperm.xlu1 %5545, %v5066_v30  }
 0xca2   : > { %5008 = vmatmul.msk.bf16.vlgmr.msrb.gmra.mxu2 %vm603_vm0, %v5004_v33  ;;  %v5065_v33 = vld [vmem:[%s7081_s8 + $0xe8] sm:$0xff] }
 0xca3   : > { %v2997_v45 = vpop.permute.xlu1 %2996 }
 0xca8   : > { %5548 = vset.pattern.permute.xlu1 %v5659_v3 }
 0xca9   : > { %3321 = vperm.xlu1 %5548, %v5067_v31  }
 0xcab   : > { %v2985_v59 = vpop.permute.xlu1 %2984 }
 0xcac   : > { %v2999_v15 = vadd.f32 %v2985_v59, %v2979_v10 }
 0xcae   : > { %v3003_v19 = vmax.f32 %v2999_v15, 0.0  ;;  %v6665_v15 = vld [vmem:[%s7084_s11 + $0x70] sm:$0xff] }
 0xcb0   : > { %v3010_v23 = vpack.c.bf16 %v3004_v52, %v3003_v19  ;;  %v6690_v19 = vld [vmem:[%s7081_s8 + $0x110] sm:$0xff] }
 0xcb1   : > { %5549 = vset.pattern.permute.xlu1 %v5658_v1 }
 0xcb2   : > { %3291 = vperm.xlu1 %5549, %v5065_v33  }
 0xcb4   : > { %v3113_v22 = vpop.permute.xlu1 %3112 }
 0xcc0   : > { %v2888_v34 = vpop.f32.mrf.mxu0 }
 0xcc8   : > { %v2890_v38 = vpop.f32.mrf.mxu0 }
 0xcc9   : > { %v3098_v38 = vpop.permute.xlu1 %3097 }
 0xcd1   : > { %v3121_v48 = vpop.permute.xlu1 %3120 }
 0xcfd   : > { %v2869_v35 = vpop.f32.mrf.mxu3 }
 0xcff   : > { %v2916_v36 = vpop.f32.mrf.mxu1 }
 0xd00   : > { %v3181_v57 = vpop.permute.xlu1 %3180 }
 0xd05   : > { %v2871_v39 = vpop.f32.mrf.mxu3 }
 0xd06   : > { %v3103_v39 = vpop.permute.xlu2 %3102  ;;  %v3176_v59 = vpop.permute.xlu0 %3175 }
 0xd07   : > { %v2918_v46 = vpop.f32.mrf.mxu1 }
 0xd15   : > { %v2853_v8 = vpop.f32.mrf.mxu2 }
 0xd16   : > { %v2870_v51 = vadd.f32 %v2869_v35, %v2853_v8 }
 0xd18   : > { %v2892_v43 = vadd.f32 %v2888_v34, %v2870_v51  ;;  %v3125_v51 = vpop.permute.xlu2 %3124 }
 0xd1a   : > { %v2920_v49 = vadd.f32 %v2916_v36, %v2892_v43  ;;  %v5283_v43 = vld [vmem:[%s7087_s14 + $0x30] sm:$0xff] }
 0xd1d   : > { %v2855_v53 = vpop.f32.mrf.mxu2 }
 0xd25   : > { %v2944_v60 = vpop.f32.mrf.mxu2 }
 0xd26   : > { %v2948_v5 = vadd.f32 %v2944_v60, %v2920_v49 }
 0xd28   : > { %2949 = vst.msk [vmem:[#allocation2 + $0x30] sm:$0xff] %vm2455_vm1, %v2948_v5  ;;  %v3187_v5 = vpop.permute.xlu2 %3186 }
 0xd2d   : > { %v2946_v56 = vpop.f32.mrf.mxu2 }
 0xd2e   : > { %v3191_v56 = vpop.permute.xlu1 %3190 }
 0xd2f   : > { %v6585_v7 = vld [vmem:[#allocation2 + $0x30] sm:$0xff] }
 0xd30   : > { %v3118_v12 = vmul.f32 %v3113_v22, %v6585_v7  ;;  %v2982_v40 = vmul.f32 %v6585_v7, %v2977_v41 }
 0xd32   : > { %v3138_v13 = vadd.f32 %v3133_v9, %v3118_v12  ;;  %v3002_v16 = vadd.f32 %v2997_v45, %v2982_v40  ;;  %v5075_v12 = vld [vmem:[%s7082_s9 + $0x70] sm:$0xff]  ;;  %v5051_v40 = vld [vmem:[%s7088_s15 + $0x80] sm:$0xf] }
 0xd33   : > { %3364 = vperm.xlu1 %5549, %v5075_v12  }
 0xd34   : > { %v3142_v20 = vmax.f32 %v3138_v13, 0.0  ;;  %v3006_v14 = vmax.f32 %v3002_v16, 0.0 }
 0xd36   : > { %v3147_v0 = vpack.c.bf16 %v3142_v20, %v3141_v50  ;;  %v3011_v18 = vpack.c.bf16 %v3006_v14, %v3005_v42  ;;  %v5050_v20 = vld [vmem:[%s7088_s15 + $0x7c] sm:$0xf]  ;;  %v6684_v14 = vld [vmem:[%s7084_s11 + $0x60] sm:$0xff]  ;;  %v3297_v58 = vpop.permute.xlu1 %3296 }
 0xd38   : > { %3026 = vmatpush.bf16.msrb.mxu3 %v3011_v18  ;;  %3162 = vmatpush.bf16.msra.mxu1 %v3147_v0 }
 0xd3b   : > { %5552 = vset.pattern.permute.xlu1 %v5659_v3 }
 0xd3c   : > { %3027 = vmatpush.bf16.msrb.mxu3 %v3010_v23  ;;  %3379 = vperm.xlu1 %5552, %v5076_v11  }
 0xd3f   : > { %5019 = vmatmul.msk.bf16.vlgmr.msrb.gmra.mxu3 %vm838_vm2, %v5278_v24 }
 0xd44   : > { %5563 = vset.pattern.permute.xlu1 %v5658_v1 }
 0xd45   : > { %3484 = vperm.xlu1 %5563, %v6665_v15  }
 0xd4d   : > { %5564 = vset.pattern.permute.xlu1 %v5659_v3 }
 0xd4e   : > { %3509 = vperm.xlu1 %5564, %v6671_v37  }
 0xd56   : > { %3497 = vperm.xlu1 %5564, %v6684_v14  }
 0xd5e   : > { %5567 = vset.pattern.permute.xlu1 %v5658_v1 }
 0xd5f   : > { %3604 = vperm.xlu1 %5567, %v6690_v19  }
 0xd67   : > { %5570 = vset.pattern.permute.xlu1 %v5659_v3 }
 0xdc2   : > { %v3029_v32 = vpop.f32.mrf.mxu3 }
 0xdca   : > { %v3031_v34 = vpop.f32.mrf.mxu3 }
 0xdcb   : > { %v3042_v35 = vpack.c.bf16 %v3031_v34, %v3029_v32  ;;  %v3322_v32 = vpop.permute.xlu1 %3321 }
 0xdcd   : > { %5036 = vmatmul.msk.bf16.vlgmr.msrb.gmra.mxu0 %vm2455_vm1, %v3042_v35  ;;  %vm6821_vm1 = vmpackc.low %vm3748_vm15, %vm3748_vm15 }
 0xe4a   : > { %v3079_v36 = vpop.f32.mrf.mxu0 }
 0xe4b   : > { %3084 = vst.msk [vmem:[#allocation2] sm:$0xff] %vm838_vm2, %v3079_v36 }
 0xe52   : > { %v3081_v46 = vpop.f32.mrf.mxu0  ;;  %v6633_v47 = vld [vmem:[#allocation2] sm:$0xff] }
 0xe53   : > { %3085 = vst.msk [vmem:[#allocation2 + $0x10] sm:$0xff] %vm838_vm2, %v3081_v46  ;;  %v3115_v41 = vmul.f32 %v3098_v38, %v6633_v47 }
 0xe55   : > { %v3135_v45 = vadd.f32 %v3121_v48, %v3115_v41 }
 0xe57   : > { %v3139_v54 = vmax.f32 %v3135_v45, 0.0 }
 0xe5a   : > { %v6636_v8 = vld [vmem:[#allocation2 + $0x10] sm:$0xff] }
 0xe5b   : > { %v3116_v17 = vmul.f32 %v3103_v39, %v6636_v8  ;;  %v3292_v39 = vpop.permute.xlu1 %3291 }
 0xe5d   : > { %v3136_v53 = vadd.f32 %v3125_v51, %v3116_v17  ;;  %v3305_v17 = vmul.f32 %v3292_v39, %v6636_v8 }
 0xe5f   : > { %v3140_v55 = vmax.f32 %v3136_v53, 0.0 }
 0xe61   : > { %v3146_v63 = vpack.c.bf16 %v3140_v55, %v3139_v54 }
 0xe63   : > { %3163 = vmatpush.bf16.msra.mxu1 %v3146_v63 }
 0xe66   : > { %5047 = vmatmul.msk.bf16.vlgmr.msra.gmra.mxu1 %vm838_vm2, %v5283_v43 }
 0xee3   : > { %v3165_v49 = vpop.f32.mrf.mxu1 }
 0xee4   : > { %v3183_v60 = vmul.f32 %v3176_v59, %v3165_v49 }
 0xee6   : > { %v3193_v61 = vadd.f32 %v3187_v5, %v3183_v60 }
 0xee8   : > { %v3195_v6 = vmax.f32 %v3193_v61, 0.0  ;;  %v3365_v61 = vpop.permute.xlu1 %3364 }
 0xeeb   : > { %v3167_v2 = vpop.f32.mrf.mxu1 }
 0xeec   : > { %v3184_v4 = vmul.f32 %v3181_v57, %v3167_v2  ;;  %v5284_v2 = vld [vmem:[%s7087_s14 + $0x38] sm:$0xff] }
 0xeee   : > { %v3194_v22 = vadd.f32 %v3191_v56, %v3184_v4 }
 0xef0   : > { %v3196_v29 = vmax.f32 %v3194_v22, 0.0 }
 0xef2   : > { %v5540_v9 = vpack.i.bf16 %v3196_v29, %v3195_v6  ;;  %v3212_v10 = vpack.c.bf16 %v3196_v29, %v3195_v6 }
 0xef4   : > { %5541 = vrot.lane.b32.xlu0 %v5540_v9, %s7120_s0  ;;  %5536 = vrot.lane.b32.xlu2 %v5540_v9, %s7113_s22 }
 0xef5   : > { %3223 = vmatpush.bf16.msra.mxu2 %v3212_v10 }
 0xef8   : > { %5052 = vmatmul.msk.bf16.vlgmr.msra.gmra.mxu2 %vm603_vm0, %v5051_v40 }
 0xefc   : > { %3317 = vperm.xlu0 %5547, %v5066_v30   ;;  %3301 = vperm.xlu2 %5546, %v5067_v31  }
 0xf04   : > { %3313 = vperm.xlu0 %5547, %v5065_v33   ;;  %3286 = vperm.xlu2 %5546, %v5064_v44  }
 0xf0c   : > { %5550 = vset.pattern.permute.xlu2 %v5659_v3  ;;  %3375 = vperm.xlu0 %5547, %v5075_v12  }
 0xf0d   : > { %3309 = vperm.xlu2 %5550, %v5064_v44   ;;  %v3380_v44 = vpop.permute.xlu1 %3379 }
 0xf15   : > { %5551 = vset.pattern.permute.xlu2 %v5658_v1 }
 0xf16   : > { %3369 = vperm.xlu2 %5551, %v5076_v11  }
 0xf4e   : > { %v5537_v13 = vpop.permute.xlu2 %5536 }
 0xf4f   : > { %v5539_v16 = vunpack.i.h.bf16 %v5537_v13  ;;  %v5538_v42 = vunpack.i.l.bf16 %v5537_v13 }
 0xf51   : > { %v5056_v50 = vpack.c.bf16 %v5539_v16, %v5538_v42  ;;  %v5092_v42 = vld [vmem:[%s7084_s11 + $0x68] sm:$0xff] }
 0xf53   : > { %5057 = vmatpush.bf16.msk.msra.mxu3 %vm6484_vm10, %v5056_v50 }
 0xf56   : > { %5058 = vmatmul.msk.bf16.vlgmr.msra.gmra.mxu3 %vm603_vm0, %v5050_v20  ;;  %v3302_v30 = vpop.permute.xlu2 %3301 }
 0xf57   : > { %v3307_v38 = vmul.f32 %v3302_v30, %v6585_v7 }
 0xf59   : > { %v3327_v45 = vadd.f32 %v3322_v32, %v3307_v38 }
 0xf5b   : > { %v3331_v43 = vmax.f32 %v3327_v45, 0.0 }
 0xf5e   : > { %v3287_v36 = vpop.permute.xlu2 %3286 }
 0xf5f   : > { %v3304_v54 = vmul.f32 %v3287_v36, %v6633_v47 }
 0xf66   : > { %v5542_v0 = vpop.permute.xlu0 %5541 }
 0xf67   : > { %v5544_v18 = vunpack.i.h.bf16 %v5542_v0  ;;  %v5543_v52 = vunpack.i.l.bf16 %v5542_v0  ;;  %v3310_v53 = vpop.permute.xlu2 %3309  ;;  %v5077_v0 = vld [vmem:[%s7088_s15 + $0x90] sm:$0xf] }
 0xf68   : > { %v3324_v57 = vadd.f32 %v3310_v53, %v3304_v54 }
 0xf69   : > { %v5061_v24 = vpack.c.bf16 %v5544_v18, %v5543_v52 }
 0xf6a   : > { %v3328_v60 = vmax.f32 %v3324_v57, 0.0 }
 0xf6b   : > { %5062 = vmatpush.bf16.msk.msra.mxu0 %vm6694_vm14, %v5061_v24 }
 0xf6e   : > { %5063 = vmatmul.msk.bf16.vlgmr.msra.gmra.mxu0 %vm603_vm0, %v5059_v21  ;;  %v3318_v33 = vpop.permute.xlu0 %3317 }
 0xf70   : > { %v3370_v22 = vpop.permute.xlu2 %3369 }
 0xf76   : > { %v3314_v41 = vpop.permute.xlu0 %3313 }
 0xf77   : > { %v3325_v55 = vadd.f32 %v3314_v41, %v3305_v17 }
 0xf79   : > { %v3329_v59 = vmax.f32 %v3325_v55, 0.0 }
 0xf7b   : > { %v3225_v25 = vpop.f32.mrf.mxu2  ;;  %v3335_v5 = vpack.c.bf16 %v3329_v59, %v3328_v60 }
 0xf7e   : > { %v3376_v6 = vpop.permute.xlu0 %3375 }
 0xf83   : > { %v3227_v26 = vpop.f32.mrf.mxu2 }
 0xfd9   : > { %v3241_v27 = vpop.f32.mrf.mxu3 }
 0xfda   : > { %v3242_v31 = vadd.f32 %v3241_v27, %v3225_v25  ;;  %v5086_v25 = vld [vmem:[%s7088_s15 + $0x98] sm:$0xf] }
 0xfe1   : > { %v3243_v28 = vpop.f32.mrf.mxu3 }
 0xfeb   : > { %v3269_v34 = vpop.f32.mrf.mxu0 }
 0xfec   : > { %v3273_v35 = vadd.f32 %v3269_v34, %v3242_v31 }
 0xfee   : > { %3274 = vst.msk [vmem:[#allocation2 + $0x20] sm:$0xff] %vm838_vm2, %v3273_v35 }
 0xff3   : > { %v3271_v46 = vpop.f32.mrf.mxu0 }
 0xff5   : > { %v6707_v48 = vld [vmem:[#allocation2 + $0x20] sm:$0xff] }
 0xff6   : > { %v3306_v51 = vmul.f32 %v6707_v48, %v3297_v58  ;;  %v3485_v58 = vpop.permute.xlu1 %3484 }
 0xff7   : > { %v3494_v54 = vmul.f32 %v6707_v48, %v3485_v58 }
 0xff8   : > { %v3326_v63 = vadd.f32 %v3318_v33, %v3306_v51 }
 0xffa   : > { %v3330_v49 = vmax.f32 %v3326_v63, 0.0 }
 0xffc   : > { %v3336_v7 = vpack.c.bf16 %v3331_v43, %v3330_v49 }
 0xffe   : > { %3351 = vmatpush.bf16.msrb.mxu1 %v3336_v7  ;;  %v3510_v28 = vpop.permute.xlu1 %3509 }
0x1002   : > { %3352 = vmatpush.bf16.msrb.mxu1 %v3335_v5 }
0x1005   : > { %5074 = vmatmul.msk.bf16.vlgmr.msrb.gmra.mxu1 %vm838_vm2, %v5284_v2 }
0x1006   : > { %v3498_v34 = vpop.permute.xlu1 %3497 }
0x100e   : > { %v3605_v41 = vpop.permute.xlu1 %3604 }
0x100f   : > { %v3614_v53 = vmul.f32 %v3605_v41, %v6707_v48 }
0x1082   : > { %v3354_v4 = vpop.f32.mrf.mxu1 }
0x1083   : > { %v3372_v56 = vmul.f32 %v3365_v61, %v3354_v4 }
0x1085   : > { %v3382_v9 = vadd.f32 %v3376_v6, %v3372_v56 }
0x1087   : > { %v3384_v40 = vmax.f32 %v3382_v9, 0.0 }
0x108a   : > { %v3356_v29 = vpop.f32.mrf.mxu1 }
0x108b   : > { %v3373_v10 = vmul.f32 %v3370_v22, %v3356_v29 }
0x108d   : > { %v3383_v12 = vadd.f32 %v3380_v44, %v3373_v10  ;;  %v5285_v44 = vld [vmem:[%s7090_s17 + $0x18] sm:$0xff] }
0x108f   : > { %v3385_v11 = vmax.f32 %v3383_v12, 0.0  ;;  %v5287_v12 = vld [vmem:[%s7077_s4 + $0x8] sm:$0xff] }
0x1091   : > { %v5558_v13 = vpack.i.bf16 %v3385_v11, %v3384_v40  ;;  %v3401_v16 = vpack.c.bf16 %v3385_v11, %v3384_v40  ;;  %v5286_v40 = vld [vmem:[%s7077_s4] sm:$0xff]  ;;  %v5112_v11 = vld [vmem:[%s7081_s8 + $0x108] sm:$0xff] }
0x1093   : > { %5559 = vrot.lane.b32.xlu0 %v5558_v13, %s7120_s0  ;;  %5554 = vrot.lane.b32.xlu2 %v5558_v13, %s7113_s22  ;;  %v5111_v13 = vld [vmem:[%s7081_s8 + $0x100] sm:$0xff] }
0x1094   : > { %3412 = vmatpush.bf16.msrb.mxu2 %v3401_v16  ;;  %v5122_v16 = vld [vmem:[%s7082_s9 + $0x80] sm:$0xff] }
0x1098   : > { %3573 = vmatpush.bf16.msra.mxu2 %v5287_v12 }
0x109b   : > { %3505 = vperm.xlu0 %5547, %v6665_v15   ;;  %3489 = vperm.xlu2 %5551, %v6671_v37   ;;  %v5078_v15 = vld [vmem:[%s7088_s15 + $0x94] sm:$0xf] }
0x109c   : > { %5079 = vmatmul.msk.bf16.vlgmr.msrb.gmra.mxu2 %vm603_vm0, %v5078_v15 }
0x109d   : > { %3574 = vmatpush.bf16.msra.mxu2 %v5286_v40  ;;  %v5149_v40 = vld [vmem:[%s7082_s9 + $0x90] sm:$0xff] }
0x10a3   : > { %5565 = vset.pattern.permute.xlu0 %v5658_v1  ;;  %3474 = vperm.xlu2 %5551, %v6684_v14  }
0x10a4   : > { %3479 = vperm.xlu0 %5565, %v5092_v42  }
0x10ab   : > { %5566 = vset.pattern.permute.xlu2 %v5659_v3 }
0x10ac   : > { %5569 = vset.pattern.permute.xlu0 %v5659_v3  ;;  %3501 = vperm.xlu2 %5566, %v5092_v42  }
0x10ad   : > { %3625 = vperm.xlu0 %5569, %v6690_v19   ;;  %v5114_v19 = vld [vmem:[%s7081_s8 + $0x118] sm:$0xff] }
0x10ae   : > { %3629 = vperm.xlu1 %5570, %v5114_v19  }
0x10b4   : > { %5568 = vset.pattern.permute.xlu2 %v5658_v1 }
0x10b5   : > { %3609 = vperm.xlu2 %5568, %v5114_v19   ;;  %3621 = vperm.xlu0 %5569, %v5112_v11  }
0x10b6   : > { %5571 = vset.pattern.permute.xlu1 %v5658_v1 }
0x10b7   : > { %3599 = vperm.xlu1 %5571, %v5112_v11   ;;  %v5150_v11 = vld [vmem:[%s7082_s9 + $0x98] sm:$0xff] }
0x10bd   : > { %3594 = vperm.xlu2 %5568, %v5111_v13   ;;  %3683 = vperm.xlu0 %5569, %v5122_v16  }
0x10bf   : > { %3672 = vperm.xlu1 %5571, %v5122_v16  }
0x10c5   : > { %5572 = vset.pattern.permute.xlu2 %v5659_v3 }
0x10c6   : > { %3617 = vperm.xlu2 %5572, %v5111_v13  }
0x10c7   : > { %5574 = vset.pattern.permute.xlu1 %v5659_v3 }
0x10ce   : > { %5573 = vset.pattern.permute.xlu2 %v5658_v1 }
0x10ed   : > { %v5555_v37 = vpop.permute.xlu2 %5554 }
0x10ee   : > { %v5557_v50 = vunpack.i.h.bf16 %v5555_v37  ;;  %v5556_v20 = vunpack.i.l.bf16 %v5555_v37 }
0x10f0   : > { %v5083_v14 = vpack.c.bf16 %v5557_v50, %v5556_v20  ;;  %v5123_v50 = vld [vmem:[%s7082_s9 + $0x88] sm:$0xff] }
0x10f1   : > { %3687 = vperm.xlu1 %5574, %v5123_v50   ;;  %3677 = vperm.xlu2 %5573, %v5123_v50  }
0x10f2   : > { %5084 = vmatpush.bf16.msk.msrb.mxu3 %vm6484_vm10, %v5083_v14  ;;  %v5140_v14 = vld [vmem:[%s7081_s8 + $0x130] sm:$0xff] }
0x10f5   : > { %5085 = vmatmul.msk.bf16.vlgmr.msrb.gmra.mxu3 %vm603_vm0, %v5077_v0  ;;  %v3490_v30 = vpop.permute.xlu2 %3489 }
0x10f9   : > { %5585 = vset.pattern.permute.xlu1 %v5658_v1 }
0x10fa   : > { %3793 = vperm.xlu1 %5585, %v5140_v14  }
0x10fd   : > { %v3475_v35 = vpop.permute.xlu2 %3474 }
0x10fe   : > { %v3492_v63 = vmul.f32 %v3475_v35, %v6633_v47  ;;  %v5138_v35 = vld [vmem:[%s7081_s8 + $0x120] sm:$0xff] }
0x1100   : > { %v3512_v4 = vadd.f32 %v3498_v34, %v3492_v63  ;;  %v5141_v34 = vld [vmem:[%s7081_s8 + $0x138] sm:$0xff] }
0x1102   : > { %v3516_v9 = vmax.f32 %v3512_v4, 0.0  ;;  %5586 = vset.pattern.permute.xlu1 %v5659_v3  ;;  %v5133_v4 = vld [vmem:[%s7088_s15 + $0xac] sm:$0xf] }
0x1103   : > { %3818 = vperm.xlu1 %5586, %v5141_v34  }
0x1105   : > { %v5560_v18 = vpop.permute.xlu0 %5559 }
0x1106   : > { %v5562_v52 = vunpack.i.h.bf16 %v5560_v18  ;;  %v5561_v24 = vunpack.i.l.bf16 %v5560_v18  ;;  %v3502_v38 = vpop.permute.xlu2 %3501 }
0x1108   : > { %v5088_v21 = vpack.c.bf16 %v5562_v52, %v5561_v24 }
0x110a   : > { %5089 = vmatpush.bf16.msk.msrb.mxu0 %vm6694_vm14, %v5088_v21 }
0x110b   : > { %3806 = vperm.xlu1 %5586, %v5138_v35  }
0x110d   : > { %5090 = vmatmul.msk.bf16.vlgmr.msrb.gmra.mxu0 %vm603_vm0, %v5086_v25  ;;  %v3506_v32 = vpop.permute.xlu0 %3505 }
0x110e   : > { %v3514_v49 = vadd.f32 %v3506_v32, %v3494_v54 }
0x110f   : > { %v3610_v51 = vpop.permute.xlu2 %3609 }
0x1110   : > { %v3518_v56 = vmax.f32 %v3514_v49, 0.0  ;;  %v5139_v49 = vld [vmem:[%s7081_s8 + $0x128] sm:$0xff] }
0x1113   : > { %5589 = vset.pattern.permute.xlu1 %v5658_v1 }
0x1114   : > { %3861 = vperm.xlu1 %5589, %v5149_v40  }
0x1116   : > { %v3480_v23 = vpop.permute.xlu0 %3479 }
0x1117   : > { %v3493_v55 = vmul.f32 %v3480_v23, %v6636_v8  ;;  %v3595_v0 = vpop.permute.xlu2 %3594 }
0x1119   : > { %v3513_v5 = vadd.f32 %v3502_v38, %v3493_v55 }
0x111b   : > { %v3517_v8 = vmax.f32 %v3513_v5, 0.0 }
0x111c   : > { %5592 = vset.pattern.permute.xlu1 %v5659_v3 }
0x111d   : > { %v3523_v10 = vpack.c.bf16 %v3517_v8, %v3516_v9  ;;  %v5124_v8 = vld [vmem:[%s7088_s15 + $0xa4] sm:$0xf]  ;;  %3876 = vperm.xlu1 %5592, %v5150_v11  }
0x111f   : > { %v3414_v26 = vpop.f32.mrf.mxu2  ;;  %v3626_v17 = vpop.permute.xlu0 %3625 }
0x1120   : > { %v3630_v57 = vpop.permute.xlu1 %3629  ;;  %v3634_v59 = vadd.f32 %v3626_v17, %v3614_v53  ;;  %v3618_v24 = vpop.permute.xlu2 %3617 }
0x1122   : > { %v3638_v22 = vmax.f32 %v3634_v59, 0.0  ;;  %v5125_v59 = vld [vmem:[%s7088_s15 + $0xa8] sm:$0xf] }
0x1127   : > { %v3416_v27 = vpop.f32.mrf.mxu2  ;;  %v3622_v58 = vpop.permute.xlu0 %3621 }
0x1129   : > { %v3600_v21 = vpop.permute.xlu1 %3599 }
0x1131   : > { %v3673_v23 = vpop.permute.xlu1 %3672 }
0x1163   : > { %v3688_v17 = vpop.permute.xlu1 %3687 }
0x1178   : > { %v3430_v31 = vpop.f32.mrf.mxu3 }
0x1179   : > { %v3431_v36 = vadd.f32 %v3430_v31, %v3414_v26 }
0x1180   : > { %v3432_v33 = vpop.f32.mrf.mxu3 }
0x1181   : > { %v5288_v33 = vld [vmem:[%s7087_s14 + $0x40] sm:$0xff] }
0x118a   : > { %v3457_v39 = vpop.f32.mrf.mxu0 }
0x118b   : > { %v3461_v46 = vadd.f32 %v3457_v39, %v3431_v36  ;;  %v3678_v39 = vpop.permute.xlu2 %3677 }
0x118d   : > { %3462 = vst.msk [vmem:[#allocation2 + $0x30] sm:$0xff] %vm838_vm2, %v3461_v46  ;;  %v3684_v46 = vpop.permute.xlu0 %3683 }
0x1192   : > { %v3459_v45 = vpop.f32.mrf.mxu0 }
0x1194   : > { %v6754_v43 = vld [vmem:[#allocation2 + $0x30] sm:$0xff] }
0x1195   : > { %v3615_v7 = vmul.f32 %v3610_v51, %v6754_v43  ;;  %v3495_v60 = vmul.f32 %v6754_v43, %v3490_v30 }
0x1197   : > { %v3635_v2 = vadd.f32 %v3630_v57, %v3615_v7  ;;  %v3515_v61 = vadd.f32 %v3510_v28, %v3495_v60 }
0x1199   : > { %v3639_v48 = vmax.f32 %v3635_v2, 0.0  ;;  %v3519_v6 = vmax.f32 %v3515_v61, 0.0  ;;  %v5181_v2 = vld [vmem:[%s7081_s8 + $0x140] sm:$0xff] }
0x119b   : > { %v3644_v29 = vpack.c.bf16 %v3639_v48, %v3638_v22  ;;  %v3524_v47 = vpack.c.bf16 %v3519_v6, %v3518_v56 }
0x119d   : > { %3539 = vmatpush.bf16.msra.mxu1 %v3524_v47  ;;  %3659 = vmatpush.bf16.msra.mxu3 %v3644_v29 }
0x11a1   : > { %3540 = vmatpush.bf16.msra.mxu1 %v3523_v10 }
0x11a4   : > { %5101 = vmatmul.msk.bf16.vlgmr.msra.gmra.mxu1 %vm838_vm2, %v5285_v44  ;;  %v3794_v44 = vpop.permute.xlu1 %3793 }
0x1221   : > { %v3542_v42 = vpop.f32.mrf.mxu1 }
0x1229   : > { %v3544_v15 = vpop.f32.mrf.mxu1 }
0x122a   : > { %v3551_v37 = vpack.c.bf16 %v3544_v15, %v3542_v42 }
0x122c   : > { %5110 = vmatmul.msk.bf16.vlgmr.msra.gmra.mxu2 %vm838_vm2, %v3551_v37  ;;  %v3819_v37 = vpop.permute.xlu1 %3818 }
0x12af   : > { %v3576_v20 = vpop.f32.mrf.mxu2 }
0x12b0   : > { %3581 = vst.msk [vmem:[#allocation2] sm:$0xff] %vm603_vm0, %v3576_v20 }
0x12b7   : > { %v3578_v19 = vpop.f32.mrf.mxu2  ;;  %v6790_v18 = vld [vmem:[#allocation2] sm:$0xff] }
0x12b8   : > { %3582 = vst.msk [vmem:[#allocation2 + $0x10] sm:$0xff] %vm603_vm0, %v3578_v19  ;;  %v3612_v52 = vmul.f32 %v3595_v0, %v6790_v18 }
0x12ba   : > { %v3632_v27 = vadd.f32 %v3618_v24, %v3612_v52 }
0x12bc   : > { %v3636_v30 = vmax.f32 %v3632_v27, 0.0 }
0x12bf   : > { %v6794_v25 = vld [vmem:[#allocation2 + $0x10] sm:$0xff] }
0x12c0   : > { %v3613_v26 = vmul.f32 %v3600_v21, %v6794_v25 }
0x12c2   : > { %v3633_v28 = vadd.f32 %v3622_v58, %v3613_v26  ;;  %v3807_v58 = vpop.permute.xlu1 %3806 }
0x12c4   : > { %v3637_v31 = vmax.f32 %v3633_v28, 0.0 }
0x12c6   : > { %v3643_v32 = vpack.c.bf16 %v3637_v31, %v3636_v30 }
0x12c8   : > { %3660 = vmatpush.bf16.msra.mxu3 %v3643_v32 }
0x12cb   : > { %5121 = vmatmul.msk.bf16.vlgmr.msra.gmra.mxu3 %vm838_vm2, %v5288_v33 }
0x134e   : > { %v3662_v36 = vpop.f32.mrf.mxu3 }
0x134f   : > { %v3680_v38 = vmul.f32 %v3673_v23, %v3662_v36  ;;  %v5289_v36 = vld [vmem:[%s7087_s14 + $0x48] sm:$0xff] }
0x1351   : > { %v3690_v45 = vadd.f32 %v3684_v46, %v3680_v38  ;;  %v5168_v38 = vld [vmem:[%s7084_s11 + $0x98] sm:$0xff] }
0x1353   : > { %v3692_v54 = vmax.f32 %v3690_v45, 0.0 }
0x1356   : > { %v3664_v41 = vpop.f32.mrf.mxu3 }
0x1357   : > { %v3681_v51 = vmul.f32 %v3678_v39, %v3664_v41  ;;  %v3862_v39 = vpop.permute.xlu1 %3861  ;;  %v5165_v41 = vld [vmem:[%s7084_s11 + $0x80] sm:$0xff] }
0x1359   : > { %v3691_v53 = vadd.f32 %v3688_v17, %v3681_v51 }
0x135b   : > { %v3693_v55 = vmax.f32 %v3691_v53, 0.0 }
0x135d   : > { %v5575_v63 = vpack.i.bf16 %v3693_v55, %v3692_v54  ;;  %v3709_v57 = vpack.c.bf16 %v3693_v55, %v3692_v54 }
0x135f   : > { %5581 = vrot.lane.b32.xlu0 %v5575_v63, %s7113_s22  ;;  %5576 = vrot.lane.b32.xlu2 %v5575_v63, %s7120_s0  ;;  %v3877_v54 = vpop.permute.xlu1 %3876 }
0x1360   : > { %3720 = vmatpush.bf16.msra.mxu0 %v3709_v57 }
0x1363   : > { %5126 = vmatmul.msk.bf16.vlgmr.msra.gmra.mxu0 %vm603_vm0, %v5125_v59 }
0x1367   : > { %3814 = vperm.xlu0 %5569, %v5140_v14   ;;  %3798 = vperm.xlu2 %5573, %v5141_v34  }
0x136f   : > { %5587 = vset.pattern.permute.xlu0 %v5658_v1  ;;  %3783 = vperm.xlu2 %5573, %v5138_v35  }
0x1370   : > { %3788 = vperm.xlu0 %5587, %v5139_v49  }
0x1377   : > { %5588 = vset.pattern.permute.xlu2 %v5659_v3 }
0x1378   : > { %3810 = vperm.xlu2 %5588, %v5139_v49   ;;  %5591 = vset.pattern.permute.xlu0 %v5659_v3 }
0x1379   : > { %3872 = vperm.xlu0 %5591, %v5149_v40   ;;  %v5151_v40 = vld [vmem:[%s7088_s15 + $0xb8] sm:$0xf] }
0x1380   : > { %5590 = vset.pattern.permute.xlu2 %v5658_v1 }
0x1381   : > { %3866 = vperm.xlu2 %5590, %v5150_v11   ;;  %5603 = vset.pattern.permute.xlu0 %v5658_v1 }
0x1382   : > { %3986 = vperm.xlu0 %5603, %v5168_v38  }
0x138a   : > { %5607 = vset.pattern.permute.xlu0 %v5659_v3 }
0x138b   : > { %3994 = vperm.xlu0 %5607, %v5165_v41  }
0x13b9   : > { %v5577_v7 = vpop.permute.xlu2 %5576 }
0x13ba   : > { %v5579_v60 = vunpack.i.h.bf16 %v5577_v7  ;;  %v5578_v5 = vunpack.i.l.bf16 %v5577_v7 }
0x13bc   : > { %v5135_v61 = vpack.c.bf16 %v5579_v60, %v5578_v5  ;;  %v5167_v5 = vld [vmem:[%s7084_s11 + $0x90] sm:$0xff] }
0x13be   : > { %5136 = vmatpush.bf16.msk.msrb.mxu2 %vm6821_vm1, %v5135_v61  ;;  %v5166_v61 = vld [vmem:[%s7084_s11 + $0x88] sm:$0xff] }
0x13c1   : > { %5137 = vmatmul.msk.bf16.vlgmr.msrb.gmra.mxu2 %vm603_vm0, %v5133_v4  ;;  %v3799_v12 = vpop.permute.xlu2 %3798  ;;  %v5183_v4 = vld [vmem:[%s7081_s8 + $0x150] sm:$0xff] }
0x13c2   : > { %v3804_v0 = vmul.f32 %v3799_v12, %v6754_v43 }
0x13c4   : > { %v3824_v21 = vadd.f32 %v3819_v37, %v3804_v0 }
0x13c6   : > { %v3828_v31 = vmax.f32 %v3824_v21, 0.0 }
0x13c9   : > { %v3784_v50 = vpop.permute.xlu2 %3783 }
0x13ca   : > { %v3801_v26 = vmul.f32 %v3784_v50, %v6790_v18 }
0x13cc   : > { %v3821_v32 = vadd.f32 %v3807_v58, %v3801_v26 }
0x13ce   : > { %v3825_v23 = vmax.f32 %v3821_v32, 0.0 }
0x13d1   : > { %v5582_v56 = vpop.permute.xlu0 %5581 }
0x13d2   : > { %v5584_v22 = vunpack.i.h.bf16 %v5582_v56  ;;  %v5583_v48 = vunpack.i.l.bf16 %v5582_v56  ;;  %v3811_v52 = vpop.permute.xlu2 %3810  ;;  %v5152_v56 = vld [vmem:[%s7088_s15 + $0xbc] sm:$0xf] }
0x13d4   : > { %v5130_v6 = vpack.c.bf16 %v5584_v22, %v5583_v48 }
0x13d6   : > { %5131 = vmatpush.bf16.msk.msrb.mxu1 %vm6484_vm10, %v5130_v6 }
0x13d9   : > { %5132 = vmatmul.msk.bf16.vlgmr.msrb.gmra.mxu1 %vm603_vm0, %v5124_v8  ;;  %v3815_v13 = vpop.permute.xlu0 %3814 }
0x13db   : > { %v3867_v51 = vpop.permute.xlu2 %3866 }
0x13e0   : > { %v3722_v29 = vpop.f32.mrf.mxu0 }
0x13e2   : > { %v3789_v20 = vpop.permute.xlu0 %3788 }
0x13e3   : > { %v3802_v19 = vmul.f32 %v3789_v20, %v6794_v25 }
0x13e5   : > { %v3822_v28 = vadd.f32 %v3811_v52, %v3802_v19 }
0x13e7   : > { %v3826_v34 = vmax.f32 %v3822_v28, 0.0 }
0x13e8   : > { %v3724_v47 = vpop.f32.mrf.mxu0 }
0x13e9   : > { %v3832_v43 = vpack.c.bf16 %v3826_v34, %v3825_v23  ;;  %v5184_v47 = vld [vmem:[%s7081_s8 + $0x158] sm:$0xff] }
0x13ea   : > { %4119 = vperm.xlu0 %5607, %v5184_v47  }
0x13eb   : > { %v3873_v45 = vpop.permute.xlu0 %3872 }
0x13f2   : > { %4107 = vperm.xlu0 %5607, %v5181_v2  }
0x13f4   : > { %v3987_v0 = vpop.permute.xlu0 %3986 }
0x13fa   : > { %5613 = vset.pattern.permute.xlu0 %v5658_v1 }
0x13fd   : > { %v3995_v58 = vpop.permute.xlu0 %3994 }
0x1444   : > { %v3766_v9 = vpop.f32.mrf.mxu2 }
0x144c   : > { %v3768_v10 = vpop.f32.mrf.mxu2 }
0x1456   : > { %v3738_v16 = vpop.f32.mrf.mxu1 }
0x1457   : > { %v3739_v42 = vadd.f32 %v3738_v16, %v3722_v29  ;;  %v5160_v29 = vld [vmem:[%s7088_s15 + $0xc0] sm:$0xf] }
0x1459   : > { %v3770_v15 = vadd.f32 %v3766_v9, %v3739_v42 }
0x145b   : > { %3771 = vst.msk [vmem:[#allocation2 + $0x20] sm:$0xff] %vm603_vm0, %v3770_v15 }
0x145e   : > { %v3740_v14 = vpop.f32.mrf.mxu1 }
0x1462   : > { %v6848_v24 = vld [vmem:[#allocation2 + $0x20] sm:$0xff] }
0x1463   : > { %v3803_v27 = vmul.f32 %v3794_v44, %v6848_v24 }
0x1465   : > { %v3823_v30 = vadd.f32 %v3815_v13, %v3803_v27 }
0x1467   : > { %v3827_v33 = vmax.f32 %v3823_v30, 0.0 }
0x1469   : > { %v3833_v35 = vpack.c.bf16 %v3828_v31, %v3827_v33 }
0x146b   : > { %3848 = vmatpush.bf16.msrb.mxu3 %v3833_v35 }
0x146f   : > { %3849 = vmatpush.bf16.msrb.mxu3 %v3832_v43 }
0x1472   : > { %5148 = vmatmul.msk.bf16.vlgmr.msrb.gmra.mxu3 %vm838_vm2, %v5289_v36 }
0x14f5   : > { %v3851_v46 = vpop.f32.mrf.mxu3 }
0x14f6   : > { %v3869_v17 = vmul.f32 %v3862_v39, %v3851_v46  ;;  %v4120_v46 = vpop.permute.xlu0 %4119 }
0x14f8   : > { %v3879_v55 = vadd.f32 %v3873_v45, %v3869_v17 }
0x14fa   : > { %v3881_v49 = vmax.f32 %v3879_v55, 0.0 }
0x14fd   : > { %v3853_v53 = vpop.f32.mrf.mxu3 }
0x14fe   : > { %v3870_v63 = vmul.f32 %v3867_v51, %v3853_v53 }
0x1500   : > { %v3880_v57 = vadd.f32 %v3877_v54, %v3870_v63 }
0x1502   : > { %v3882_v59 = vmax.f32 %v3880_v57, 0.0 }
0x1504   : > { %v5598_v7 = vpack.i.bf16 %v3882_v59, %v3881_v49  ;;  %v3898_v60 = vpack.c.bf16 %v3882_v59, %v3881_v49  ;;  %v5290_v59 = vld [vmem:[%s7090_s17 + $0x20] sm:$0xff] }
0x1506   : > { %5599 = vrot.lane.b32.xlu1 %v5598_v7, %s7113_s22  ;;  %5594 = vrot.lane.b32.xlu2 %v5598_v7, %s7120_s0  ;;  %v5291_v7 = vld [vmem:[%s7078_s5] sm:$0xff] }
0x1507   : > { %3909 = vmatpush.bf16.msrb.mxu0 %v3898_v60  ;;  %v5182_v60 = vld [vmem:[%s7081_s8 + $0x148] sm:$0xff] }
0x150a   : > { %5153 = vmatmul.msk.bf16.vlgmr.msrb.gmra.mxu0 %vm603_vm0, %v5152_v56 }
0x150b   : > { %4063 = vmatpush.bf16.msra.mxu0 %v5291_v7 }
0x150e   : > { %4002 = vperm.xlu1 %5592, %v5167_v5   ;;  %3981 = vperm.xlu2 %5590, %v5167_v5   ;;  %v5192_v5 = vld [vmem:[%s7082_s9 + $0xa0] sm:$0xff] }
0x1516   : > { %5605 = vset.pattern.permute.xlu1 %v5658_v1  ;;  %5604 = vset.pattern.permute.xlu2 %v5659_v3 }
0x1517   : > { %3971 = vperm.xlu1 %5605, %v5165_v41   ;;  %4006 = vperm.xlu2 %5604, %v5168_v38  }
0x151f   : > { %5608 = vset.pattern.permute.xlu1 %v5659_v3  ;;  %5606 = vset.pattern.permute.xlu2 %v5658_v1 }
0x1520   : > { %3998 = vperm.xlu1 %5608, %v5166_v61   ;;  %3976 = vperm.xlu2 %5606, %v5166_v61  }
0x1528   : > { %4094 = vperm.xlu2 %5606, %v5183_v4   ;;  %5609 = vset.pattern.permute.xlu1 %v5658_v1 }
0x1529   : > { %4099 = vperm.xlu1 %5609, %v5184_v47  }
0x1530   : > { %5610 = vset.pattern.permute.xlu2 %v5659_v3 }
0x1531   : > { %4115 = vperm.xlu2 %5610, %v5183_v4   ;;  %4084 = vperm.xlu1 %5609, %v5181_v2  }
0x1539   : > { %5611 = vset.pattern.permute.xlu2 %v5658_v1  ;;  %5612 = vset.pattern.permute.xlu1 %v5659_v3 }
0x153a   : > { %4111 = vperm.xlu1 %5612, %v5182_v60   ;;  %4089 = vperm.xlu2 %5611, %v5182_v60  }
0x1542   : > { %4173 = vperm.xlu1 %5612, %v5192_v5   ;;  %4162 = vperm.xlu2 %5611, %v5192_v5  }
0x154a   : > { %5614 = vset.pattern.permute.xlu2 %v5659_v3  ;;  %5625 = vset.pattern.permute.xlu1 %v5658_v1 }
0x1560   : > { %v5595_v22 = vpop.permute.xlu2 %5594 }
0x1561   : > { %v5597_v48 = vunpack.i.h.bf16 %v5595_v22  ;;  %v5596_v6 = vunpack.i.l.bf16 %v5595_v22  ;;  %v5193_v22 = vld [vmem:[%s7082_s9 + $0xa8] sm:$0xff] }
0x1562   : > { %4167 = vperm.xlu0 %5613, %v5193_v22   ;;  %4177 = vperm.xlu2 %5614, %v5193_v22  }
0x1563   : > { %v5162_v8 = vpack.c.bf16 %v5597_v48, %v5596_v6  ;;  %v5210_v6 = vld [vmem:[%s7081_s8 + $0x170] sm:$0xff] }
0x1565   : > { %5163 = vmatpush.bf16.msk.msra.mxu2 %vm6821_vm1, %v5162_v8 }
0x1568   : > { %5164 = vmatmul.msk.bf16.vlgmr.msra.gmra.mxu2 %vm603_vm0, %v5160_v29  ;;  %v3982_v16 = vpop.permute.xlu2 %3981 }
0x1569   : > { %v3991_v30 = vmul.f32 %v3982_v16, %v6848_v24 }
0x156a   : > { %4283 = vperm.xlu0 %5613, %v5210_v6  }
0x1571   : > { %v4007_v42 = vpop.permute.xlu2 %4006 }
0x1572   : > { %5626 = vset.pattern.permute.xlu0 %v5659_v3 }
0x1578   : > { %v5600_v9 = vpop.permute.xlu1 %5599 }
0x1579   : > { %v5602_v10 = vunpack.i.h.bf16 %v5600_v9  ;;  %v5601_v44 = vunpack.i.l.bf16 %v5600_v9 }
0x157a   : > { %v3977_v50 = vpop.permute.xlu2 %3976 }
0x157b   : > { %v5157_v12 = vpack.c.bf16 %v5602_v10, %v5601_v44  ;;  %v3990_v34 = vmul.f32 %v3977_v50, %v6794_v25  ;;  %v4108_v10 = vpop.permute.xlu0 %4107  ;;  %v5211_v50 = vld [vmem:[%s7081_s8 + $0x178] sm:$0xff] }
0x157c   : > { %4308 = vperm.xlu0 %5626, %v5211_v50  }
0x157d   : > { %5158 = vmatpush.bf16.msk.msra.mxu1 %vm6484_vm10, %v5157_v12 }
0x1580   : > { %5159 = vmatmul.msk.bf16.vlgmr.msra.gmra.mxu1 %vm603_vm0, %v5151_v40  ;;  %v4003_v15 = vpop.permute.xlu1 %4002 }
0x1581   : > { %v4011_v35 = vadd.f32 %v4003_v15, %v3991_v30 }
0x1582   : > { %v4095_v19 = vpop.permute.xlu2 %4094 }
0x1583   : > { %v4104_v33 = vmul.f32 %v4095_v19, %v6848_v24  ;;  %v4015_v51 = vmax.f32 %v4011_v35, 0.0  ;;  %v5209_v35 = vld [vmem:[%s7081_s8 + $0x168] sm:$0xff] }
0x1584   : > { %5630 = vset.pattern.permute.xlu0 %v5658_v1 }
0x1587   : > { %v3911_v11 = vpop.f32.mrf.mxu0 }
0x1589   : > { %v3972_v14 = vpop.permute.xlu1 %3971 }
0x158a   : > { %v3989_v43 = vmul.f32 %v3972_v14, %v6790_v18 }
0x158b   : > { %v4116_v31 = vpop.permute.xlu2 %4115 }
0x158c   : > { %v4124_v36 = vadd.f32 %v4116_v31, %v4104_v33  ;;  %v4009_v53 = vadd.f32 %v3995_v58, %v3989_v43  ;;  %v5220_v43 = vld [vmem:[%s7082_s9 + $0xb8] sm:$0xff] }
0x158e   : > { %v4128_v54 = vmax.f32 %v4124_v36, 0.0  ;;  %v4013_v49 = vmax.f32 %v4009_v53, 0.0  ;;  %v6972_v36 = vld [vmem:[%s7083_s10] sm:$0xff] }
0x158f   : > { %v3913_v13 = vpop.f32.mrf.mxu0 }
0x1592   : > { %v3999_v26 = vpop.permute.xlu1 %3998 }
0x1593   : > { %v4010_v41 = vadd.f32 %v3999_v26, %v3990_v34  ;;  %v5208_v34 = vld [vmem:[%s7081_s8 + $0x160] sm:$0xff] }
0x1594   : > { %v4090_v44 = vpop.permute.xlu2 %4089 }
0x1595   : > { %v4014_v25 = vmax.f32 %v4010_v41, 0.0 }
0x1597   : > { %v4020_v18 = vpack.c.bf16 %v4014_v25, %v4013_v49  ;;  %v5194_v25 = vld [vmem:[%s7088_s15 + $0xcc] sm:$0xf] }
0x159b   : > { %v4100_v32 = vpop.permute.xlu1 %4099 }
0x15a3   : > { %v4085_v8 = vpop.permute.xlu1 %4084 }
0x15eb   : > { %v3954_v37 = vpop.f32.mrf.mxu2 }
0x15f3   : > { %v3956_v20 = vpop.f32.mrf.mxu2 }
0x15f4   : > { %v4163_v20 = vpop.permute.xlu2 %4162 }
0x15fc   : > { %v4178_v26 = vpop.permute.xlu2 %4177 }
0x15fd   : > { %v3927_v52 = vpop.f32.mrf.mxu1 }
0x15fe   : > { %v3928_v21 = vadd.f32 %v3927_v52, %v3911_v11  ;;  %v4112_v11 = vpop.permute.xlu1 %4111  ;;  %v4168_v52 = vpop.permute.xlu0 %4167 }
0x1600   : > { %v3958_v27 = vadd.f32 %v3954_v37, %v3928_v21  ;;  %v5292_v37 = vld [vmem:[%s7087_s14 + $0x50] sm:$0xff] }
0x1602   : > { %3959 = vst.msk [vmem:[#allocation2 + $0x30] sm:$0xff] %vm603_vm0, %v3958_v27 }
0x1605   : > { %v3929_v28 = vpop.f32.mrf.mxu1 }
0x1606   : > { %v4174_v19 = vpop.permute.xlu1 %4173 }
0x1609   : > { %v6909_v23 = vld [vmem:[#allocation2 + $0x30] sm:$0xff] }
0x160a   : > { %v4105_v38 = vmul.f32 %v4100_v32, %v6909_v23  ;;  %v3992_v39 = vmul.f32 %v6909_v23, %v3987_v0 }
0x160c   : > { %v4125_v17 = vadd.f32 %v4120_v46, %v4105_v38  ;;  %v4012_v45 = vadd.f32 %v4007_v42, %v3992_v39  ;;  %v5195_v38 = vld [vmem:[%s7088_s15 + $0xd0] sm:$0xf] }
0x160e   : > { %v4129_v24 = vmax.f32 %v4125_v17, 0.0  ;;  %v4016_v55 = vmax.f32 %v4012_v45, 0.0 }
0x1610   : > { %v4134_v63 = vpack.c.bf16 %v4129_v24, %v4128_v54  ;;  %v4021_v57 = vpack.c.bf16 %v4016_v55, %v4015_v51  ;;  %v5203_v51 = vld [vmem:[%s7088_s15 + $0xd4] sm:$0xf] }
0x1612   : > { %4036 = vmatpush.bf16.msra.mxu3 %v4021_v57  ;;  %4149 = vmatpush.bf16.msrb.mxu1 %v4134_v63  ;;  %v5219_v63 = vld [vmem:[%s7082_s9 + $0xb0] sm:$0xff] }
0x1613   : > { %4351 = vperm.xlu0 %5630, %v5219_v63  }
0x1616   : > { %4037 = vmatpush.bf16.msra.mxu3 %v4020_v18 }
0x1619   : > { %5175 = vmatmul.msk.bf16.vlgmr.msra.gmra.mxu3 %vm838_vm2, %v5290_v59 }
0x161b   : > { %5645 = vset.pattern.permute.xlu0 %v5659_v3 }
0x169c   : > { %v4039_v61 = vpop.f32.mrf.mxu3 }
0x16a4   : > { %v4041_v4 = vpop.f32.mrf.mxu3 }
0x16a5   : > { %v4046_v56 = vpack.c.bf16 %v4041_v4, %v4039_v61  ;;  %v4284_v4 = vpop.permute.xlu0 %4283 }
0x16a7   : > { %5180 = vmatmul.msk.bf16.vlgmr.msra.gmra.mxu0 %vm603_vm0, %v4046_v56 }
0x1724   : > { %v4065_v48 = vpop.f32.mrf.mxu0 }
0x1725   : > { %4071 = vst.msk [vmem:[#allocation2] sm:$0xff] %vm4070_vm3, %v4065_v48 }
0x172c   : > { %v4067_v29 = vpop.f32.mrf.mxu0  ;;  %v6938_v47 = vld [vmem:[#allocation2] sm:$0xff] }
0x172d   : > { %4072 = vst.msk [vmem:[#allocation2 + $0x10] sm:$0xff] %vm4070_vm3, %v4067_v29  ;;  %v4102_v9 = vmul.f32 %v4085_v8, %v6938_v47  ;;  %v4309_v29 = vpop.permute.xlu0 %4308 }
0x172f   : > { %v4122_v2 = vadd.f32 %v4108_v10, %v4102_v9 }
0x1731   : > { %v4126_v16 = vmax.f32 %v4122_v2, 0.0 }
0x1734   : > { %v6942_v12 = vld [vmem:[#allocation2 + $0x10] sm:$0xff] }
0x1735   : > { %v4103_v40 = vmul.f32 %v4090_v44, %v6942_v12 }
0x1737   : > { %v4123_v13 = vadd.f32 %v4112_v11, %v4103_v40 }
0x1739   : > { %v4127_v42 = vmax.f32 %v4123_v13, 0.0 }
0x173b   : > { %v4133_v15 = vpack.c.bf16 %v4127_v42, %v4126_v16 }
0x173d   : > { %4150 = vmatpush.bf16.msrb.mxu1 %v4133_v15 }
0x1740   : > { %5191 = vmatmul.msk.bf16.vlgmr.msrb.gmra.mxu1 %vm838_vm2, %v5292_v37 }
0x17bd   : > { %v4152_v14 = vpop.f32.mrf.mxu1 }
0x17be   : > { %v4170_v0 = vmul.f32 %v4163_v20, %v4152_v14 }
0x17c0   : > { %v4180_v27 = vadd.f32 %v4174_v19, %v4170_v0  ;;  %v5293_v19 = vld [vmem:[%s7087_s14 + $0x58] sm:$0xff] }
0x17c2   : > { %v4182_v30 = vmax.f32 %v4180_v27, 0.0  ;;  %v4352_v27 = vpop.permute.xlu0 %4351 }
0x17c5   : > { %v4154_v21 = vpop.f32.mrf.mxu1 }
0x17c6   : > { %v4171_v58 = vmul.f32 %v4168_v52, %v4154_v21  ;;  %v4455_v52 = vld [vmem:[%s7083_s10 + $0x8] sm:$0xff] }
0x17c8   : > { %v4181_v28 = vadd.f32 %v4178_v26, %v4171_v58 }
0x17ca   : > { %v4183_v31 = vmax.f32 %v4181_v28, 0.0 }
0x17cc   : > { %v5620_v32 = vpack.i.bf16 %v4183_v31, %v4182_v30  ;;  %v4199_v33 = vpack.c.bf16 %v4183_v31, %v4182_v30 }
0x17ce   : > { %5621 = vrot.lane.b32.xlu2 %v5620_v32, %s7120_s0  ;;  %5616 = vrot.lane.b32.xlu1 %v5620_v32, %s7113_s22 }
0x17cf   : > { %4210 = vmatpush.bf16.msrb.mxu2 %v4199_v33 }
0x17d2   : > { %5196 = vmatmul.msk.bf16.vlgmr.msrb.gmra.mxu2 %vm603_vm0, %v5195_v38 }
0x17d6   : > { %4304 = vperm.xlu2 %5614, %v5210_v6   ;;  %4288 = vperm.xlu1 %5625, %v5211_v50  }
0x17de   : > { %5627 = vset.pattern.permute.xlu2 %v5658_v1  ;;  %4273 = vperm.xlu1 %5625, %v5208_v34  }
0x17df   : > { %4278 = vperm.xlu2 %5627, %v5209_v35  }
0x17e6   : > { %5628 = vset.pattern.permute.xlu1 %v5659_v3 }
0x17e7   : > { %5629 = vset.pattern.permute.xlu2 %v5659_v3  ;;  %4296 = vperm.xlu1 %5628, %v5208_v34  }
0x17e8   : > { %4300 = vperm.xlu2 %5629, %v5209_v35  }
0x17ef   : > { %5631 = vset.pattern.permute.xlu1 %v5658_v1 }
0x17f0   : > { %4356 = vperm.xlu1 %5631, %v5220_v43   ;;  %4362 = vperm.xlu2 %5629, %v5219_v63  }
0x17f8   : > { %5632 = vset.pattern.permute.xlu1 %v5659_v3  ;;  %5644 = vset.pattern.permute.xlu2 %v5658_v1 }
0x17f9   : > { %4366 = vperm.xlu1 %5632, %v5220_v43  }
0x1801   : > { %5643 = vset.pattern.permute.xlu1 %v5658_v1 }
0x1802   : > { %4460 = vperm.xlu1 %5643, %v6972_v36  }
0x180a   : > { %5646 = vset.pattern.permute.xlu1 %v5659_v3 }
0x180b   : > { %4487 = vperm.xlu1 %5646, %v4455_v52  }
0x1813   : > { %5647 = vset.pattern.permute.xlu1 %v5658_v1 }
0x1828   : > { %v5622_v39 = vpop.permute.xlu2 %5621 }
0x1829   : > { %v5624_v46 = vunpack.i.h.bf16 %v5622_v39  ;;  %v5623_v41 = vunpack.i.l.bf16 %v5622_v39 }
0x182b   : > { %v5205_v45 = vpack.c.bf16 %v5624_v46, %v5623_v41  ;;  %v4456_v46 = vld [vmem:[%s7083_s10 + $0x10] sm:$0xff]  ;;  %v5222_v41 = vld [vmem:[%s7088_s15 + $0xe4] sm:$0xf] }
0x182d   : > { %5206 = vmatpush.bf16.msk.msrb.mxu0 %vm6981_vm5, %v5205_v45 }
0x1830   : > { %5207 = vmatmul.msk.bf16.vlgmr.msrb.gmra.mxu0 %vm603_vm0, %v5203_v51  ;;  %v4305_v60 = vpop.permute.xlu2 %4304 }
0x1839   : > { %v4279_v48 = vpop.permute.xlu2 %4278 }
0x183a   : > { %v4292_v13 = vmul.f32 %v4279_v48, %v6942_v12 }
0x1840   : > { %v5617_v53 = vpop.permute.xlu1 %5616 }
0x1841   : > { %v5619_v54 = vunpack.i.h.bf16 %v5617_v53  ;;  %v5618_v24 = vunpack.i.l.bf16 %v5617_v53 }
0x1842   : > { %v4301_v11 = vpop.permute.xlu2 %4300 }
0x1843   : > { %v5200_v55 = vpack.c.bf16 %v5619_v54, %v5618_v24  ;;  %v4312_v15 = vadd.f32 %v4301_v11, %v4292_v13 }
0x1845   : > { %5201 = vmatpush.bf16.msk.msrb.mxu3 %vm6484_vm10, %v5200_v55  ;;  %v4457_v55 = vld [vmem:[%s7083_s10 + $0x18] sm:$0xff] }
0x1846   : > { %4475 = vperm.xlu1 %5647, %v4457_v55  }
0x1848   : > { %5202 = vmatmul.msk.bf16.vlgmr.msrb.gmra.mxu3 %vm603_vm0, %v5194_v25  ;;  %v4289_v7 = vpop.permute.xlu1 %4288 }
0x1849   : > { %v4294_v8 = vmul.f32 %v4289_v7, %v6909_v23  ;;  %v4316_v23 = vmax.f32 %v4312_v15, 0.0 }
0x184a   : > { %v4363_v28 = vpop.permute.xlu2 %4362 }
0x184b   : > { %v4314_v44 = vadd.f32 %v4309_v29, %v4294_v8 }
0x184d   : > { %v4318_v37 = vmax.f32 %v4314_v44, 0.0 }
0x1850   : > { %v4274_v56 = vpop.permute.xlu1 %4273 }
0x1851   : > { %v4291_v2 = vmul.f32 %v4274_v56, %v6938_v47 }
0x1855   : > { %v4212_v57 = vpop.f32.mrf.mxu2 }
0x1859   : > { %v4297_v9 = vpop.permute.xlu1 %4296 }
0x185a   : > { %v4311_v16 = vadd.f32 %v4297_v9, %v4291_v2 }
0x185c   : > { %v4315_v20 = vmax.f32 %v4311_v16, 0.0 }
0x185d   : > { %v4214_v49 = vpop.f32.mrf.mxu2 }
0x185e   : > { %v4322_v0 = vpack.c.bf16 %v4316_v23, %v4315_v20 }
0x1862   : > { %v4357_v21 = vpop.permute.xlu1 %4356 }
0x186b   : > { %v4367_v33 = vpop.permute.xlu1 %4366 }
0x1874   : > { %v4461_v25 = vpop.permute.xlu1 %4460 }
0x187d   : > { %v4488_v7 = vpop.permute.xlu1 %4487 }
0x18ad   : > { %v4256_v18 = vpop.f32.mrf.mxu0 }
0x18b5   : > { %v4258_v59 = vpop.f32.mrf.mxu0 }
0x18b8   : > { %v4476_v13 = vpop.permute.xlu1 %4475 }
0x18cb   : > { %v4228_v5 = vpop.f32.mrf.mxu3 }
0x18cc   : > { %v4229_v61 = vadd.f32 %v4228_v5, %v4212_v57  ;;  %v4478_v5 = vmul.f32 %v4461_v25, %v6938_v47 }
0x18ce   : > { %v4260_v22 = vadd.f32 %v4256_v18, %v4229_v61 }
0x18d0   : > { %4261 = vst.msk [vmem:[#allocation2 + $0x20] sm:$0xff] %vm4070_vm3, %v4260_v22 }
0x18d3   : > { %v4230_v6 = vpop.f32.mrf.mxu3 }
0x18d7   : > { %v7004_v10 = vld [vmem:[#allocation2 + $0x20] sm:$0xff] }
0x18d8   : > { %v4293_v40 = vmul.f32 %v4284_v4, %v7004_v10 }
0x18da   : > { %v4313_v42 = vadd.f32 %v4305_v60, %v4293_v40  ;;  %v5230_v60 = vld [vmem:[%s7088_s15 + $0xe8] sm:$0xf] }
0x18dc   : > { %v4317_v50 = vmax.f32 %v4313_v42, 0.0 }
0x18de   : > { %v4323_v14 = vpack.c.bf16 %v4318_v37, %v4317_v50 }
0x18e0   : > { %4338 = vmatpush.bf16.msra.mxu1 %v4323_v14 }
0x18e4   : > { %4339 = vmatpush.bf16.msra.mxu1 %v4322_v0 }
0x18e7   : > { %5218 = vmatmul.msk.bf16.vlgmr.msra.gmra.mxu1 %vm838_vm2, %v5293_v19 }
0x1964   : > { %v4341_v26 = vpop.f32.mrf.mxu1 }
0x1965   : > { %v4359_v58 = vmul.f32 %v4352_v27, %v4341_v26 }
0x1967   : > { %v4369_v31 = vadd.f32 %v4363_v28, %v4359_v58 }
0x1969   : > { %v4371_v35 = vmax.f32 %v4369_v31, 0.0 }
0x196c   : > { %v4343_v30 = vpop.f32.mrf.mxu1 }
0x196d   : > { %v4360_v32 = vmul.f32 %v4357_v21, %v4343_v30  ;;  %v5238_v30 = vld [vmem:[%s7089_s16 + $0x4] sm:$0xf] }
0x196f   : > { %v4370_v34 = vadd.f32 %v4367_v33, %v4360_v32  ;;  %v4538_v33 = vld [vmem:[%s7080_s7] sm:$0xff] }
0x1971   : > { %v4372_v43 = vmax.f32 %v4370_v34, 0.0 }
0x1973   : > { %v5638_v38 = vpack.i.bf16 %v4372_v43, %v4371_v35  ;;  %v4388_v39 = vpack.c.bf16 %v4372_v43, %v4371_v35 }
0x1975   : > { %5639 = vrot.lane.b32.xlu0 %v5638_v38, %s7120_s0  ;;  %5634 = vrot.lane.b32.xlu2 %v5638_v38, %s7113_s22 }
0x1976   : > { %4399 = vmatpush.bf16.msra.mxu2 %v4388_v39 }
0x1979   : > { %5223 = vmatmul.msk.bf16.vlgmr.msra.gmra.mxu2 %vm603_vm0, %v5222_v41 }
0x197d   : > { %4483 = vperm.xlu0 %5645, %v6972_v36   ;;  %4465 = vperm.xlu2 %5644, %v4455_v52   ;;  %v4506_v36 = vld [vmem:[%s7085_s12] sm:$0xf] }
0x197e   : > { %v4517_v24 = vsel %vm4515_vm6, %v4506_v36, 0 }
0x197f   : > { %4526 = vmatpush.bf16.msrb.mxu1 %v4517_v24 }
0x1985   : > { %4470 = vperm.xlu2 %5644, %v4456_v46   ;;  %4495 = vperm.xlu0 %5645, %v4457_v55  }
0x198d   : > { %5648 = vset.pattern.permute.xlu2 %v5659_v3  ;;  %v5221_v3 = vld [vmem:[%s7088_s15 + $0xe0] sm:$0xf]  ;;  %5649 = vset.pattern.permute.xlu0 %v5658_v1 }
0x198e   : > { %4491 = vperm.xlu2 %5648, %v4456_v46  }
0x19cf   : > { %v5635_v45 = vpop.permute.xlu2 %5634 }
0x19d0   : > { %v5637_v51 = vunpack.i.h.bf16 %v5635_v45  ;;  %v5636_v53 = vunpack.i.l.bf16 %v5635_v45 }
0x19d2   : > { %v5227_v54 = vpack.c.bf16 %v5637_v51, %v5636_v53 }
0x19d4   : > { %5228 = vmatpush.bf16.msk.msra.mxu3 %vm6484_vm10, %v5227_v54 }
0x19d7   : > { %5229 = vmatmul.msk.bf16.vlgmr.msra.gmra.mxu3 %vm603_vm0, %v5221_v3  ;;  %v4466_v63 = vpop.permute.xlu2 %4465 }
0x19d8   : > { %v4479_v18 = vmul.f32 %v4466_v63, %v6942_v12 }
0x19da   : > { %v4499_v61 = vadd.f32 %v4488_v7, %v4479_v18 }
0x19dc   : > { %v4503_v56 = vmax.f32 %v4499_v61, 0.0 }
0x19df   : > { %v4471_v29 = vpop.permute.xlu2 %4470 }
0x19e0   : > { %v4480_v16 = vmul.f32 %v4471_v29, %v7004_v10  ;;  %v4539_v10 = vld [vmem:[%s7089_s16] sm:$0xf] }
0x19e7   : > { %v5640_v57 = vpop.permute.xlu0 %5639 }
0x19e8   : > { %v5642_v62 = vunpack.i.h.bf16 %v5640_v57  ;;  %v5641_v49 = vunpack.i.l.bf16 %v5640_v57  ;;  %v4492_v47 = vpop.permute.xlu2 %4491 }
0x19e9   : > { %v4500_v15 = vadd.f32 %v4492_v47, %v4480_v16 }
0x19ea   : > { %v5232_v59 = vpack.c.bf16 %v5642_v62, %v5641_v49 }
0x19eb   : > { %v4504_v14 = vmax.f32 %v4500_v15, 0.0 }
0x19ec   : > { %5233 = vmatpush.bf16.msk.msra.mxu0 %vm6981_vm5, %v5232_v59 }
0x19ef   : > { %v4484_v1 = vpop.permute.xlu0 %4483  ;;  %5234 = vmatmul.msk.bf16.vlgmr.msra.gmra.mxu0 %vm603_vm0, %v5230_v60 }
0x19f0   : > { %v4498_v4 = vadd.f32 %v4484_v1, %v4478_v5 }
0x19f2   : > { %v4502_v22 = vmax.f32 %v4498_v4, 0.0 }
0x19f4   : > { %v4507_v48 = vpack.c.bf16 %v4503_v56, %v4502_v22 }
0x19f6   : > { %5235 = vmatmul.msk.bf16.vlgmr.msrb.gmra.mxu1 %vm4070_vm3, %v4507_v48 }
0x19f7   : > { %v4496_v50 = vpop.permute.xlu0 %4495 }
0x19fc   : > { %v4401_v12 = vpop.f32.mrf.mxu2 }
0x1a04   : > { %v4403_v6 = vpop.f32.mrf.mxu2 }
0x1a5a   : > { %v4417_v17 = vpop.f32.mrf.mxu3 }
0x1a5b   : > { %v4418_v9 = vadd.f32 %v4417_v17, %v4401_v12 }
0x1a62   : > { %v4419_v8 = vpop.f32.mrf.mxu3 }
0x1a6c   : > { %v4444_v44 = vpop.f32.mrf.mxu0 }
0x1a6d   : > { %v4448_v2 = vadd.f32 %v4444_v44, %v4418_v9 }
0x1a6f   : > { %4449 = vst.msk [vmem:[#allocation2 + $0x30] sm:$0xff] %vm4070_vm3, %v4448_v2 }
0x1a73   : > { %v4528_v40 = vpop.f32.mrf.mxu1 }
0x1a74   : > { %v4446_v11 = vpop.f32.mrf.mxu0 }
0x1a76   : > { %v4453_v42 = vld [vmem:[#allocation2 + $0x30] sm:$0xff] }
0x1a77   : > { %v4481_v37 = vmul.f32 %v4476_v13, %v4453_v42 }
0x1a79   : > { %v4501_v20 = vadd.f32 %v4496_v50, %v4481_v37 }
0x1a7b   : > { %v4505_v23 = vmax.f32 %v4501_v20, 0.0  ;;  %v4530_v0 = vpop.f32.mrf.mxu1 }
0x1a7c   : > { %v4540_v19 = vpack.c.bf16 %v4530_v0, %v4528_v40 }
0x1a7d   : > { %v4508_v52 = vpack.c.bf16 %v4505_v23, %v4504_v14 }
0x1a7e   : > { %4563 = vrot.lane.b32.xlu2 %v4540_v19, %s7120_s0 }
0x1a7f   : > { %5236 = vmatmul.msk.bf16.gmra.mxu1 %vm4070_vm3, %v4508_v52 }
0x1ad8   : > { %v4564_v28 = vpop.permute.xlu2 %4563 }
0x1afc   : > { %v4533_v21 = vpop.f32.mrf.mxu1 }
0x1b04   : > { %v4535_v26 = vpop.f32.mrf.mxu1 }
0x1b05   : > { %v4541_v27 = vpack.c.bf16 %v4535_v26, %v4533_v21 }
0x1b07   : > { %4565 = vrot.lane.b32.xlu1 %v4541_v27, %s7120_s0  ;;  %4551 = vmatpush.bf16.msrb.mxu2 %v4541_v27 }
0x1b0b   : > { %4552 = vmatpush.bf16.msrb.mxu2 %v4540_v19 }
0x1b0e   : > { %5237 = vmatmul.msk.bf16.vlgmr.msrb.gmra.mxu2 %vm838_vm2, %v4539_v10 }
0x1b79   : > { %v4566_v58 = vpop.permute.xlu1 %4565 }
0x1b7a   : > { %4578 = vmatpush.bf16.msrb.mxu3 %v4566_v58 }
0x1b7e   : > { %4579 = vmatpush.bf16.msrb.mxu3 %v4564_v28 }
0x1b81   : > { %5239 = vmatmul.msk.bf16.vlgmr.msrb.gmra.mxu3 %vm838_vm2, %v5238_v30 }
0x1b91   : > { %v4554_v31 = vpop.f32.mrf.mxu2 }
0x1b92   : > { %v4558_v34 = vadd.f32 %v4554_v31, %v4538_v33 }
0x1b99   : > { %v4556_v32 = vpop.f32.mrf.mxu2 }
0x1c04   : > { %v4581_v35 = vpop.f32.mrf.mxu3 }
0x1c05   : > { %v4585_v43 = vadd.f32 %v4581_v35, %v4558_v34 }
0x1c07   : > { %4588 = vperm.xlu0 %5649, %v4585_v43  }
0x1c0c   : > { %v4583_v38 = vpop.f32.mrf.mxu3 }
0x1c79   : > { %v4589_v39 = vpop.permute.xlu0 %4588 }
0x1c7a   : > { %4591 = vst [vmem:[%s573_s19] sm:$0xff] %v4589_v39 }
0x1c7b PF: > { %s28_s27 = sadd.s32 1, %s5656_s27  }
0x1c7c   : > { %p25_p4 = scmp.ge.s32.totalorder %s28_s27, 4  }
0x1c7e   :  { %27 = sbr.rel (!%p25_p4) target bundleno = 4 (0x4), region = 213 }

</bundles_post_ra>
